<compile_context>
chip_gen: v7x
topology: tpu7x:2x2x1
jax: 0.10.0
libtpu: 0.0.40
codegen_flags: <defaults>
</compile_context>

<pallas_src>
import functools

import jax
import jax.numpy as jnp
from jax.experimental import pallas as pl
from jax.experimental.pallas import tpu as pltpu


def _round_up(x, m):
    return (x + m - 1) // m * m


# ---------------------------------------------------------------------------
# Fused ensemble kernel
# ---------------------------------------------------------------------------

def _make_ensemble_kernel(T, B_pad, H_pad, n_rest):
    """grid = (M,): one grid step = one member's full forward."""
    H = H_pad

    def kernel(nlayers_ref, rest_idx_ref,   # SMEM (M,) int32 (scalar prefetch)
               x_ref,                       # (T*B_pad, I_pad) bf16, time-major, shared
               wih0_ref, whh0_ref, b0_ref,  # (1,I_pad,4H) bf16, (1,H,4H) bf16, (1,1,4H) f32
               wihr_ref, whhr_ref, br_ref,  # compacted: (1,n_rest,H,4H) bf16 x2, (1,n_rest,1,4H) f32
               whead_ref, bhead_ref,        # (1,H,L_pad) bf16, (1,1,L_pad) f32
               out_ref,                     # (1,B_pad,L_pad) f32
               gates_sc,                    # VMEM (T*B_pad, 4H) f32: staged pre-activations
               yseq_sc,                     # VMEM (T*B_pad, H) f32: inter-layer sequence
               hlast_sc):                   # VMEM (B_pad, H) f32: last hidden state
        m = pl.program_id(0)
        del rest_idx_ref  # only used by the index_maps

        def run_layer(whh_bf16, collect):
            """LSTM recurrence over gates_sc (already = x @ Wih + b)."""
            h = jnp.zeros((B_pad, H), jnp.float32)
            c = jnp.zeros((B_pad, H), jnp.float32)
            hs = []
            for t in range(T):                         # static -> fully unrolled
                g = gates_sc[t * B_pad:(t + 1) * B_pad, :] + jnp.dot(
                    h.astype(jnp.bfloat16), whh_bf16,
                    preferred_element_type=jnp.float32)
                i_g = jax.nn.sigmoid(g[:, 0 * H:1 * H])
                f_g = jax.nn.sigmoid(g[:, 1 * H:2 * H])
                g_g = jnp.tanh(g[:, 2 * H:3 * H])
                o_g = jax.nn.sigmoid(g[:, 3 * H:4 * H])
                c = f_g * c + i_g * g_g
                h = o_g * jnp.tanh(c)
                if collect:
                    hs.append(h)
            return h, hs

        # ----- layer 0: one big input-projection matmul, staged in VMEM.
        gates_sc[...] = jnp.dot(x_ref[...], wih0_ref[0],
                                preferred_element_type=jnp.float32) + b0_ref[0]
        h0, hs0 = run_layer(whh0_ref[0], collect=True)
        hlast_sc[...] = h0

        # Only write the layer-0 sequence if a deeper layer will consume it.
        @pl.when(nlayers_ref[m] > 1)
        def _():
            for t in range(T):
                yseq_sc[t * B_pad:(t + 1) * B_pad, :] = hs0[t]

        # ----- remaining layers (member-dependent depth, weights compacted).
        for l in range(n_rest):
            @pl.when(nlayers_ref[m] > l + 1)
            def _():
                gates_sc[...] = jnp.dot(
                    yseq_sc[...].astype(jnp.bfloat16), wihr_ref[0, l],
                    preferred_element_type=jnp.float32) + br_ref[0, l]
                h_l, hs_l = run_layer(whhr_ref[0, l],
                                      collect=(l < n_rest - 1))
                hlast_sc[...] = h_l
                if l < n_rest - 1:
                    for t in range(T):
                        yseq_sc[t * B_pad:(t + 1) * B_pad, :] = hs_l[t]

        # ----- head Linear on the last hidden state only.
        out_ref[0] = jnp.dot(hlast_sc[...].astype(jnp.bfloat16), whead_ref[0],
                             preferred_element_type=jnp.float32) + bhead_ref[0]

    return kernel


# ---------------------------------------------------------------------------
# Parameter init (deterministic, PyTorch-style uniform(-1/sqrt(H), 1/sqrt(H)))
# ---------------------------------------------------------------------------

def _uniform(key, shape, bound):
    return jax.random.uniform(key, shape, jnp.float32, -bound, bound)


def init_ensemble_params(key, input_size, head_out, member_cfg):
    """member_cfg: list of (num_layers, hidden_size) per member (deterministic
    stand-in for the np.random choices in __init__)."""
    members = []
    for (num_layers, H) in member_cfg:
        layers = []
        k = 1.0 / float(jnp.sqrt(jnp.float32(H)))
        for l in range(num_layers):
            in_dim = input_size if l == 0 else H
            key, k1, k2, k3, k4 = jax.random.split(key, 5)
            wih = _uniform(k1, (in_dim, 4 * H), k)        # torch W_ih^T
            whh = _uniform(k2, (H, 4 * H), k)             # torch W_hh^T
            b = _uniform(k3, (1, 4 * H), k) + _uniform(k4, (1, 4 * H), k)
            layers.append((wih, whh, b))
        key, k5, k6 = jax.random.split(key, 3)
        w_head = _uniform(k5, (H, head_out), k)           # torch Linear weight^T
        b_head = _uniform(k6, (1, head_out), k)
        members.append({"layers": layers, "w_head": w_head, "b_head": b_head})
    return members


# ---------------------------------------------------------------------------
# Packing: pad H -> 128, I -> 128, L -> 128, stack over members (bf16 weights).
# Padded gate columns / head rows are zero so padding contributes exactly 0.
# Members are reordered heaviest-last (output is permutation-invariant).
# ---------------------------------------------------------------------------

def _pad_gate_cols(w, H, H_pad):
    if H == H_pad:
        return w
    blocks = [jnp.pad(w[:, g * H:(g + 1) * H], ((0, 0), (0, H_pad - H)))
              for g in range(4)]
    return jnp.concatenate(blocks, axis=1)


def _pad_rows(w, rows_pad):
    r = w.shape[0]
    return w if r == rows_pad else jnp.pad(w, ((0, rows_pad - r), (0, 0)))


def pack_ensemble(members, member_cfg, input_size, head_out):
    # Heaviest member (most layers / largest H) goes last, so on v7x the lone
    # TensorCore of the 2/1 split gets it and the light members share a core.
    order = sorted(range(len(members)),
                   key=lambda i: (member_cfg[i][0], member_cfg[i][1]))
    member_cfg = [member_cfg[i] for i in order]
    members = [members[i] for i in order]

    M = len(members)
    H_pad = _round_up(max(h for _, h in member_cfg), 128)
    I_pad = _round_up(input_size, 128)
    L_pad = _round_up(head_out, 128)
    max_layers = max(nl for nl, _ in member_cfg)
    n_rest = max(1, max_layers - 1)
    bf16 = jnp.bfloat16

    wih0, whh0, b0 = [], [], []
    whead, bhead = [], []
    rest_w, rest_u, rest_b = [], [], []     # compacted: only members with >1 layer
    rest_idx = []

    for (num_layers, H), mem in zip(member_cfg, members):
        layers = mem["layers"]
        w, u, b = layers[0]
        wih0.append(_pad_rows(_pad_gate_cols(w, H, H_pad), I_pad).astype(bf16))
        whh0.append(_pad_rows(_pad_gate_cols(u, H, H_pad), H_pad).astype(bf16))
        b0.append(_pad_gate_cols(b, H, H_pad))

        if num_layers > 1:
            rest_idx.append(len(rest_w))
            wr, ur, brr = [], [], []
            for l in range(1, n_rest + 1):
                if l < num_layers:
                    w_l, u_l, b_l = layers[l]
                    wr.append(_pad_rows(_pad_gate_cols(w_l, H, H_pad), H_pad).astype(bf16))
                    ur.append(_pad_rows(_pad_gate_cols(u_l, H, H_pad), H_pad).astype(bf16))
                    brr.append(_pad_gate_cols(b_l, H, H_pad))
                else:  # inactive extra layer: zeros (skipped by pl.when anyway)
                    wr.append(jnp.zeros((H_pad, 4 * H_pad), bf16))
                    ur.append(jnp.zeros((H_pad, 4 * H_pad), bf16))
                    brr.append(jnp.zeros((1, 4 * H_pad), jnp.float32))
            rest_w.append(jnp.stack(wr))
            rest_u.append(jnp.stack(ur))
            rest_b.append(jnp.stack(brr))
        else:
            # 1-layer member: alias block 0 (never read thanks to pl.when);
            # identical index across steps lets the pipeline skip the DMA.
            rest_idx.append(0)

        whead.append(jnp.pad(mem["w_head"],
                             ((0, H_pad - H), (0, L_pad - head_out))).astype(bf16))
        bhead.append(jnp.pad(mem["b_head"], ((0, 0), (0, L_pad - head_out))))

    if not rest_w:  # all members are 1-layer: keep one dummy block to index
        rest_w = [jnp.zeros((n_rest, H_pad, 4 * H_pad), bf16)]
        rest_u = [jnp.zeros((n_rest, H_pad, 4 * H_pad), bf16)]
        rest_b = [jnp.zeros((n_rest, 1, 4 * H_pad), jnp.float32)]

    return dict(
        nlayers=jnp.array([nl for nl, _ in member_cfg], jnp.int32),
        rest_idx=jnp.array(rest_idx, jnp.int32),
        wih0=jnp.stack(wih0), whh0=jnp.stack(whh0), b0=jnp.stack(b0),
        wihr=jnp.stack(rest_w), whhr=jnp.stack(rest_u), br=jnp.stack(rest_b),
        whead=jnp.stack(whead), bhead=jnp.stack(bhead),
        dims=dict(M=M, I=input_size, I_pad=I_pad, H_pad=H_pad,
                  L=head_out, L_pad=L_pad, n_rest=n_rest),
    )


# ---------------------------------------------------------------------------
# Forward pass
# ---------------------------------------------------------------------------

def deep_ensemble_forward(packed, x_btf):
    d = packed["dims"]
    B, T, I = x_btf.shape
    assert I == d["I"]
    B_pad = _round_up(B, 8)
    I_pad, H_pad, L_pad = d["I_pad"], d["H_pad"], d["L_pad"]
    M, n_rest, L = d["M"], d["n_rest"], d["L"]
    TB = T * B_pad
    H4 = 4 * H_pad

    # (B,T,I) -> time-major, batch/lane padded, flattened to (T*B_pad, I_pad) bf16.
    x_tbi = jnp.transpose(x_btf, (1, 0, 2))
    x_tbi = jnp.pad(x_tbi, ((0, 0), (0, B_pad - B), (0, I_pad - I)))
    x2d = x_tbi.reshape(TB, I_pad).astype(jnp.bfloat16)

    kernel = _make_ensemble_kernel(T, B_pad, H_pad, n_rest)

    grid_spec = pltpu.PrefetchScalarGridSpec(
        num_scalar_prefetch=2,
        grid=(M,),
        in_specs=[
            pl.BlockSpec((TB, I_pad), lambda m, nl, ri: (0, 0)),           # x (shared)
            pl.BlockSpec((1, I_pad, H4), lambda m, nl, ri: (m, 0, 0)),     # Wih layer0
            pl.BlockSpec((1, H_pad, H4), lambda m, nl, ri: (m, 0, 0)),     # Whh layer0
            pl.BlockSpec((1, 1, H4), lambda m, nl, ri: (m, 0, 0)),         # b layer0
            pl.BlockSpec((1, n_rest, H_pad, H4),
                         lambda m, nl, ri: (ri[m], 0, 0, 0)),              # Wih rest (compacted)
            pl.BlockSpec((1, n_rest, H_pad, H4),
                         lambda m, nl, ri: (ri[m], 0, 0, 0)),              # Whh rest (compacted)
            pl.BlockSpec((1, n_rest, 1, H4),
                         lambda m, nl, ri: (ri[m], 0, 0, 0)),              # b rest (compacted)
            pl.BlockSpec((1, H_pad, L_pad), lambda m, nl, ri: (m, 0, 0)),  # head W
            pl.BlockSpec((1, 1, L_pad), lambda m, nl, ri: (m, 0, 0)),      # head b
        ],
        out_specs=pl.BlockSpec((1, B_pad, L_pad), lambda m, nl, ri: (m, 0, 0)),
        scratch_shapes=[pltpu.VMEM((TB, H4), jnp.float32),      # gates
                        pltpu.VMEM((TB, H_pad), jnp.float32),   # inter-layer seq
                        pltpu.VMEM((B_pad, H_pad), jnp.float32)],  # last hidden
    )

    preds_pad = pl.pallas_call(
        kernel,
        grid_spec=grid_spec,
        out_shape=jax.ShapeDtypeStruct((M, B_pad, L_pad), jnp.float32),
        compiler_params=pltpu.CompilerParams(
            dimension_semantics=("parallel",)),
    )(packed["nlayers"], packed["rest_idx"], x2d,
      packed["wih0"], packed["whh0"], packed["b0"],
      packed["wihr"], packed["whhr"], packed["br"],
      packed["whead"], packed["bhead"])

    preds = preds_pad[:, :B, :L]                  # (M, B, L)
    mean = jnp.mean(preds, axis=0)                # (B, L)
    std = jnp.std(preds, axis=0, ddof=1)          # torch.std default (unbiased)
    return mean, std


# ---------------------------------------------------------------------------
# Pure-JAX reference (f32) for a loose correctness check.
# ---------------------------------------------------------------------------

def deep_ensemble_reference(members, member_cfg, x_btf):
    B, T, _ = x_btf.shape
    preds = []
    for (num_layers, H), mem in zip(member_cfg, members):
        h = [jnp.zeros((B, H), jnp.float32) for _ in range(num_layers)]
        c = [jnp.zeros((B, H), jnp.float32) for _ in range(num_layers)]
        for t in range(T):
            inp = x_btf[:, t, :]
            for l in range(num_layers):
                w, u, b = mem["layers"][l]
                g = inp @ w + h[l] @ u + b
                i_g = jax.nn.sigmoid(g[:, 0 * H:1 * H])
                f_g = jax.nn.sigmoid(g[:, 1 * H:2 * H])
                g_g = jnp.tanh(g[:, 2 * H:3 * H])
                o_g = jax.nn.sigmoid(g[:, 3 * H:4 * H])
                c[l] = f_g * c[l] + i_g * g_g
                h[l] = o_g * jnp.tanh(c[l])
                inp = h[l]
        preds.append(h[-1] @ mem["w_head"] + mem["b_head"])
    preds = jnp.stack(preds)                      # (M, B, L)
    return preds.mean(axis=0), jnp.std(preds, axis=0, ddof=1)


# ---------------------------------------------------------------------------

if __name__ == "__main__":
    # Module defaults: input_size=83, latent_dim=1, output_size=1,
    # output_sequence_length=86, num_ensemble_members=3.
    B, T = 2, 8
    input_size, latent_dim = 83, 1
    I = input_size + latent_dim                   # 84
    out_seq_len, out_size = 86, 1
    L = out_seq_len * out_size                    # 86

    # Deterministic stand-in for np.random.randint(1,3)/np.random.choice([...]):
    member_cfg = [(1, 64), (2, 128), (1, 64)]     # (num_layers, hidden_size)

    members = init_ensemble_params(jax.random.PRNGKey(0), I, L, member_cfg)
    packed = pack_ensemble(members, member_cfg, I, L)
    x = jax.random.normal(jax.random.PRNGKey(1), (B, T, I), jnp.float32)

    fwd = jax.jit(functools.partial(deep_ensemble_forward, packed))
    mean_pred, epistemic_unc = fwd(x)
    jax.block_until_ready((mean_pred, epistemic_unc))

    assert mean_pred.shape == (B, L), mean_pred.shape
    assert epistemic_unc.shape == (B, L), epistemic_unc.shape
    assert bool(jnp.all(jnp.isfinite(mean_pred)))
    assert bool(jnp.all(jnp.isfinite(epistemic_unc)))
    assert bool(jnp.all(epistemic_unc >= 0))

    # Loose check vs f32 reference (kernel uses bf16 weights).
    ref_mean, ref_std = deep_ensemble_reference(members, member_cfg, x)
    assert bool(jnp.allclose(mean_pred, ref_mean, atol=0.1, rtol=0.1)), (
        float(jnp.max(jnp.abs(mean_pred - ref_mean))))
    assert bool(jnp.allclose(epistemic_unc, ref_std, atol=0.1, rtol=0.1)), (
        float(jnp.max(jnp.abs(epistemic_unc - ref_std))))

    # TODO(synk): training (.fit with per-member loss choices), save/load and
    # the untrained-model warning are host-side logic, not kernel work.
    print("KERNEL_OK")
</pallas_src>

<mosaic_0001>
module attributes {stable_mosaic.version = 11 : i64} {
  func.func @kernel(%arg0: i32, %arg1: memref<3xi32, #tpu.memory_space<smem>>, %arg2: memref<3xi32, #tpu.memory_space<smem>>, %arg3: memref<64x128xbf16, #tpu.memory_space<vmem>>, %arg4: memref<1x128x512xbf16, #tpu.memory_space<vmem>>, %arg5: memref<1x128x512xbf16, #tpu.memory_space<vmem>>, %arg6: memref<1x1x512xf32, #tpu.memory_space<vmem>>, %arg7: memref<1x1x128x512xbf16, #tpu.memory_space<vmem>>, %arg8: memref<1x1x128x512xbf16, #tpu.memory_space<vmem>>, %arg9: memref<1x1x1x512xf32, #tpu.memory_space<vmem>>, %arg10: memref<1x128x128xbf16, #tpu.memory_space<vmem>>, %arg11: memref<1x1x128xf32, #tpu.memory_space<vmem>>, %arg12: memref<1x8x128xf32, #tpu.memory_space<vmem>>, %arg13: memref<64x512xf32, #tpu.memory_space<vmem>>, %arg14: memref<64x128xf32, #tpu.memory_space<vmem>>, %arg15: memref<8x128xf32, #tpu.memory_space<vmem>>) attributes {dimension_semantics = [#tpu.dimension_semantics<parallel>], iteration_bounds = array<i64: 3>, scalar_prefetch = 2 : i64, scratch_operands = 3 : i64, tpu.core_type = #tpu.core_type<tc>, window_params = [{pipeline_mode = #tpu.pipeline_mode<synchronous>, transform_indices = @transform_0, window_bounds = array<i64: 64, 128>}, {transform_indices = @transform_1, window_bounds = array<i64: 1, 128, 512>}, {transform_indices = @transform_2, window_bounds = array<i64: 1, 128, 512>}, {transform_indices = @transform_3, window_bounds = array<i64: 1, 1, 512>}, {transform_indices = @transform_4, window_bounds = array<i64: 1, 1, 128, 512>}, {transform_indices = @transform_5, window_bounds = array<i64: 1, 1, 128, 512>}, {transform_indices = @transform_6, window_bounds = array<i64: 1, 1, 1, 512>}, {transform_indices = @transform_7, window_bounds = array<i64: 1, 128, 128>}, {transform_indices = @transform_8, window_bounds = array<i64: 1, 1, 128>}, {transform_indices = @transform_9, window_bounds = array<i64: 1, 8, 128>}]} {
    %c0 = arith.constant 0 : index
    %c0_0 = arith.constant 0 : index
    %0 = vector.load %arg3[%c0, %c0_0] : memref<64x128xbf16, #tpu.memory_space<vmem>>, vector<64x128xbf16>
    %c0_1 = arith.constant 0 : index
    %c0_2 = arith.constant 0 : index
    %c0_3 = arith.constant 0 : index
    %1 = vector.load %arg4[%c0_1, %c0_2, %c0_3] : memref<1x128x512xbf16, #tpu.memory_space<vmem>>, vector<1x128x512xbf16>
    %2 = vector.shape_cast %1 : vector<1x128x512xbf16> to vector<128x512xbf16>
    %cst = arith.constant dense<0.000000e+00> : vector<64x512xf32>
    %3 = tpu.matmul %0, %2, %cst {dimension_numbers = #tpu.dot_dimension_numbers<[1], [0], [0], [1], [0, 0, 1, 1], [], []>} : vector<64x128xbf16>, vector<128x512xbf16>, vector<64x512xf32> -> vector<64x512xf32>
    %c0_4 = arith.constant 0 : index
    %c0_5 = arith.constant 0 : index
    %c0_6 = arith.constant 0 : index
    %4 = vector.load %arg6[%c0_4, %c0_5, %c0_6] : memref<1x1x512xf32, #tpu.memory_space<vmem>>, vector<1x1x512xf32>
    %5 = vector.shape_cast %4 : vector<1x1x512xf32> to vector<1x512xf32>
    %6 = vector.broadcast %5 : vector<1x512xf32> to vector<64x512xf32>
    %7 = arith.addf %3, %6 : vector<64x512xf32>
    %c0_7 = arith.constant 0 : index
    %c0_8 = arith.constant 0 : index
    %8 = vector.load %arg13[%c0_7, %c0_8] : memref<64x512xf32, #tpu.memory_space<vmem>>, vector<64x512xf32>
    tpu.vector_store %arg13[%c0_7, %c0_8], %7 {strides = array<i32>} : memref<64x512xf32, #tpu.memory_space<vmem>>, vector<64x512xf32>,
    %c0_9 = arith.constant 0 : index
    %c0_10 = arith.constant 0 : index
    %c0_11 = arith.constant 0 : index
    %9 = vector.load %arg5[%c0_9, %c0_10, %c0_11] : memref<1x128x512xbf16, #tpu.memory_space<vmem>>, vector<1x128x512xbf16>
    %10 = vector.shape_cast %9 : vector<1x128x512xbf16> to vector<128x512xbf16>
    %cst_12 = arith.constant 0.000000e+00 : f32
    %11 = vector.broadcast %cst_12 : f32 to vector<8x128xf32>
    %cst_13 = arith.constant 0.000000e+00 : f32
    %12 = vector.broadcast %cst_13 : f32 to vector<8x128xf32>
    %c0_14 = arith.constant 0 : index
    %c0_15 = arith.constant 0 : index
    %13 = vector.load %arg13[%c0_14, %c0_15] : memref<64x512xf32, #tpu.memory_space<vmem>>, vector<8x512xf32>
    %14 = arith.truncf %11 : vector<8x128xf32> to vector<8x128xbf16>
    %cst_16 = arith.constant dense<0.000000e+00> : vector<8x512xf32>
    %15 = tpu.matmul %14, %10, %cst_16 {dimension_numbers = #tpu.dot_dimension_numbers<[1], [0], [0], [1], [0, 0, 1, 1], [], []>} : vector<8x128xbf16>, vector<128x512xbf16>, vector<8x512xf32> -> vector<8x512xf32>
    %16 = arith.addf %13, %15 : vector<8x512xf32>
    %17 = vector.extract_strided_slice %16 {offsets = [0, 0], sizes = [8, 128], strides = [1, 1]} : vector<8x512xf32> to vector<8x128xf32>
    %18 = arith.negf %17 : vector<8x128xf32>
    %19 = math.exp %18 : vector<8x128xf32>
    %cst_17 = arith.constant 1.000000e+00 : f32
    %20 = vector.broadcast %cst_17 : f32 to vector<8x128xf32>
    %21 = arith.addf %20, %19 : vector<8x128xf32>
    %22 = arith.divf %20, %21 : vector<8x128xf32>
    %23 = vector.extract_strided_slice %16 {offsets = [0, 128], sizes = [8, 128], strides = [1, 1]} : vector<8x512xf32> to vector<8x128xf32>
    %24 = arith.negf %23 : vector<8x128xf32>
    %25 = math.exp %24 : vector<8x128xf32>
    %cst_18 = arith.constant 1.000000e+00 : f32
    %26 = vector.broadcast %cst_18 : f32 to vector<8x128xf32>
    %27 = arith.addf %26, %25 : vector<8x128xf32>
    %28 = arith.divf %26, %27 : vector<8x128xf32>
    %29 = vector.extract_strided_slice %16 {offsets = [0, 256], sizes = [8, 128], strides = [1, 1]} : vector<8x512xf32> to vector<8x128xf32>
    %30 = math.tanh %29 : vector<8x128xf32>
    %31 = vector.extract_strided_slice %16 {offsets = [0, 384], sizes = [8, 128], strides = [1, 1]} : vector<8x512xf32> to vector<8x128xf32>
    %32 = arith.negf %31 : vector<8x128xf32>
    %33 = math.exp %32 : vector<8x128xf32>
    %cst_19 = arith.constant 1.000000e+00 : f32
    %34 = vector.broadcast %cst_19 : f32 to vector<8x128xf32>
    %35 = arith.addf %34, %33 : vector<8x128xf32>
    %36 = arith.divf %34, %35 : vector<8x128xf32>
    %37 = arith.mulf %28, %12 : vector<8x128xf32>
    %38 = arith.mulf %22, %30 : vector<8x128xf32>
    %39 = arith.addf %37, %38 : vector<8x128xf32>
    %40 = math.tanh %39 : vector<8x128xf32>
    %41 = arith.mulf %36, %40 : vector<8x128xf32>
    %c8 = arith.constant 8 : index
    %c0_20 = arith.constant 0 : index
    %42 = vector.load %arg13[%c8, %c0_20] : memref<64x512xf32, #tpu.memory_space<vmem>>, vector<8x512xf32>
    %43 = arith.truncf %41 : vector<8x128xf32> to vector<8x128xbf16>
    %cst_21 = arith.constant dense<0.000000e+00> : vector<8x512xf32>
    %44 = tpu.matmul %43, %10, %cst_21 {dimension_numbers = #tpu.dot_dimension_numbers<[1], [0], [0], [1], [0, 0, 1, 1], [], []>} : vector<8x128xbf16>, vector<128x512xbf16>, vector<8x512xf32> -> vector<8x512xf32>
    %45 = arith.addf %42, %44 : vector<8x512xf32>
    %46 = vector.extract_strided_slice %45 {offsets = [0, 0], sizes = [8, 128], strides = [1, 1]} : vector<8x512xf32> to vector<8x128xf32>
    %47 = arith.negf %46 : vector<8x128xf32>
    %48 = math.exp %47 : vector<8x128xf32>
    %cst_22 = arith.constant 1.000000e+00 : f32
    %49 = vector.broadcast %cst_22 : f32 to vector<8x128xf32>
    %50 = arith.addf %49, %48 : vector<8x128xf32>
    %51 = arith.divf %49, %50 : vector<8x128xf32>
    %52 = vector.extract_strided_slice %45 {offsets = [0, 128], sizes = [8, 128], strides = [1, 1]} : vector<8x512xf32> to vector<8x128xf32>
    %53 = arith.negf %52 : vector<8x128xf32>
    %54 = math.exp %53 : vector<8x128xf32>
    %cst_23 = arith.constant 1.000000e+00 : f32
    %55 = vector.broadcast %cst_23 : f32 to vector<8x128xf32>
    %56 = arith.addf %55, %54 : vector<8x128xf32>
    %57 = arith.divf %55, %56 : vector<8x128xf32>
    %58 = vector.extract_strided_slice %45 {offsets = [0, 256], sizes = [8, 128], strides = [1, 1]} : vector<8x512xf32> to vector<8x128xf32>
    %59 = math.tanh %58 : vector<8x128xf32>
    %60 = vector.extract_strided_slice %45 {offsets = [0, 384], sizes = [8, 128], strides = [1, 1]} : vector<8x512xf32> to vector<8x128xf32>
    %61 = arith.negf %60 : vector<8x128xf32>
    %62 = math.exp %61 : vector<8x128xf32>
    %cst_24 = arith.constant 1.000000e+00 : f32
    %63 = vector.broadcast %cst_24 : f32 to vector<8x128xf32>
    %64 = arith.addf %63, %62 : vector<8x128xf32>
    %65 = arith.divf %63, %64 : vector<8x128xf32>
    %66 = arith.mulf %57, %39 : vector<8x128xf32>
    %67 = arith.mulf %51, %59 : vector<8x128xf32>
    %68 = arith.addf %66, %67 : vector<8x128xf32>
    %69 = math.tanh %68 : vector<8x128xf32>
    %70 = arith.mulf %65, %69 : vector<8x128xf32>
    %c16 = arith.constant 16 : index
    %c0_25 = arith.constant 0 : index
    %71 = vector.load %arg13[%c16, %c0_25] : memref<64x512xf32, #tpu.memory_space<vmem>>, vector<8x512xf32>
    %72 = arith.truncf %70 : vector<8x128xf32> to vector<8x128xbf16>
    %cst_26 = arith.constant dense<0.000000e+00> : vector<8x512xf32>
    %73 = tpu.matmul %72, %10, %cst_26 {dimension_numbers = #tpu.dot_dimension_numbers<[1], [0], [0], [1], [0, 0, 1, 1], [], []>} : vector<8x128xbf16>, vector<128x512xbf16>, vector<8x512xf32> -> vector<8x512xf32>
    %74 = arith.addf %71, %73 : vector<8x512xf32>
    %75 = vector.extract_strided_slice %74 {offsets = [0, 0], sizes = [8, 128], strides = [1, 1]} : vector<8x512xf32> to vector<8x128xf32>
    %76 = arith.negf %75 : vector<8x128xf32>
    %77 = math.exp %76 : vector<8x128xf32>
    %cst_27 = arith.constant 1.000000e+00 : f32
    %78 = vector.broadcast %cst_27 : f32 to vector<8x128xf32>
    %79 = arith.addf %78, %77 : vector<8x128xf32>
    %80 = arith.divf %78, %79 : vector<8x128xf32>
    %81 = vector.extract_strided_slice %74 {offsets = [0, 128], sizes = [8, 128], strides = [1, 1]} : vector<8x512xf32> to vector<8x128xf32>
    %82 = arith.negf %81 : vector<8x128xf32>
    %83 = math.exp %82 : vector<8x128xf32>
    %cst_28 = arith.constant 1.000000e+00 : f32
    %84 = vector.broadcast %cst_28 : f32 to vector<8x128xf32>
    %85 = arith.addf %84, %83 : vector<8x128xf32>
    %86 = arith.divf %84, %85 : vector<8x128xf32>
    %87 = vector.extract_strided_slice %74 {offsets = [0, 256], sizes = [8, 128], strides = [1, 1]} : vector<8x512xf32> to vector<8x128xf32>
    %88 = math.tanh %87 : vector<8x128xf32>
    %89 = vector.extract_strided_slice %74 {offsets = [0, 384], sizes = [8, 128], strides = [1, 1]} : vector<8x512xf32> to vector<8x128xf32>
    %90 = arith.negf %89 : vector<8x128xf32>
    %91 = math.exp %90 : vector<8x128xf32>
    %cst_29 = arith.constant 1.000000e+00 : f32
    %92 = vector.broadcast %cst_29 : f32 to vector<8x128xf32>
    %93 = arith.addf %92, %91 : vector<8x128xf32>
    %94 = arith.divf %92, %93 : vector<8x128xf32>
    %95 = arith.mulf %86, %68 : vector<8x128xf32>
    %96 = arith.mulf %80, %88 : vector<8x128xf32>
    %97 = arith.addf %95, %96 : vector<8x128xf32>
    %98 = math.tanh %97 : vector<8x128xf32>
    %99 = arith.mulf %94, %98 : vector<8x128xf32>
    %c24 = arith.constant 24 : index
    %c0_30 = arith.constant 0 : index
    %100 = vector.load %arg13[%c24, %c0_30] : memref<64x512xf32, #tpu.memory_space<vmem>>, vector<8x512xf32>
    %101 = arith.truncf %99 : vector<8x128xf32> to vector<8x128xbf16>
    %cst_31 = arith.constant dense<0.000000e+00> : vector<8x512xf32>
    %102 = tpu.matmul %101, %10, %cst_31 {dimension_numbers = #tpu.dot_dimension_numbers<[1], [0], [0], [1], [0, 0, 1, 1], [], []>} : vector<8x128xbf16>, vector<128x512xbf16>, vector<8x512xf32> -> vector<8x512xf32>
    %103 = arith.addf %100, %102 : vector<8x512xf32>
    %104 = vector.extract_strided_slice %103 {offsets = [0, 0], sizes = [8, 128], strides = [1, 1]} : vector<8x512xf32> to vector<8x128xf32>
    %105 = arith.negf %104 : vector<8x128xf32>
    %106 = math.exp %105 : vector<8x128xf32>
    %cst_32 = arith.constant 1.000000e+00 : f32
    %107 = vector.broadcast %cst_32 : f32 to vector<8x128xf32>
    %108 = arith.addf %107, %106 : vector<8x128xf32>
    %109 = arith.divf %107, %108 : vector<8x128xf32>
    %110 = vector.extract_strided_slice %103 {offsets = [0, 128], sizes = [8, 128], strides = [1, 1]} : vector<8x512xf32> to vector<8x128xf32>
    %111 = arith.negf %110 : vector<8x128xf32>
    %112 = math.exp %111 : vector<8x128xf32>
    %cst_33 = arith.constant 1.000000e+00 : f32
    %113 = vector.broadcast %cst_33 : f32 to vector<8x128xf32>
    %114 = arith.addf %113, %112 : vector<8x128xf32>
    %115 = arith.divf %113, %114 : vector<8x128xf32>
    %116 = vector.extract_strided_slice %103 {offsets = [0, 256], sizes = [8, 128], strides = [1, 1]} : vector<8x512xf32> to vector<8x128xf32>
    %117 = math.tanh %116 : vector<8x128xf32>
    %118 = vector.extract_strided_slice %103 {offsets = [0, 384], sizes = [8, 128], strides = [1, 1]} : vector<8x512xf32> to vector<8x128xf32>
    %119 = arith.negf %118 : vector<8x128xf32>
    %120 = math.exp %119 : vector<8x128xf32>
    %cst_34 = arith.constant 1.000000e+00 : f32
    %121 = vector.broadcast %cst_34 : f32 to vector<8x128xf32>
    %122 = arith.addf %121, %120 : vector<8x128xf32>
    %123 = arith.divf %121, %122 : vector<8x128xf32>
    %124 = arith.mulf %115, %97 : vector<8x128xf32>
    %125 = arith.mulf %109, %117 : vector<8x128xf32>
    %126 = arith.addf %124, %125 : vector<8x128xf32>
    %127 = math.tanh %126 : vector<8x128xf32>
    %128 = arith.mulf %123, %127 : vector<8x128xf32>
    %c32 = arith.constant 32 : index
    %c0_35 = arith.constant 0 : index
    %129 = vector.load %arg13[%c32, %c0_35] : memref<64x512xf32, #tpu.memory_space<vmem>>, vector<8x512xf32>
    %130 = arith.truncf %128 : vector<8x128xf32> to vector<8x128xbf16>
    %cst_36 = arith.constant dense<0.000000e+00> : vector<8x512xf32>
    %131 = tpu.matmul %130, %10, %cst_36 {dimension_numbers = #tpu.dot_dimension_numbers<[1], [0], [0], [1], [0, 0, 1, 1], [], []>} : vector<8x128xbf16>, vector<128x512xbf16>, vector<8x512xf32> -> vector<8x512xf32>
    %132 = arith.addf %129, %131 : vector<8x512xf32>
    %133 = vector.extract_strided_slice %132 {offsets = [0, 0], sizes = [8, 128], strides = [1, 1]} : vector<8x512xf32> to vector<8x128xf32>
    %134 = arith.negf %133 : vector<8x128xf32>
    %135 = math.exp %134 : vector<8x128xf32>
    %cst_37 = arith.constant 1.000000e+00 : f32
    %136 = vector.broadcast %cst_37 : f32 to vector<8x128xf32>
    %137 = arith.addf %136, %135 : vector<8x128xf32>
    %138 = arith.divf %136, %137 : vector<8x128xf32>
    %139 = vector.extract_strided_slice %132 {offsets = [0, 128], sizes = [8, 128], strides = [1, 1]} : vector<8x512xf32> to vector<8x128xf32>
    %140 = arith.negf %139 : vector<8x128xf32>
    %141 = math.exp %140 : vector<8x128xf32>
    %cst_38 = arith.constant 1.000000e+00 : f32
    %142 = vector.broadcast %cst_38 : f32 to vector<8x128xf32>
    %143 = arith.addf %142, %141 : vector<8x128xf32>
    %144 = arith.divf %142, %143 : vector<8x128xf32>
    %145 = vector.extract_strided_slice %132 {offsets = [0, 256], sizes = [8, 128], strides = [1, 1]} : vector<8x512xf32> to vector<8x128xf32>
    %146 = math.tanh %145 : vector<8x128xf32>
    %147 = vector.extract_strided_slice %132 {offsets = [0, 384], sizes = [8, 128], strides = [1, 1]} : vector<8x512xf32> to vector<8x128xf32>
    %148 = arith.negf %147 : vector<8x128xf32>
    %149 = math.exp %148 : vector<8x128xf32>
    %cst_39 = arith.constant 1.000000e+00 : f32
    %150 = vector.broadcast %cst_39 : f32 to vector<8x128xf32>
    %151 = arith.addf %150, %149 : vector<8x128xf32>
    %152 = arith.divf %150, %151 : vector<8x128xf32>
    %153 = arith.mulf %144, %126 : vector<8x128xf32>
    %154 = arith.mulf %138, %146 : vector<8x128xf32>
    %155 = arith.addf %153, %154 : vector<8x128xf32>
    %156 = math.tanh %155 : vector<8x128xf32>
    %157 = arith.mulf %152, %156 : vector<8x128xf32>
    %c40 = arith.constant 40 : index
    %c0_40 = arith.constant 0 : index
    %158 = vector.load %arg13[%c40, %c0_40] : memref<64x512xf32, #tpu.memory_space<vmem>>, vector<8x512xf32>
    %159 = arith.truncf %157 : vector<8x128xf32> to vector<8x128xbf16>
    %cst_41 = arith.constant dense<0.000000e+00> : vector<8x512xf32>
    %160 = tpu.matmul %159, %10, %cst_41 {dimension_numbers = #tpu.dot_dimension_numbers<[1], [0], [0], [1], [0, 0, 1, 1], [], []>} : vector<8x128xbf16>, vector<128x512xbf16>, vector<8x512xf32> -> vector<8x512xf32>
    %161 = arith.addf %158, %160 : vector<8x512xf32>
    %162 = vector.extract_strided_slice %161 {offsets = [0, 0], sizes = [8, 128], strides = [1, 1]} : vector<8x512xf32> to vector<8x128xf32>
    %163 = arith.negf %162 : vector<8x128xf32>
    %164 = math.exp %163 : vector<8x128xf32>
    %cst_42 = arith.constant 1.000000e+00 : f32
    %165 = vector.broadcast %cst_42 : f32 to vector<8x128xf32>
    %166 = arith.addf %165, %164 : vector<8x128xf32>
    %167 = arith.divf %165, %166 : vector<8x128xf32>
    %168 = vector.extract_strided_slice %161 {offsets = [0, 128], sizes = [8, 128], strides = [1, 1]} : vector<8x512xf32> to vector<8x128xf32>
    %169 = arith.negf %168 : vector<8x128xf32>
    %170 = math.exp %169 : vector<8x128xf32>
    %cst_43 = arith.constant 1.000000e+00 : f32
    %171 = vector.broadcast %cst_43 : f32 to vector<8x128xf32>
    %172 = arith.addf %171, %170 : vector<8x128xf32>
    %173 = arith.divf %171, %172 : vector<8x128xf32>
    %174 = vector.extract_strided_slice %161 {offsets = [0, 256], sizes = [8, 128], strides = [1, 1]} : vector<8x512xf32> to vector<8x128xf32>
    %175 = math.tanh %174 : vector<8x128xf32>
    %176 = vector.extract_strided_slice %161 {offsets = [0, 384], sizes = [8, 128], strides = [1, 1]} : vector<8x512xf32> to vector<8x128xf32>
    %177 = arith.negf %176 : vector<8x128xf32>
    %178 = math.exp %177 : vector<8x128xf32>
    %cst_44 = arith.constant 1.000000e+00 : f32
    %179 = vector.broadcast %cst_44 : f32 to vector<8x128xf32>
    %180 = arith.addf %179, %178 : vector<8x128xf32>
    %181 = arith.divf %179, %180 : vector<8x128xf32>
    %182 = arith.mulf %173, %155 : vector<8x128xf32>
    %183 = arith.mulf %167, %175 : vector<8x128xf32>
    %184 = arith.addf %182, %183 : vector<8x128xf32>
    %185 = math.tanh %184 : vector<8x128xf32>
    %186 = arith.mulf %181, %185 : vector<8x128xf32>
    %c48 = arith.constant 48 : index
    %c0_45 = arith.constant 0 : index
    %187 = vector.load %arg13[%c48, %c0_45] : memref<64x512xf32, #tpu.memory_space<vmem>>, vector<8x512xf32>
    %188 = arith.truncf %186 : vector<8x128xf32> to vector<8x128xbf16>
    %cst_46 = arith.constant dense<0.000000e+00> : vector<8x512xf32>
    %189 = tpu.matmul %188, %10, %cst_46 {dimension_numbers = #tpu.dot_dimension_numbers<[1], [0], [0], [1], [0, 0, 1, 1], [], []>} : vector<8x128xbf16>, vector<128x512xbf16>, vector<8x512xf32> -> vector<8x512xf32>
    %190 = arith.addf %187, %189 : vector<8x512xf32>
    %191 = vector.extract_strided_slice %190 {offsets = [0, 0], sizes = [8, 128], strides = [1, 1]} : vector<8x512xf32> to vector<8x128xf32>
    %192 = arith.negf %191 : vector<8x128xf32>
    %193 = math.exp %192 : vector<8x128xf32>
    %cst_47 = arith.constant 1.000000e+00 : f32
    %194 = vector.broadcast %cst_47 : f32 to vector<8x128xf32>
    %195 = arith.addf %194, %193 : vector<8x128xf32>
    %196 = arith.divf %194, %195 : vector<8x128xf32>
    %197 = vector.extract_strided_slice %190 {offsets = [0, 128], sizes = [8, 128], strides = [1, 1]} : vector<8x512xf32> to vector<8x128xf32>
    %198 = arith.negf %197 : vector<8x128xf32>
    %199 = math.exp %198 : vector<8x128xf32>
    %cst_48 = arith.constant 1.000000e+00 : f32
    %200 = vector.broadcast %cst_48 : f32 to vector<8x128xf32>
    %201 = arith.addf %200, %199 : vector<8x128xf32>
    %202 = arith.divf %200, %201 : vector<8x128xf32>
    %203 = vector.extract_strided_slice %190 {offsets = [0, 256], sizes = [8, 128], strides = [1, 1]} : vector<8x512xf32> to vector<8x128xf32>
    %204 = math.tanh %203 : vector<8x128xf32>
    %205 = vector.extract_strided_slice %190 {offsets = [0, 384], sizes = [8, 128], strides = [1, 1]} : vector<8x512xf32> to vector<8x128xf32>
    %206 = arith.negf %205 : vector<8x128xf32>
    %207 = math.exp %206 : vector<8x128xf32>
    %cst_49 = arith.constant 1.000000e+00 : f32
    %208 = vector.broadcast %cst_49 : f32 to vector<8x128xf32>
    %209 = arith.addf %208, %207 : vector<8x128xf32>
    %210 = arith.divf %208, %209 : vector<8x128xf32>
    %211 = arith.mulf %202, %184 : vector<8x128xf32>
    %212 = arith.mulf %196, %204 : vector<8x128xf32>
    %213 = arith.addf %211, %212 : vector<8x128xf32>
    %214 = math.tanh %213 : vector<8x128xf32>
    %215 = arith.mulf %210, %214 : vector<8x128xf32>
    %c56 = arith.constant 56 : index
    %c0_50 = arith.constant 0 : index
    %216 = vector.load %arg13[%c56, %c0_50] : memref<64x512xf32, #tpu.memory_space<vmem>>, vector<8x512xf32>
    %217 = arith.truncf %215 : vector<8x128xf32> to vector<8x128xbf16>
    %cst_51 = arith.constant dense<0.000000e+00> : vector<8x512xf32>
    %218 = tpu.matmul %217, %10, %cst_51 {dimension_numbers = #tpu.dot_dimension_numbers<[1], [0], [0], [1], [0, 0, 1, 1], [], []>} : vector<8x128xbf16>, vector<128x512xbf16>, vector<8x512xf32> -> vector<8x512xf32>
    %219 = arith.addf %216, %218 : vector<8x512xf32>
    %220 = vector.extract_strided_slice %219 {offsets = [0, 0], sizes = [8, 128], strides = [1, 1]} : vector<8x512xf32> to vector<8x128xf32>
    %221 = arith.negf %220 : vector<8x128xf32>
    %222 = math.exp %221 : vector<8x128xf32>
    %cst_52 = arith.constant 1.000000e+00 : f32
    %223 = vector.broadcast %cst_52 : f32 to vector<8x128xf32>
    %224 = arith.addf %223, %222 : vector<8x128xf32>
    %225 = arith.divf %223, %224 : vector<8x128xf32>
    %226 = vector.extract_strided_slice %219 {offsets = [0, 128], sizes = [8, 128], strides = [1, 1]} : vector<8x512xf32> to vector<8x128xf32>
    %227 = arith.negf %226 : vector<8x128xf32>
    %228 = math.exp %227 : vector<8x128xf32>
    %cst_53 = arith.constant 1.000000e+00 : f32
    %229 = vector.broadcast %cst_53 : f32 to vector<8x128xf32>
    %230 = arith.addf %229, %228 : vector<8x128xf32>
    %231 = arith.divf %229, %230 : vector<8x128xf32>
    %232 = vector.extract_strided_slice %219 {offsets = [0, 256], sizes = [8, 128], strides = [1, 1]} : vector<8x512xf32> to vector<8x128xf32>
    %233 = math.tanh %232 : vector<8x128xf32>
    %234 = vector.extract_strided_slice %219 {offsets = [0, 384], sizes = [8, 128], strides = [1, 1]} : vector<8x512xf32> to vector<8x128xf32>
    %235 = arith.negf %234 : vector<8x128xf32>
    %236 = math.exp %235 : vector<8x128xf32>
    %cst_54 = arith.constant 1.000000e+00 : f32
    %237 = vector.broadcast %cst_54 : f32 to vector<8x128xf32>
    %238 = arith.addf %237, %236 : vector<8x128xf32>
    %239 = arith.divf %237, %238 : vector<8x128xf32>
    %240 = arith.mulf %231, %213 : vector<8x128xf32>
    %241 = arith.mulf %225, %233 : vector<8x128xf32>
    %242 = arith.addf %240, %241 : vector<8x128xf32>
    %243 = math.tanh %242 : vector<8x128xf32>
    %244 = arith.mulf %239, %243 : vector<8x128xf32>
    %c0_55 = arith.constant 0 : index
    %c0_56 = arith.constant 0 : index
    %245 = vector.load %arg15[%c0_55, %c0_56] : memref<8x128xf32, #tpu.memory_space<vmem>>, vector<8x128xf32>
    tpu.vector_store %arg15[%c0_55, %c0_56], %244 {strides = array<i32>} : memref<8x128xf32, #tpu.memory_space<vmem>>, vector<8x128xf32>,
    %246 = arith.index_cast %arg0 : i32 to index
    %247 = memref.load %arg1[%246] : memref<3xi32, #tpu.memory_space<smem>>
    %c1_i32 = arith.constant 1 : i32
    %248 = arith.cmpi sgt, %247, %c1_i32 : i32
    %249 = arith.extui %248 : i1 to i32
    %c0_i32 = arith.constant 0 : i32
    %250 = arith.cmpi ne, %249, %c0_i32 : i32
    scf.if %250 {
      %c0_71 = arith.constant 0 : index
      %c0_72 = arith.constant 0 : index
      %268 = vector.load %arg14[%c0_71, %c0_72] : memref<64x128xf32, #tpu.memory_space<vmem>>, vector<8x128xf32>
      tpu.vector_store %arg14[%c0_71, %c0_72], %41 {strides = array<i32>} : memref<64x128xf32, #tpu.memory_space<vmem>>, vector<8x128xf32>,
      %c8_73 = arith.constant 8 : index
      %c0_74 = arith.constant 0 : index
      %269 = vector.load %arg14[%c8_73, %c0_74] : memref<64x128xf32, #tpu.memory_space<vmem>>, vector<8x128xf32>
      tpu.vector_store %arg14[%c8_73, %c0_74], %70 {strides = array<i32>} : memref<64x128xf32, #tpu.memory_space<vmem>>, vector<8x128xf32>,
      %c16_75 = arith.constant 16 : index
      %c0_76 = arith.constant 0 : index
      %270 = vector.load %arg14[%c16_75, %c0_76] : memref<64x128xf32, #tpu.memory_space<vmem>>, vector<8x128xf32>
      tpu.vector_store %arg14[%c16_75, %c0_76], %99 {strides = array<i32>} : memref<64x128xf32, #tpu.memory_space<vmem>>, vector<8x128xf32>,
      %c24_77 = arith.constant 24 : index
      %c0_78 = arith.constant 0 : index
      %271 = vector.load %arg14[%c24_77, %c0_78] : memref<64x128xf32, #tpu.memory_space<vmem>>, vector<8x128xf32>
      tpu.vector_store %arg14[%c24_77, %c0_78], %128 {strides = array<i32>} : memref<64x128xf32, #tpu.memory_space<vmem>>, vector<8x128xf32>,
      %c32_79 = arith.constant 32 : index
      %c0_80 = arith.constant 0 : index
      %272 = vector.load %arg14[%c32_79, %c0_80] : memref<64x128xf32, #tpu.memory_space<vmem>>, vector<8x128xf32>
      tpu.vector_store %arg14[%c32_79, %c0_80], %157 {strides = array<i32>} : memref<64x128xf32, #tpu.memory_space<vmem>>, vector<8x128xf32>,
      %c40_81 = arith.constant 40 : index
      %c0_82 = arith.constant 0 : index
      %273 = vector.load %arg14[%c40_81, %c0_82] : memref<64x128xf32, #tpu.memory_space<vmem>>, vector<8x128xf32>
      tpu.vector_store %arg14[%c40_81, %c0_82], %186 {strides = array<i32>} : memref<64x128xf32, #tpu.memory_space<vmem>>, vector<8x128xf32>,
      %c48_83 = arith.constant 48 : index
      %c0_84 = arith.constant 0 : index
      %274 = vector.load %arg14[%c48_83, %c0_84] : memref<64x128xf32, #tpu.memory_space<vmem>>, vector<8x128xf32>
      tpu.vector_store %arg14[%c48_83, %c0_84], %215 {strides = array<i32>} : memref<64x128xf32, #tpu.memory_space<vmem>>, vector<8x128xf32>,
      %c56_85 = arith.constant 56 : index
      %c0_86 = arith.constant 0 : index
      %275 = vector.load %arg14[%c56_85, %c0_86] : memref<64x128xf32, #tpu.memory_space<vmem>>, vector<8x128xf32>
      tpu.vector_store %arg14[%c56_85, %c0_86], %244 {strides = array<i32>} : memref<64x128xf32, #tpu.memory_space<vmem>>, vector<8x128xf32>,
    } else {
    }
    %251 = arith.index_cast %arg0 : i32 to index
    %252 = memref.load %arg1[%251] : memref<3xi32, #tpu.memory_space<smem>>
    %c1_i32_57 = arith.constant 1 : i32
    %253 = arith.cmpi sgt, %252, %c1_i32_57 : i32
    %254 = arith.extui %253 : i1 to i32
    %c0_i32_58 = arith.constant 0 : i32
    %255 = arith.cmpi ne, %254, %c0_i32_58 : i32
    scf.if %255 {
      %c0_71 = arith.constant 0 : index
      %c0_72 = arith.constant 0 : index
      %268 = vector.load %arg14[%c0_71, %c0_72] : memref<64x128xf32, #tpu.memory_space<vmem>>, vector<64x128xf32>
      %269 = arith.truncf %268 : vector<64x128xf32> to vector<64x128xbf16>
      %c0_73 = arith.constant 0 : index
      %c0_74 = arith.constant 0 : index
      %c0_75 = arith.constant 0 : index
      %c0_76 = arith.constant 0 : index
      %270 = vector.load %arg7[%c0_73, %c0_74, %c0_75, %c0_76] : memref<1x1x128x512xbf16, #tpu.memory_space<vmem>>, vector<1x1x128x512xbf16>
      %271 = vector.shape_cast %270 : vector<1x1x128x512xbf16> to vector<128x512xbf16>
      %cst_77 = arith.constant dense<0.000000e+00> : vector<64x512xf32>
      %272 = tpu.matmul %269, %271, %cst_77 {dimension_numbers = #tpu.dot_dimension_numbers<[1], [0], [0], [1], [0, 0, 1, 1], [], []>} : vector<64x128xbf16>, vector<128x512xbf16>, vector<64x512xf32> -> vector<64x512xf32>
      %c0_78 = arith.constant 0 : index
      %c0_79 = arith.constant 0 : index
      %c0_80 = arith.constant 0 : index
      %c0_81 = arith.constant 0 : index
      %273 = vector.load %arg9[%c0_78, %c0_79, %c0_80, %c0_81] : memref<1x1x1x512xf32, #tpu.memory_space<vmem>>, vector<1x1x1x512xf32>
      %274 = vector.shape_cast %273 : vector<1x1x1x512xf32> to vector<1x512xf32>
      %275 = vector.broadcast %274 : vector<1x512xf32> to vector<64x512xf32>
      %276 = arith.addf %272, %275 : vector<64x512xf32>
      %c0_82 = arith.constant 0 : index
      %c0_83 = arith.constant 0 : index
      %277 = vector.load %arg13[%c0_82, %c0_83] : memref<64x512xf32, #tpu.memory_space<vmem>>, vector<64x512xf32>
      tpu.vector_store %arg13[%c0_82, %c0_83], %276 {strides = array<i32>} : memref<64x512xf32, #tpu.memory_space<vmem>>, vector<64x512xf32>,
      %c0_84 = arith.constant 0 : index
      %c0_85 = arith.constant 0 : index
      %c0_86 = arith.constant 0 : index
      %c0_87 = arith.constant 0 : index
      %278 = vector.load %arg8[%c0_84, %c0_85, %c0_86, %c0_87] : memref<1x1x128x512xbf16, #tpu.memory_space<vmem>>, vector<1x1x128x512xbf16>
      %279 = vector.shape_cast %278 : vector<1x1x128x512xbf16> to vector<128x512xbf16>
      %cst_88 = arith.constant 0.000000e+00 : f32
      %280 = vector.broadcast %cst_88 : f32 to vector<8x128xf32>
      %cst_89 = arith.constant 0.000000e+00 : f32
      %281 = vector.broadcast %cst_89 : f32 to vector<8x128xf32>
      %c0_90 = arith.constant 0 : index
      %c0_91 = arith.constant 0 : index
      %282 = vector.load %arg13[%c0_90, %c0_91] : memref<64x512xf32, #tpu.memory_space<vmem>>, vector<8x512xf32>
      %283 = arith.truncf %280 : vector<8x128xf32> to vector<8x128xbf16>
      %cst_92 = arith.constant dense<0.000000e+00> : vector<8x512xf32>
      %284 = tpu.matmul %283, %279, %cst_92 {dimension_numbers = #tpu.dot_dimension_numbers<[1], [0], [0], [1], [0, 0, 1, 1], [], []>} : vector<8x128xbf16>, vector<128x512xbf16>, vector<8x512xf32> -> vector<8x512xf32>
      %285 = arith.addf %282, %284 : vector<8x512xf32>
      %286 = vector.extract_strided_slice %285 {offsets = [0, 0], sizes = [8, 128], strides = [1, 1]} : vector<8x512xf32> to vector<8x128xf32>
      %287 = arith.negf %286 : vector<8x128xf32>
      %288 = math.exp %287 : vector<8x128xf32>
      %cst_93 = arith.constant 1.000000e+00 : f32
      %289 = vector.broadcast %cst_93 : f32 to vector<8x128xf32>
      %290 = arith.addf %289, %288 : vector<8x128xf32>
      %291 = arith.divf %289, %290 : vector<8x128xf32>
      %292 = vector.extract_strided_slice %285 {offsets = [0, 128], sizes = [8, 128], strides = [1, 1]} : vector<8x512xf32> to vector<8x128xf32>
      %293 = arith.negf %292 : vector<8x128xf32>
      %294 = math.exp %293 : vector<8x128xf32>
      %cst_94 = arith.constant 1.000000e+00 : f32
      %295 = vector.broadcast %cst_94 : f32 to vector<8x128xf32>
      %296 = arith.addf %295, %294 : vector<8x128xf32>
      %297 = arith.divf %295, %296 : vector<8x128xf32>
      %298 = vector.extract_strided_slice %285 {offsets = [0, 256], sizes = [8, 128], strides = [1, 1]} : vector<8x512xf32> to vector<8x128xf32>
      %299 = math.tanh %298 : vector<8x128xf32>
      %300 = vector.extract_strided_slice %285 {offsets = [0, 384], sizes = [8, 128], strides = [1, 1]} : vector<8x512xf32> to vector<8x128xf32>
      %301 = arith.negf %300 : vector<8x128xf32>
      %302 = math.exp %301 : vector<8x128xf32>
      %cst_95 = arith.constant 1.000000e+00 : f32
      %303 = vector.broadcast %cst_95 : f32 to vector<8x128xf32>
      %304 = arith.addf %303, %302 : vector<8x128xf32>
      %305 = arith.divf %303, %304 : vector<8x128xf32>
      %306 = arith.mulf %297, %281 : vector<8x128xf32>
      %307 = arith.mulf %291, %299 : vector<8x128xf32>
      %308 = arith.addf %306, %307 : vector<8x128xf32>
      %309 = math.tanh %308 : vector<8x128xf32>
      %310 = arith.mulf %305, %309 : vector<8x128xf32>
      %c8_96 = arith.constant 8 : index
      %c0_97 = arith.constant 0 : index
      %311 = vector.load %arg13[%c8_96, %c0_97] : memref<64x512xf32, #tpu.memory_space<vmem>>, vector<8x512xf32>
      %312 = arith.truncf %310 : vector<8x128xf32> to vector<8x128xbf16>
      %cst_98 = arith.constant dense<0.000000e+00> : vector<8x512xf32>
      %313 = tpu.matmul %312, %279, %cst_98 {dimension_numbers = #tpu.dot_dimension_numbers<[1], [0], [0], [1], [0, 0, 1, 1], [], []>} : vector<8x128xbf16>, vector<128x512xbf16>, vector<8x512xf32> -> vector<8x512xf32>
      %314 = arith.addf %311, %313 : vector<8x512xf32>
      %315 = vector.extract_strided_slice %314 {offsets = [0, 0], sizes = [8, 128], strides = [1, 1]} : vector<8x512xf32> to vector<8x128xf32>
      %316 = arith.negf %315 : vector<8x128xf32>
      %317 = math.exp %316 : vector<8x128xf32>
      %cst_99 = arith.constant 1.000000e+00 : f32
      %318 = vector.broadcast %cst_99 : f32 to vector<8x128xf32>
      %319 = arith.addf %318, %317 : vector<8x128xf32>
      %320 = arith.divf %318, %319 : vector<8x128xf32>
      %321 = vector.extract_strided_slice %314 {offsets = [0, 128], sizes = [8, 128], strides = [1, 1]} : vector<8x512xf32> to vector<8x128xf32>
      %322 = arith.negf %321 : vector<8x128xf32>
      %323 = math.exp %322 : vector<8x128xf32>
      %cst_100 = arith.constant 1.000000e+00 : f32
      %324 = vector.broadcast %cst_100 : f32 to vector<8x128xf32>
      %325 = arith.addf %324, %323 : vector<8x128xf32>
      %326 = arith.divf %324, %325 : vector<8x128xf32>
      %327 = vector.extract_strided_slice %314 {offsets = [0, 256], sizes = [8, 128], strides = [1, 1]} : vector<8x512xf32> to vector<8x128xf32>
      %328 = math.tanh %327 : vector<8x128xf32>
      %329 = vector.extract_strided_slice %314 {offsets = [0, 384], sizes = [8, 128], strides = [1, 1]} : vector<8x512xf32> to vector<8x128xf32>
      %330 = arith.negf %329 : vector<8x128xf32>
      %331 = math.exp %330 : vector<8x128xf32>
      %cst_101 = arith.constant 1.000000e+00 : f32
      %332 = vector.broadcast %cst_101 : f32 to vector<8x128xf32>
      %333 = arith.addf %332, %331 : vector<8x128xf32>
      %334 = arith.divf %332, %333 : vector<8x128xf32>
      %335 = arith.mulf %326, %308 : vector<8x128xf32>
      %336 = arith.mulf %320, %328 : vector<8x128xf32>
      %337 = arith.addf %335, %336 : vector<8x128xf32>
      %338 = math.tanh %337 : vector<8x128xf32>
      %339 = arith.mulf %334, %338 : vector<8x128xf32>
      %c16_102 = arith.constant 16 : index
      %c0_103 = arith.constant 0 : index
      %340 = vector.load %arg13[%c16_102, %c0_103] : memref<64x512xf32, #tpu.memory_space<vmem>>, vector<8x512xf32>
      %341 = arith.truncf %339 : vector<8x128xf32> to vector<8x128xbf16>
      %cst_104 = arith.constant dense<0.000000e+00> : vector<8x512xf32>
      %342 = tpu.matmul %341, %279, %cst_104 {dimension_numbers = #tpu.dot_dimension_numbers<[1], [0], [0], [1], [0, 0, 1, 1], [], []>} : vector<8x128xbf16>, vector<128x512xbf16>, vector<8x512xf32> -> vector<8x512xf32>
      %343 = arith.addf %340, %342 : vector<8x512xf32>
      %344 = vector.extract_strided_slice %343 {offsets = [0, 0], sizes = [8, 128], strides = [1, 1]} : vector<8x512xf32> to vector<8x128xf32>
      %345 = arith.negf %344 : vector<8x128xf32>
      %346 = math.exp %345 : vector<8x128xf32>
      %cst_105 = arith.constant 1.000000e+00 : f32
      %347 = vector.broadcast %cst_105 : f32 to vector<8x128xf32>
      %348 = arith.addf %347, %346 : vector<8x128xf32>
      %349 = arith.divf %347, %348 : vector<8x128xf32>
      %350 = vector.extract_strided_slice %343 {offsets = [0, 128], sizes = [8, 128], strides = [1, 1]} : vector<8x512xf32> to vector<8x128xf32>
      %351 = arith.negf %350 : vector<8x128xf32>
      %352 = math.exp %351 : vector<8x128xf32>
      %cst_106 = arith.constant 1.000000e+00 : f32
      %353 = vector.broadcast %cst_106 : f32 to vector<8x128xf32>
      %354 = arith.addf %353, %352 : vector<8x128xf32>
      %355 = arith.divf %353, %354 : vector<8x128xf32>
      %356 = vector.extract_strided_slice %343 {offsets = [0, 256], sizes = [8, 128], strides = [1, 1]} : vector<8x512xf32> to vector<8x128xf32>
      %357 = math.tanh %356 : vector<8x128xf32>
      %358 = vector.extract_strided_slice %343 {offsets = [0, 384], sizes = [8, 128], strides = [1, 1]} : vector<8x512xf32> to vector<8x128xf32>
      %359 = arith.negf %358 : vector<8x128xf32>
      %360 = math.exp %359 : vector<8x128xf32>
      %cst_107 = arith.constant 1.000000e+00 : f32
      %361 = vector.broadcast %cst_107 : f32 to vector<8x128xf32>
      %362 = arith.addf %361, %360 : vector<8x128xf32>
      %363 = arith.divf %361, %362 : vector<8x128xf32>
      %364 = arith.mulf %355, %337 : vector<8x128xf32>
      %365 = arith.mulf %349, %357 : vector<8x128xf32>
      %366 = arith.addf %364, %365 : vector<8x128xf32>
      %367 = math.tanh %366 : vector<8x128xf32>
      %368 = arith.mulf %363, %367 : vector<8x128xf32>
      %c24_108 = arith.constant 24 : index
      %c0_109 = arith.constant 0 : index
      %369 = vector.load %arg13[%c24_108, %c0_109] : memref<64x512xf32, #tpu.memory_space<vmem>>, vector<8x512xf32>
      %370 = arith.truncf %368 : vector<8x128xf32> to vector<8x128xbf16>
      %cst_110 = arith.constant dense<0.000000e+00> : vector<8x512xf32>
      %371 = tpu.matmul %370, %279, %cst_110 {dimension_numbers = #tpu.dot_dimension_numbers<[1], [0], [0], [1], [0, 0, 1, 1], [], []>} : vector<8x128xbf16>, vector<128x512xbf16>, vector<8x512xf32> -> vector<8x512xf32>
      %372 = arith.addf %369, %371 : vector<8x512xf32>
      %373 = vector.extract_strided_slice %372 {offsets = [0, 0], sizes = [8, 128], strides = [1, 1]} : vector<8x512xf32> to vector<8x128xf32>
      %374 = arith.negf %373 : vector<8x128xf32>
      %375 = math.exp %374 : vector<8x128xf32>
      %cst_111 = arith.constant 1.000000e+00 : f32
      %376 = vector.broadcast %cst_111 : f32 to vector<8x128xf32>
      %377 = arith.addf %376, %375 : vector<8x128xf32>
      %378 = arith.divf %376, %377 : vector<8x128xf32>
      %379 = vector.extract_strided_slice %372 {offsets = [0, 128], sizes = [8, 128], strides = [1, 1]} : vector<8x512xf32> to vector<8x128xf32>
      %380 = arith.negf %379 : vector<8x128xf32>
      %381 = math.exp %380 : vector<8x128xf32>
      %cst_112 = arith.constant 1.000000e+00 : f32
      %382 = vector.broadcast %cst_112 : f32 to vector<8x128xf32>
      %383 = arith.addf %382, %381 : vector<8x128xf32>
      %384 = arith.divf %382, %383 : vector<8x128xf32>
      %385 = vector.extract_strided_slice %372 {offsets = [0, 256], sizes = [8, 128], strides = [1, 1]} : vector<8x512xf32> to vector<8x128xf32>
      %386 = math.tanh %385 : vector<8x128xf32>
      %387 = vector.extract_strided_slice %372 {offsets = [0, 384], sizes = [8, 128], strides = [1, 1]} : vector<8x512xf32> to vector<8x128xf32>
      %388 = arith.negf %387 : vector<8x128xf32>
      %389 = math.exp %388 : vector<8x128xf32>
      %cst_113 = arith.constant 1.000000e+00 : f32
      %390 = vector.broadcast %cst_113 : f32 to vector<8x128xf32>
      %391 = arith.addf %390, %389 : vector<8x128xf32>
      %392 = arith.divf %390, %391 : vector<8x128xf32>
      %393 = arith.mulf %384, %366 : vector<8x128xf32>
      %394 = arith.mulf %378, %386 : vector<8x128xf32>
      %395 = arith.addf %393, %394 : vector<8x128xf32>
      %396 = math.tanh %395 : vector<8x128xf32>
      %397 = arith.mulf %392, %396 : vector<8x128xf32>
      %c32_114 = arith.constant 32 : index
      %c0_115 = arith.constant 0 : index
      %398 = vector.load %arg13[%c32_114, %c0_115] : memref<64x512xf32, #tpu.memory_space<vmem>>, vector<8x512xf32>
      %399 = arith.truncf %397 : vector<8x128xf32> to vector<8x128xbf16>
      %cst_116 = arith.constant dense<0.000000e+00> : vector<8x512xf32>
      %400 = tpu.matmul %399, %279, %cst_116 {dimension_numbers = #tpu.dot_dimension_numbers<[1], [0], [0], [1], [0, 0, 1, 1], [], []>} : vector<8x128xbf16>, vector<128x512xbf16>, vector<8x512xf32> -> vector<8x512xf32>
      %401 = arith.addf %398, %400 : vector<8x512xf32>
      %402 = vector.extract_strided_slice %401 {offsets = [0, 0], sizes = [8, 128], strides = [1, 1]} : vector<8x512xf32> to vector<8x128xf32>
      %403 = arith.negf %402 : vector<8x128xf32>
      %404 = math.exp %403 : vector<8x128xf32>
      %cst_117 = arith.constant 1.000000e+00 : f32
      %405 = vector.broadcast %cst_117 : f32 to vector<8x128xf32>
      %406 = arith.addf %405, %404 : vector<8x128xf32>
      %407 = arith.divf %405, %406 : vector<8x128xf32>
      %408 = vector.extract_strided_slice %401 {offsets = [0, 128], sizes = [8, 128], strides = [1, 1]} : vector<8x512xf32> to vector<8x128xf32>
      %409 = arith.negf %408 : vector<8x128xf32>
      %410 = math.exp %409 : vector<8x128xf32>
      %cst_118 = arith.constant 1.000000e+00 : f32
      %411 = vector.broadcast %cst_118 : f32 to vector<8x128xf32>
      %412 = arith.addf %411, %410 : vector<8x128xf32>
      %413 = arith.divf %411, %412 : vector<8x128xf32>
      %414 = vector.extract_strided_slice %401 {offsets = [0, 256], sizes = [8, 128], strides = [1, 1]} : vector<8x512xf32> to vector<8x128xf32>
      %415 = math.tanh %414 : vector<8x128xf32>
      %416 = vector.extract_strided_slice %401 {offsets = [0, 384], sizes = [8, 128], strides = [1, 1]} : vector<8x512xf32> to vector<8x128xf32>
      %417 = arith.negf %416 : vector<8x128xf32>
      %418 = math.exp %417 : vector<8x128xf32>
      %cst_119 = arith.constant 1.000000e+00 : f32
      %419 = vector.broadcast %cst_119 : f32 to vector<8x128xf32>
      %420 = arith.addf %419, %418 : vector<8x128xf32>
      %421 = arith.divf %419, %420 : vector<8x128xf32>
      %422 = arith.mulf %413, %395 : vector<8x128xf32>
      %423 = arith.mulf %407, %415 : vector<8x128xf32>
      %424 = arith.addf %422, %423 : vector<8x128xf32>
      %425 = math.tanh %424 : vector<8x128xf32>
      %426 = arith.mulf %421, %425 : vector<8x128xf32>
      %c40_120 = arith.constant 40 : index
      %c0_121 = arith.constant 0 : index
      %427 = vector.load %arg13[%c40_120, %c0_121] : memref<64x512xf32, #tpu.memory_space<vmem>>, vector<8x512xf32>
      %428 = arith.truncf %426 : vector<8x128xf32> to vector<8x128xbf16>
      %cst_122 = arith.constant dense<0.000000e+00> : vector<8x512xf32>
      %429 = tpu.matmul %428, %279, %cst_122 {dimension_numbers = #tpu.dot_dimension_numbers<[1], [0], [0], [1], [0, 0, 1, 1], [], []>} : vector<8x128xbf16>, vector<128x512xbf16>, vector<8x512xf32> -> vector<8x512xf32>
      %430 = arith.addf %427, %429 : vector<8x512xf32>
      %431 = vector.extract_strided_slice %430 {offsets = [0, 0], sizes = [8, 128], strides = [1, 1]} : vector<8x512xf32> to vector<8x128xf32>
      %432 = arith.negf %431 : vector<8x128xf32>
      %433 = math.exp %432 : vector<8x128xf32>
      %cst_123 = arith.constant 1.000000e+00 : f32
      %434 = vector.broadcast %cst_123 : f32 to vector<8x128xf32>
      %435 = arith.addf %434, %433 : vector<8x128xf32>
      %436 = arith.divf %434, %435 : vector<8x128xf32>
      %437 = vector.extract_strided_slice %430 {offsets = [0, 128], sizes = [8, 128], strides = [1, 1]} : vector<8x512xf32> to vector<8x128xf32>
      %438 = arith.negf %437 : vector<8x128xf32>
      %439 = math.exp %438 : vector<8x128xf32>
      %cst_124 = arith.constant 1.000000e+00 : f32
      %440 = vector.broadcast %cst_124 : f32 to vector<8x128xf32>
      %441 = arith.addf %440, %439 : vector<8x128xf32>
      %442 = arith.divf %440, %441 : vector<8x128xf32>
      %443 = vector.extract_strided_slice %430 {offsets = [0, 256], sizes = [8, 128], strides = [1, 1]} : vector<8x512xf32> to vector<8x128xf32>
      %444 = math.tanh %443 : vector<8x128xf32>
      %445 = vector.extract_strided_slice %430 {offsets = [0, 384], sizes = [8, 128], strides = [1, 1]} : vector<8x512xf32> to vector<8x128xf32>
      %446 = arith.negf %445 : vector<8x128xf32>
      %447 = math.exp %446 : vector<8x128xf32>
      %cst_125 = arith.constant 1.000000e+00 : f32
      %448 = vector.broadcast %cst_125 : f32 to vector<8x128xf32>
      %449 = arith.addf %448, %447 : vector<8x128xf32>
      %450 = arith.divf %448, %449 : vector<8x128xf32>
      %451 = arith.mulf %442, %424 : vector<8x128xf32>
      %452 = arith.mulf %436, %444 : vector<8x128xf32>
      %453 = arith.addf %451, %452 : vector<8x128xf32>
      %454 = math.tanh %453 : vector<8x128xf32>
      %455 = arith.mulf %450, %454 : vector<8x128xf32>
      %c48_126 = arith.constant 48 : index
      %c0_127 = arith.constant 0 : index
      %456 = vector.load %arg13[%c48_126, %c0_127] : memref<64x512xf32, #tpu.memory_space<vmem>>, vector<8x512xf32>
      %457 = arith.truncf %455 : vector<8x128xf32> to vector<8x128xbf16>
      %cst_128 = arith.constant dense<0.000000e+00> : vector<8x512xf32>
      %458 = tpu.matmul %457, %279, %cst_128 {dimension_numbers = #tpu.dot_dimension_numbers<[1], [0], [0], [1], [0, 0, 1, 1], [], []>} : vector<8x128xbf16>, vector<128x512xbf16>, vector<8x512xf32> -> vector<8x512xf32>
      %459 = arith.addf %456, %458 : vector<8x512xf32>
      %460 = vector.extract_strided_slice %459 {offsets = [0, 0], sizes = [8, 128], strides = [1, 1]} : vector<8x512xf32> to vector<8x128xf32>
      %461 = arith.negf %460 : vector<8x128xf32>
      %462 = math.exp %461 : vector<8x128xf32>
      %cst_129 = arith.constant 1.000000e+00 : f32
      %463 = vector.broadcast %cst_129 : f32 to vector<8x128xf32>
      %464 = arith.addf %463, %462 : vector<8x128xf32>
      %465 = arith.divf %463, %464 : vector<8x128xf32>
      %466 = vector.extract_strided_slice %459 {offsets = [0, 128], sizes = [8, 128], strides = [1, 1]} : vector<8x512xf32> to vector<8x128xf32>
      %467 = arith.negf %466 : vector<8x128xf32>
      %468 = math.exp %467 : vector<8x128xf32>
      %cst_130 = arith.constant 1.000000e+00 : f32
      %469 = vector.broadcast %cst_130 : f32 to vector<8x128xf32>
      %470 = arith.addf %469, %468 : vector<8x128xf32>
      %471 = arith.divf %469, %470 : vector<8x128xf32>
      %472 = vector.extract_strided_slice %459 {offsets = [0, 256], sizes = [8, 128], strides = [1, 1]} : vector<8x512xf32> to vector<8x128xf32>
      %473 = math.tanh %472 : vector<8x128xf32>
      %474 = vector.extract_strided_slice %459 {offsets = [0, 384], sizes = [8, 128], strides = [1, 1]} : vector<8x512xf32> to vector<8x128xf32>
      %475 = arith.negf %474 : vector<8x128xf32>
      %476 = math.exp %475 : vector<8x128xf32>
      %cst_131 = arith.constant 1.000000e+00 : f32
      %477 = vector.broadcast %cst_131 : f32 to vector<8x128xf32>
      %478 = arith.addf %477, %476 : vector<8x128xf32>
      %479 = arith.divf %477, %478 : vector<8x128xf32>
      %480 = arith.mulf %471, %453 : vector<8x128xf32>
      %481 = arith.mulf %465, %473 : vector<8x128xf32>
      %482 = arith.addf %480, %481 : vector<8x128xf32>
      %483 = math.tanh %482 : vector<8x128xf32>
      %484 = arith.mulf %479, %483 : vector<8x128xf32>
      %c56_132 = arith.constant 56 : index
      %c0_133 = arith.constant 0 : index
      %485 = vector.load %arg13[%c56_132, %c0_133] : memref<64x512xf32, #tpu.memory_space<vmem>>, vector<8x512xf32>
      %486 = arith.truncf %484 : vector<8x128xf32> to vector<8x128xbf16>
      %cst_134 = arith.constant dense<0.000000e+00> : vector<8x512xf32>
      %487 = tpu.matmul %486, %279, %cst_134 {dimension_numbers = #tpu.dot_dimension_numbers<[1], [0], [0], [1], [0, 0, 1, 1], [], []>} : vector<8x128xbf16>, vector<128x512xbf16>, vector<8x512xf32> -> vector<8x512xf32>
      %488 = arith.addf %485, %487 : vector<8x512xf32>
      %489 = vector.extract_strided_slice %488 {offsets = [0, 0], sizes = [8, 128], strides = [1, 1]} : vector<8x512xf32> to vector<8x128xf32>
      %490 = arith.negf %489 : vector<8x128xf32>
      %491 = math.exp %490 : vector<8x128xf32>
      %cst_135 = arith.constant 1.000000e+00 : f32
      %492 = vector.broadcast %cst_135 : f32 to vector<8x128xf32>
      %493 = arith.addf %492, %491 : vector<8x128xf32>
      %494 = arith.divf %492, %493 : vector<8x128xf32>
      %495 = vector.extract_strided_slice %488 {offsets = [0, 128], sizes = [8, 128], strides = [1, 1]} : vector<8x512xf32> to vector<8x128xf32>
      %496 = arith.negf %495 : vector<8x128xf32>
      %497 = math.exp %496 : vector<8x128xf32>
      %cst_136 = arith.constant 1.000000e+00 : f32
      %498 = vector.broadcast %cst_136 : f32 to vector<8x128xf32>
      %499 = arith.addf %498, %497 : vector<8x128xf32>
      %500 = arith.divf %498, %499 : vector<8x128xf32>
      %501 = vector.extract_strided_slice %488 {offsets = [0, 256], sizes = [8, 128], strides = [1, 1]} : vector<8x512xf32> to vector<8x128xf32>
      %502 = math.tanh %501 : vector<8x128xf32>
      %503 = vector.extract_strided_slice %488 {offsets = [0, 384], sizes = [8, 128], strides = [1, 1]} : vector<8x512xf32> to vector<8x128xf32>
      %504 = arith.negf %503 : vector<8x128xf32>
      %505 = math.exp %504 : vector<8x128xf32>
      %cst_137 = arith.constant 1.000000e+00 : f32
      %506 = vector.broadcast %cst_137 : f32 to vector<8x128xf32>
      %507 = arith.addf %506, %505 : vector<8x128xf32>
      %508 = arith.divf %506, %507 : vector<8x128xf32>
      %509 = arith.mulf %500, %482 : vector<8x128xf32>
      %510 = arith.mulf %494, %502 : vector<8x128xf32>
      %511 = arith.addf %509, %510 : vector<8x128xf32>
      %512 = math.tanh %511 : vector<8x128xf32>
      %513 = arith.mulf %508, %512 : vector<8x128xf32>
      %c0_138 = arith.constant 0 : index
      %c0_139 = arith.constant 0 : index
      %514 = vector.load %arg15[%c0_138, %c0_139] : memref<8x128xf32, #tpu.memory_space<vmem>>, vector<8x128xf32>
      tpu.vector_store %arg15[%c0_138, %c0_139], %513 {strides = array<i32>} : memref<8x128xf32, #tpu.memory_space<vmem>>, vector<8x128xf32>,
    } else {
    }
    %c0_59 = arith.constant 0 : index
    %c0_60 = arith.constant 0 : index
    %256 = vector.load %arg15[%c0_59, %c0_60] : memref<8x128xf32, #tpu.memory_space<vmem>>, vector<8x128xf32>
    %257 = arith.truncf %256 : vector<8x128xf32> to vector<8x128xbf16>
    %c0_61 = arith.constant 0 : index
    %c0_62 = arith.constant 0 : index
    %c0_63 = arith.constant 0 : index
    %258 = vector.load %arg10[%c0_61, %c0_62, %c0_63] : memref<1x128x128xbf16, #tpu.memory_space<vmem>>, vector<1x128x128xbf16>
    %259 = vector.shape_cast %258 : vector<1x128x128xbf16> to vector<128x128xbf16>
    %cst_64 = arith.constant dense<0.000000e+00> : vector<8x128xf32>
    %260 = tpu.matmul %257, %259, %cst_64 {dimension_numbers = #tpu.dot_dimension_numbers<[1], [0], [0], [1], [0, 0, 1, 1], [], []>} : vector<8x128xbf16>, vector<128x128xbf16>, vector<8x128xf32> -> vector<8x128xf32>
    %c0_65 = arith.constant 0 : index
    %c0_66 = arith.constant 0 : index
    %c0_67 = arith.constant 0 : index
    %261 = vector.load %arg11[%c0_65, %c0_66, %c0_67] : memref<1x1x128xf32, #tpu.memory_space<vmem>>, vector<1x1x128xf32>
    %262 = vector.shape_cast %261 : vector<1x1x128xf32> to vector<1x128xf32>
    %263 = vector.broadcast %262 : vector<1x128xf32> to vector<8x128xf32>
    %264 = arith.addf %260, %263 : vector<8x128xf32>
    %c0_68 = arith.constant 0 : index
    %c0_69 = arith.constant 0 : index
    %c0_70 = arith.constant 0 : index
    %265 = vector.load %arg12[%c0_68, %c0_69, %c0_70] : memref<1x8x128xf32, #tpu.memory_space<vmem>>, vector<1x8x128xf32>
    %266 = vector.shape_cast %265 : vector<1x8x128xf32> to vector<8x128xf32>
    %267 = vector.shape_cast %264 : vector<8x128xf32> to vector<1x8x128xf32>
    tpu.vector_store %arg12[%c0_68, %c0_69, %c0_70], %267 {strides = array<i32>} : memref<1x8x128xf32, #tpu.memory_space<vmem>>, vector<1x8x128xf32>,
    return
  }
  func.func @transform_0(%arg0: i32, %arg1: memref<3xi32, #tpu.memory_space<smem>>, %arg2: memref<3xi32, #tpu.memory_space<smem>>) -> (i32, i32) {
    %c0_i32 = arith.constant 0 : i32
    %c0_i32_0 = arith.constant 0 : i32
    %c0_i32_1 = arith.constant 0 : i32
    return %c0_i32, %c0_i32_0 : i32, i32
  }
  func.func @transform_1(%arg0: i32, %arg1: memref<3xi32, #tpu.memory_space<smem>>, %arg2: memref<3xi32, #tpu.memory_space<smem>>) -> (i32, i32, i32) {
    %c0_i32 = arith.constant 0 : i32
    %c0_i32_0 = arith.constant 0 : i32
    %c0_i32_1 = arith.constant 0 : i32
    return %arg0, %c0_i32, %c0_i32_0 : i32, i32, i32
  }
  func.func @transform_2(%arg0: i32, %arg1: memref<3xi32, #tpu.memory_space<smem>>, %arg2: memref<3xi32, #tpu.memory_space<smem>>) -> (i32, i32, i32) {
    %c0_i32 = arith.constant 0 : i32
    %c0_i32_0 = arith.constant 0 : i32
    %c0_i32_1 = arith.constant 0 : i32
    return %arg0, %c0_i32, %c0_i32_0 : i32, i32, i32
  }
  func.func @transform_3(%arg0: i32, %arg1: memref<3xi32, #tpu.memory_space<smem>>, %arg2: memref<3xi32, #tpu.memory_space<smem>>) -> (i32, i32, i32) {
    %c0_i32 = arith.constant 0 : i32
    %c0_i32_0 = arith.constant 0 : i32
    %c0_i32_1 = arith.constant 0 : i32
    return %arg0, %c0_i32, %c0_i32_0 : i32, i32, i32
  }
  func.func @transform_4(%arg0: i32, %arg1: memref<3xi32, #tpu.memory_space<smem>>, %arg2: memref<3xi32, #tpu.memory_space<smem>>) -> (i32, i32, i32, i32) {
    %0 = arith.index_cast %arg0 : i32 to index
    %1 = memref.load %arg2[%0] : memref<3xi32, #tpu.memory_space<smem>>
    %c0_i32 = arith.constant 0 : i32
    %c0_i32_0 = arith.constant 0 : i32
    %c0_i32_1 = arith.constant 0 : i32
    %c0_i32_2 = arith.constant 0 : i32
    return %1, %c0_i32, %c0_i32_0, %c0_i32_1 : i32, i32, i32, i32
  }
  func.func @transform_5(%arg0: i32, %arg1: memref<3xi32, #tpu.memory_space<smem>>, %arg2: memref<3xi32, #tpu.memory_space<smem>>) -> (i32, i32, i32, i32) {
    %0 = arith.index_cast %arg0 : i32 to index
    %1 = memref.load %arg2[%0] : memref<3xi32, #tpu.memory_space<smem>>
    %c0_i32 = arith.constant 0 : i32
    %c0_i32_0 = arith.constant 0 : i32
    %c0_i32_1 = arith.constant 0 : i32
    %c0_i32_2 = arith.constant 0 : i32
    return %1, %c0_i32, %c0_i32_0, %c0_i32_1 : i32, i32, i32, i32
  }
  func.func @transform_6(%arg0: i32, %arg1: memref<3xi32, #tpu.memory_space<smem>>, %arg2: memref<3xi32, #tpu.memory_space<smem>>) -> (i32, i32, i32, i32) {
    %0 = arith.index_cast %arg0 : i32 to index
    %1 = memref.load %arg2[%0] : memref<3xi32, #tpu.memory_space<smem>>
    %c0_i32 = arith.constant 0 : i32
    %c0_i32_0 = arith.constant 0 : i32
    %c0_i32_1 = arith.constant 0 : i32
    %c0_i32_2 = arith.constant 0 : i32
    return %1, %c0_i32, %c0_i32_0, %c0_i32_1 : i32, i32, i32, i32
  }
  func.func @transform_7(%arg0: i32, %arg1: memref<3xi32, #tpu.memory_space<smem>>, %arg2: memref<3xi32, #tpu.memory_space<smem>>) -> (i32, i32, i32) {
    %c0_i32 = arith.constant 0 : i32
    %c0_i32_0 = arith.constant 0 : i32
    %c0_i32_1 = arith.constant 0 : i32
    return %arg0, %c0_i32, %c0_i32_0 : i32, i32, i32
  }
  func.func @transform_8(%arg0: i32, %arg1: memref<3xi32, #tpu.memory_space<smem>>, %arg2: memref<3xi32, #tpu.memory_space<smem>>) -> (i32, i32, i32) {
    %c0_i32 = arith.constant 0 : i32
    %c0_i32_0 = arith.constant 0 : i32
    %c0_i32_1 = arith.constant 0 : i32
    return %arg0, %c0_i32, %c0_i32_0 : i32, i32, i32
  }
  func.func @transform_9(%arg0: i32, %arg1: memref<3xi32, #tpu.memory_space<smem>>, %arg2: memref<3xi32, #tpu.memory_space<smem>>) -> (i32, i32, i32) {
    %c0_i32 = arith.constant 0 : i32
    %c0_i32_0 = arith.constant 0 : i32
    %c0_i32_1 = arith.constant 0 : i32
    return %arg0, %c0_i32, %c0_i32_0 : i32, i32, i32
  }
}

</mosaic_0001>

<bundles_post_ra>
// kernel: deep_ensemble_forward.1
= control target key start
LH: loop header
LB: loop body
LE: loop exit
PB: predicated region body
PF: predicated region fallthrough
CT: control target
= control target key end

     0   :  { %s6153_s0 = inlined_call_operand.vmem [shape: s32[3], index: 0, kind: input, shape index: {}]   ;;  %s6154_s2 = inlined_call_operand.vmem [shape: bf16[64,128], index: 2, kind: input, shape index: {}]   ;;  %s6155_s3 = inlined_call_operand.vmem [shape: bf16[3,128,512], index: 3, kind: input, shape index: {}]   ;;  %s6156_s4 = inlined_call_operand.vmem [shape: bf16[3,128,512], index: 4, kind: input, shape index: {}]   ;;  %s6157_s5 = inlined_call_operand.vmem [shape: f32[3,1,512], index: 5, kind: input, shape index: {}]   ;;  %s6158_s6 = inlined_call_operand.vmem [shape: bf16[1,1,128,512], index: 6, kind: input, shape index: {}]   ;;  %s6159_s7 = inlined_call_operand.vmem [shape: bf16[1,1,128,512], index: 7, kind: input, shape index: {}]   ;;  %s6160_s8 = inlined_call_operand.vmem [shape: f32[1,1,1,512], index: 8, kind: input, shape index: {}]   ;;  %s6161_s9 = inlined_call_operand.vmem [shape: bf16[3,128,128], index: 9, kind: input, shape index: {}]   ;;  %s6162_s10 = inlined_call_operand.vmem [shape: f32[3,1,128], index: 10, kind: input, shape index: {}]   ;;  %s6163_s11 = inlined_call_operand.vmem [shape: f32[3,8,128], index: 11, kind: output, shape index: {}]   ;;  %s6164_s1 = inlined_call_operand.vmem [shape: s32[3], index: 1, kind: input, shape index: {}]  }
   0x1   :  { %s16_s19 = sshll.u32 %s6153_s0, 4  ;;  %s20_s22 = sshll.u32 %s6164_s1, 4  ;;  %s17_s19 = int_to_ptr.vmem [resolvable:$true] %s16_s19  ;;  %s21_s22 = int_to_ptr.vmem [resolvable:$true] %s20_s22 }
   0x2   :  { %s4595_s23 = scalar_lea.vmem %s17_s19, 16  ;;  %p4600_p1 = scmp.lt.s32.totalorder %s17_s19, %s17_s19 }
   0x3   :  { %p4596_p0 = scmp.ne.s32.totalorder %s17_s19, %s4595_s23  ;;  %p4601_p2 = scmp.lt.s32.totalorder %s4595_s23, %s4595_s23 }
   0x5   :  { %p4602_p3 = por %p4601_p2, %p4600_p1 }
   0x7   :  { %p4603_p4 = pnand %p4602_p3, %p4596_p0 }
   0x9   :  { %4606 = shalt.err (!%p4603_p4)  }
   0xa   :  { %s4629_s24 = smov [#allocation6]   ;;  %s4607_s25 = scalar_lea.vmem %s21_s22, 16 }
   0xb   :  { %19 = dma.vmem_to_smem %s17_s19, 16, %s4629_s24, [#allocation5] }
   0xc   :  { %p4608_p5 = scmp.ne.s32.totalorder %s21_s22, %s4607_s25  ;;  %p4612_p6 = scmp.lt.s32.totalorder %s21_s22, %s21_s22 }
   0xd   :  { %p4613_p7 = scmp.lt.s32.totalorder %s4607_s25, %s4607_s25 }
   0xf   :  { %p4614_p8 = por %p4613_p7, %p4612_p6 }
  0x11   :  { %p4615_p9 = pnand %p4614_p8, %p4608_p5 }
  0x13   :  { %4618 = shalt.err (!%p4615_p9)  }
  0x14   :  { %s4630_s0 = smov [#allocation7]  }
  0x15   :  { %23 = dma.vmem_to_smem %s21_s22, 16, %s4630_s0, [#allocation5] }
  0x16   :  { %4623 = dma.done.wait [#allocation5], 32 }
  0x17   :  { %4624 = vsyncadd [#allocation5], 4294967264 }
  0x18   :  { %25 = sfence }
  0x19   :  { %s4701_s1 = smov 0  }
  0x1a LB: > { %s4707_s26 = sadd.s32 4294967295, %s4627_s1   ;;  %p3815_p10 = scmp.ge.s32.totalorder %s4627_s1, 1  ;;  %s4627_s1 = sphi %s4701_s1, %s31_s1  }
  0x1b   : > { %p377_p11 = scmp.lt.s32.totalorder %s4627_s1, 4 }
  0x1d   : > { %p378_p12 = pnand %p3815_p10, %p377_p11 }
  0x1f   : > { %381 = sbr.rel (%p378_p12) target bundleno = 4597 (0x11f5), region = 56 }
  0x26   : > { %p446_p13 = scmp.lt.s32.totalorder %s4707_s26, 2  ;;  %s460_s27 = sld [smem:[#allocation7 + %s4707_s26]]  ;;  %v6169_v0 = vmov 0   ;;  %v4118_v35 = vld [vmem:[%s6154_s2] sm:$0xff]   ;;  %v4131_v44 = vld [vmem:[%s6154_s2 + $0x8] sm:$0xff]   ;;  %v4144_v53 = vld [vmem:[%s6154_s2 + $0x10] sm:$0xff]  }
  0x27   : > { %s467_s28 = sld [smem:[#allocation7 + %s4707_s26]]  ;;  %771 = vmatprep.mubr.bf16.mxu0 %v6169_v0  ;;  %844 = vmatprep.mubr.bf16.mxu1 %v6169_v0  ;;  %v4157_v62 = vld [vmem:[%s6154_s2 + $0x18] sm:$0xff]  }
  0x28   : > { %s4715_s29 = sld [smem:[#allocation7 + %s4707_s26]] }
  0x29   : > { %s4720_s30 = scalar_select %p446_p13, %s4707_s26, 2 }
  0x2b   : > { %s4022_s12 = sshll.u32 %s4720_s30, 8  ;;  %s4026_s13 = sshll.u32 %s4720_s30, 6 }
  0x2c   : > { %s4729_s16 = scalar_lea.vmem %s6155_s3, %s4022_s12  ;;  %p461_p0 = scmp.lt.s32.totalorder %s460_s27, 0 }
  0x2d   : > { %s4734_s19 = scalar_lea.vmem %s6161_s9, %s4026_s13  ;;  %v4070_v1 = vld [vmem:[%s4729_s16 + $0x4] ss:$16 sps:$4 sm:$0xff]   ;;  %p468_p1 = scmp.lt.s32.totalorder %s467_s28, 0  ;;  %v4072_v2 = vld [vmem:[%s4729_s16 + $0xc] ss:$16 sps:$4 sm:$0xff]  }
  0x2e   : > { %p475_p2 = scmp.lt.s32.totalorder %s4715_s29, 0  ;;  %s6239_s27 = smov (!%p461_p0, %s460_s27), 0  ;;  %739 = vmatprep.subr.bf16.mxu0 %v4070_v1  ;;  %v4074_v3 = vld [vmem:[%s4729_s16] ss:$16 sps:$4 sm:$0xff]   ;;  %v4075_v4 = vld [vmem:[%s4729_s16 + $0x8] ss:$16 sps:$4 sm:$0xff]   ;;  %812 = vmatprep.subr.bf16.mxu1 %v4072_v2 }
  0x2f   : > { %s6241_s28 = smov (!%p468_p1, %s467_s28), 0  ;;  %v4076_v5 = vld [vmem:[%s4729_s16 + $0x24] ss:$16 sps:$4 sm:$0xff]   ;;  %s4024_s20 = sshll.u32 %s6239_s27, 8  ;;  %740 = vmatpush1.bf16.msra.mxu0 %v4074_v3  ;;  %813 = vmatpush1.bf16.msra.mxu1 %v4075_v4  ;;  %v4078_v6 = vld [vmem:[%s4729_s16 + $0x2c] ss:$16 sps:$4 sm:$0xff]  }
  0x30   : > { %s487_s23 = scalar_lea.vmem %s6162_s10, %s4720_s30  ;;  %v4080_v7 = vld [vmem:[%s4729_s16 + $0x20] ss:$16 sps:$4 sm:$0xff]   ;;  %s4751_s0 = scalar_lea.vmem %s6158_s6, %s4024_s20  ;;  %741 = vmatprep.subr.bf16.mxu0 %v4076_v5  ;;  %v4081_v8 = vld [vmem:[%s4729_s16 + $0x28] ss:$16 sps:$4 sm:$0xff]   ;;  %814 = vmatprep.subr.bf16.mxu1 %v4078_v6  ;;  %v4082_v9 = vld [vmem:[%s4729_s16 + $0x44] ss:$16 sps:$4 sm:$0xff]   ;;  %v535_v6 = vlaneseq }
  0x31   : > { %s4025_s13 = sshll.u32 %s6241_s28, 8  ;;  %s3828_s17 = sshll.u32 %s4720_s30, 3  ;;  %v4084_v10 = vld [vmem:[%s4729_s16 + $0x4c] ss:$16 sps:$4 sm:$0xff]   ;;  %v4086_v11 = vld [vmem:[%s4729_s16 + $0x40] ss:$16 sps:$4 sm:$0xff]  }
  0x32   : > { %s4757_s15 = scalar_lea.vmem %s6159_s7, %s4025_s13  ;;  %s6243_s29 = smov (!%p475_p2, %s4715_s29), 0  ;;  %v4087_v12 = vld [vmem:[%s4729_s16 + $0x48] ss:$16 sps:$4 sm:$0xff]   ;;  %v4088_v13 = vld [vmem:[%s4729_s16 + $0x64] ss:$16 sps:$4 sm:$0xff]  }
  0x33   : > { %s4769_s20 = scalar_lea.vmem %s6163_s11, %s3828_s17  ;;  %742 = vmatpush1.bf16.msra.mxu0 %v4080_v7  ;;  %815 = vmatpush1.bf16.msra.mxu1 %v4081_v8  ;;  %s3825_s21 = sshll.u32 %s6243_s29, 2  ;;  %v4090_v14 = vld [vmem:[%s4729_s16 + $0x6c] ss:$16 sps:$4 sm:$0xff]   ;;  %v4092_v15 = vld [vmem:[%s4729_s16 + $0x60] ss:$16 sps:$4 sm:$0xff]   ;;  %v4991_v7 = vshrl.u32 %v535_v6, 7 }
  0x34   : > { %743 = vmatprep.subr.bf16.mxu0 %v4082_v9  ;;  %816 = vmatprep.subr.bf16.mxu1 %v4084_v10  ;;  %s4777_s25 = scalar_lea.vmem %s6160_s8, %s3825_s21  ;;  %v4093_v16 = vld [vmem:[%s4729_s16 + $0x68] ss:$16 sps:$4 sm:$0xff]   ;;  %v4094_v17 = vld [vmem:[%s4729_s16 + $0x84] ss:$16 sps:$4 sm:$0xff]   ;;  %v4096_v18 = vld [vmem:[%s4729_s16 + $0x8c] ss:$16 sps:$4 sm:$0xff]   ;;  %s4793_s27 = scalar_lea.vmem %s6156_s4, %s4022_s12 }
  0x35   : > { %v4098_v19 = vld [vmem:[%s4729_s16 + $0x80] ss:$16 sps:$4 sm:$0xff]   ;;  %v4099_v20 = vld [vmem:[%s4729_s16 + $0x88] ss:$16 sps:$4 sm:$0xff]   ;;  %v4100_v21 = vld [vmem:[%s4729_s16 + $0xa4] ss:$16 sps:$4 sm:$0xff]  }
  0x36   : > { %v4102_v22 = vld [vmem:[%s4729_s16 + $0xac] ss:$16 sps:$4 sm:$0xff]   ;;  %v4104_v23 = vld [vmem:[%s4729_s16 + $0xa0] ss:$16 sps:$4 sm:$0xff]   ;;  %v4105_v24 = vld [vmem:[%s4729_s16 + $0xa8] ss:$16 sps:$4 sm:$0xff]  }
  0x37   : > { %744 = vmatpush1.bf16.msra.mxu0 %v4086_v11  ;;  %817 = vmatpush1.bf16.msra.mxu1 %v4087_v12  ;;  %v4106_v25 = vld [vmem:[%s4729_s16 + $0xc4] ss:$16 sps:$4 sm:$0xff]   ;;  %v4108_v26 = vld [vmem:[%s4729_s16 + $0xcc] ss:$16 sps:$4 sm:$0xff]   ;;  %v4110_v27 = vld [vmem:[%s4729_s16 + $0xc0] ss:$16 sps:$4 sm:$0xff]  }
  0x38   : > { %745 = vmatprep.subr.bf16.mxu0 %v4088_v13  ;;  %818 = vmatprep.subr.bf16.mxu1 %v4090_v14  ;;  %v4111_v28 = vld [vmem:[%s4729_s16 + $0xc8] ss:$16 sps:$4 sm:$0xff]   ;;  %v4112_v29 = vld [vmem:[%s4729_s16 + $0xe4] ss:$16 sps:$4 sm:$0xff]   ;;  %v4114_v30 = vld [vmem:[%s4729_s16 + $0xec] ss:$16 sps:$4 sm:$0xff]  }
  0x39   : > { %v4116_v31 = vld [vmem:[%s4729_s16 + $0xe0] ss:$16 sps:$4 sm:$0xff]   ;;  %v4117_v32 = vld [vmem:[%s4729_s16 + $0xe8] ss:$16 sps:$4 sm:$0xff]   ;;  %v4805_v33 = vld [vmem:[%s4793_s27 + $0x4] ss:$16 sps:$4 sm:$0xff]  }
  0x3a   : > { %v4808_v34 = vld [vmem:[%s4793_s27 + $0xc] ss:$16 sps:$4 sm:$0xff]   ;;  %v4814_v36 = vld [vmem:[%s4793_s27] ss:$16 sps:$4 sm:$0xff]   ;;  %v4817_v37 = vld [vmem:[%s4793_s27 + $0x8] ss:$16 sps:$4 sm:$0xff]  }
  0x3b   : > { %746 = vmatpush1.bf16.msra.mxu0 %v4092_v15  ;;  %819 = vmatpush1.bf16.msra.mxu1 %v4093_v16  ;;  %v4820_v38 = vld [vmem:[%s4793_s27 + $0x24] ss:$16 sps:$4 sm:$0xff]   ;;  %v4825_v39 = vld [vmem:[%s4793_s27 + $0x2c] ss:$16 sps:$4 sm:$0xff]   ;;  %v4828_v40 = vld [vmem:[%s4793_s27 + $0x20] ss:$16 sps:$4 sm:$0xff]  }
  0x3c   : > { %747 = vmatprep.subr.bf16.mxu0 %v4094_v17  ;;  %820 = vmatprep.subr.bf16.mxu1 %v4096_v18  ;;  %v4833_v41 = vld [vmem:[%s4793_s27 + $0x28] ss:$16 sps:$4 sm:$0xff]   ;;  %v4836_v42 = vld [vmem:[%s4793_s27 + $0x44] ss:$16 sps:$4 sm:$0xff]   ;;  %v4841_v43 = vld [vmem:[%s4793_s27 + $0x4c] ss:$16 sps:$4 sm:$0xff]  }
  0x3d   : > { %v4849_v45 = vld [vmem:[%s4793_s27 + $0x40] ss:$16 sps:$4 sm:$0xff]   ;;  %v4852_v46 = vld [vmem:[%s4793_s27 + $0x48] ss:$16 sps:$4 sm:$0xff]   ;;  %v4857_v47 = vld [vmem:[%s4793_s27 + $0x64] ss:$16 sps:$4 sm:$0xff]  }
  0x3e   : > { %v4862_v48 = vld [vmem:[%s4793_s27 + $0x6c] ss:$16 sps:$4 sm:$0xff]   ;;  %v4867_v49 = vld [vmem:[%s4793_s27 + $0x60] ss:$16 sps:$4 sm:$0xff]   ;;  %v4870_v50 = vld [vmem:[%s4793_s27 + $0x68] ss:$16 sps:$4 sm:$0xff]  }
  0x3f   : > { %748 = vmatpush1.bf16.msra.mxu0 %v4098_v19  ;;  %821 = vmatpush1.bf16.msra.mxu1 %v4099_v20  ;;  %v4875_v51 = vld [vmem:[%s4793_s27 + $0x84] ss:$16 sps:$4 sm:$0xff]   ;;  %v4878_v52 = vld [vmem:[%s4793_s27 + $0x8c] ss:$16 sps:$4 sm:$0xff]   ;;  %v4888_v54 = vld [vmem:[%s4793_s27 + $0x80] ss:$16 sps:$4 sm:$0xff]  }
  0x40   : > { %749 = vmatprep.subr.bf16.mxu0 %v4100_v21  ;;  %822 = vmatprep.subr.bf16.mxu1 %v4102_v22  ;;  %v4891_v55 = vld [vmem:[%s4793_s27 + $0x88] ss:$16 sps:$4 sm:$0xff]   ;;  %v4896_v56 = vld [vmem:[%s4793_s27 + $0xa4] ss:$16 sps:$4 sm:$0xff]   ;;  %v4899_v57 = vld [vmem:[%s4793_s27 + $0xac] ss:$16 sps:$4 sm:$0xff]  }
  0x41   : > { %v4904_v58 = vld [vmem:[%s4793_s27 + $0xa0] ss:$16 sps:$4 sm:$0xff]   ;;  %v4907_v59 = vld [vmem:[%s4793_s27 + $0xa8] ss:$16 sps:$4 sm:$0xff]   ;;  %v4912_v60 = vld [vmem:[%s4793_s27 + $0xc4] ss:$16 sps:$4 sm:$0xff]  }
  0x42   : > { %v4915_v61 = vld [vmem:[%s4793_s27 + $0xcc] ss:$16 sps:$4 sm:$0xff]   ;;  %v4925_v63 = vld [vmem:[%s4793_s27 + $0xc0] ss:$16 sps:$4 sm:$0xff]   ;;  %v4928_v1 = vld [vmem:[%s4793_s27 + $0xc8] ss:$16 sps:$4 sm:$0xff]  }
  0x43   : > { %750 = vmatpush1.bf16.msra.mxu0 %v4104_v23  ;;  %823 = vmatpush1.bf16.msra.mxu1 %v4105_v24  ;;  %v4933_v2 = vld [vmem:[%s4793_s27 + $0xe4] ss:$16 sps:$4 sm:$0xff]   ;;  %v4936_v3 = vld [vmem:[%s4793_s27 + $0xec] ss:$16 sps:$4 sm:$0xff]   ;;  %v4941_v4 = vld [vmem:[%s4793_s27 + $0xe0] ss:$16 sps:$4 sm:$0xff]  }
  0x44   : > { %751 = vmatprep.subr.bf16.mxu0 %v4106_v25  ;;  %824 = vmatprep.subr.bf16.mxu1 %v4108_v26  ;;  %v4944_v5 = vld [vmem:[%s4793_s27 + $0xe8] ss:$16 sps:$4 sm:$0xff]   ;;  %s3820_s24 = sshll.u32 %s4720_s30, 2  ;;  %6176 = vst [vmem:[#allocation9_spill] sm:$0xff] %v4991_v7  ;;  %v6168_v8 = vsub.s32 0, %v4991_v7  ;;  %v6167_v9 = vsub.s32 2, %v4991_v7 }
  0x45   : > { %s459_s12 = scalar_lea.vmem %s6157_s5, %s3820_s24  ;;  %v6166_v11 = vsub.s32 1, %v4991_v7  ;;  %v6165_v12 = vsub.s32 3, %v4991_v7 }
  0x46   : > { %v533_v10 = vld [vmem:[%s459_s12] sm:$0xf] }
  0x47   : > { %752 = vmatpush1.bf16.msra.mxu0 %v4110_v27  ;;  %825 = vmatpush1.bf16.msra.mxu1 %v4111_v28  ;;  %v538_v13 = vrot.slane %v533_v10, %v6168_v8  ;;  %v5004_v14 = vrot.slane %v533_v10, %v6167_v9  ;;  %v5008_v15 = vrot.slane %v533_v10, %v6166_v11 }
  0x48   : > { %753 = vmatprep.subr.bf16.mxu0 %v4112_v29  ;;  %826 = vmatprep.subr.bf16.mxu1 %v4114_v30  ;;  %v5012_v16 = vrot.slane %v533_v10, %v6165_v12 }
  0x4b   : > { %754 = vmatpush1.bf16.msra.mxu0 %v4116_v31  ;;  %827 = vmatpush1.bf16.msra.mxu1 %v4117_v32 }
  0x4c   : > { %1113 = vmatprep.subr.bf16.mxu0 %v4805_v33  ;;  %1154 = vmatprep.subr.bf16.mxu1 %v4808_v34 }
  0x4e   : > { %772 = vmatmul.mubr.bf16.vlgmr.msra.gmra.mrb[0].mxu0 %v4118_v35  ;;  %845 = vmatmul.mubr.bf16.vlgmr.msra.gmra.mrb[0].mxu1 %v4118_v35 }
  0x4f   : > { %1114 = vmatpush1.bf16.msra.mxu0 %v4814_v36  ;;  %1155 = vmatpush1.bf16.msra.mxu1 %v4817_v37 }
  0x50   : > { %1115 = vmatprep.subr.bf16.mxu0 %v4820_v38  ;;  %1156 = vmatprep.subr.bf16.mxu1 %v4825_v39 }
  0x51   : > { %781 = vmatprep.mubr.bf16.mxu0 %v6169_v0  ;;  %854 = vmatprep.mubr.bf16.mxu1 %v6169_v0 }
  0x53   : > { %1116 = vmatpush1.bf16.msra.mxu0 %v4828_v40  ;;  %1157 = vmatpush1.bf16.msra.mxu1 %v4833_v41 }
  0x54   : > { %1117 = vmatprep.subr.bf16.mxu0 %v4836_v42  ;;  %1158 = vmatprep.subr.bf16.mxu1 %v4841_v43 }
  0x56   : > { %782 = vmatmul.mubr.bf16.gmra.mrb[4].mxu0 %v4131_v44  ;;  %855 = vmatmul.mubr.bf16.gmra.mrb[4].mxu1 %v4131_v44 }
  0x57   : > { %1118 = vmatpush1.bf16.msra.mxu0 %v4849_v45  ;;  %1159 = vmatpush1.bf16.msra.mxu1 %v4852_v46 }
  0x58   : > { %1119 = vmatprep.subr.bf16.mxu0 %v4857_v47  ;;  %1160 = vmatprep.subr.bf16.mxu1 %v4862_v48 }
  0x59   : > { %791 = vmatprep.mubr.bf16.mxu0 %v6169_v0  ;;  %864 = vmatprep.mubr.bf16.mxu1 %v6169_v0 }
  0x5b   : > { %1120 = vmatpush1.bf16.msra.mxu0 %v4867_v49  ;;  %1161 = vmatpush1.bf16.msra.mxu1 %v4870_v50 }
  0x5c   : > { %1121 = vmatprep.subr.bf16.mxu0 %v4875_v51  ;;  %1162 = vmatprep.subr.bf16.mxu1 %v4878_v52 }
  0x5e   : > { %792 = vmatmul.mubr.bf16.gmra.mrb[8].mxu0 %v4144_v53  ;;  %865 = vmatmul.mubr.bf16.gmra.mrb[8].mxu1 %v4144_v53 }
  0x5f   : > { %1122 = vmatpush1.bf16.msra.mxu0 %v4888_v54  ;;  %1163 = vmatpush1.bf16.msra.mxu1 %v4891_v55 }
  0x60   : > { %1123 = vmatprep.subr.bf16.mxu0 %v4896_v56  ;;  %1164 = vmatprep.subr.bf16.mxu1 %v4899_v57 }
  0x61   : > { %801 = vmatprep.mubr.bf16.mxu0 %v6169_v0  ;;  %874 = vmatprep.mubr.bf16.mxu1 %v6169_v0 }
  0x63   : > { %1124 = vmatpush1.bf16.msra.mxu0 %v4904_v58  ;;  %1165 = vmatpush1.bf16.msra.mxu1 %v4907_v59 }
  0x64   : > { %1125 = vmatprep.subr.bf16.mxu0 %v4912_v60  ;;  %1166 = vmatprep.subr.bf16.mxu1 %v4915_v61 }
  0x66   : > { %802 = vmatmul.mubr.bf16.gmra.mrb[12].mxu0 %v4157_v62  ;;  %875 = vmatmul.mubr.bf16.gmra.mrb[12].mxu1 %v4157_v62 }
  0x67   : > { %1126 = vmatpush1.bf16.msra.mxu0 %v4925_v63  ;;  %1167 = vmatpush1.bf16.msra.mxu1 %v4928_v1 }
  0x68   : > { %1127 = vmatprep.subr.bf16.mxu0 %v4933_v2  ;;  %1168 = vmatprep.subr.bf16.mxu1 %v4936_v3 }
  0x69   : > { %1145 = vmatprep.mubr.bf16.mxu0 %v6169_v0  ;;  %1186 = vmatprep.mubr.bf16.mxu1 %v6169_v0 }
  0x6b   : > { %1128 = vmatpush1.bf16.msra.mxu0 %v4941_v4  ;;  %1169 = vmatpush1.bf16.msra.mxu1 %v4944_v5 }
  0x6c   : > { %1228 = vmatprep.subr.bf16.mxu0 %v4805_v33  ;;  %1269 = vmatprep.subr.bf16.mxu1 %v4808_v34 }
  0x6e   : > { %1146 = vmatmul.mubr.bf16.vlgmr.msra.gmra.mrb[16].mxu0 %v6169_v0  ;;  %1187 = vmatmul.mubr.bf16.vlgmr.msra.gmra.mrb[16].mxu1 %v6169_v0 }
  0x6f   : > { %1229 = vmatpush1.bf16.msra.mxu0 %v4814_v36  ;;  %1270 = vmatpush1.bf16.msra.mxu1 %v4817_v37 }
  0x70   : > { %1230 = vmatprep.subr.bf16.mxu0 %v4820_v38  ;;  %1271 = vmatprep.subr.bf16.mxu1 %v4825_v39 }
  0x71   : > { %1260 = vmatprep.mubr.bf16.mxu0 %v6169_v0  ;;  %1301 = vmatprep.mubr.bf16.mxu1 %v6169_v0 }
  0x73   : > { %1231 = vmatpush1.bf16.msra.mxu0 %v4828_v40  ;;  %1272 = vmatpush1.bf16.msra.mxu1 %v4833_v41 }
  0x74   : > { %1232 = vmatprep.subr.bf16.mxu0 %v4836_v42  ;;  %1273 = vmatprep.subr.bf16.mxu1 %v4841_v43 }
  0x77   : > { %1233 = vmatpush1.bf16.msra.mxu0 %v4849_v45  ;;  %1274 = vmatpush1.bf16.msra.mxu1 %v4852_v46 }
  0x78   : > { %1234 = vmatprep.subr.bf16.mxu0 %v4857_v47  ;;  %1275 = vmatprep.subr.bf16.mxu1 %v4862_v48 }
  0x7b   : > { %1235 = vmatpush1.bf16.msra.mxu0 %v4867_v49  ;;  %1276 = vmatpush1.bf16.msra.mxu1 %v4870_v50 }
  0x7c   : > { %1236 = vmatprep.subr.bf16.mxu0 %v4875_v51  ;;  %1277 = vmatprep.subr.bf16.mxu1 %v4878_v52 }
  0x7f   : > { %1237 = vmatpush1.bf16.msra.mxu0 %v4888_v54  ;;  %1278 = vmatpush1.bf16.msra.mxu1 %v4891_v55 }
  0x80   : > { %1238 = vmatprep.subr.bf16.mxu0 %v4896_v56  ;;  %1279 = vmatprep.subr.bf16.mxu1 %v4899_v57 }
  0x83   : > { %1239 = vmatpush1.bf16.msra.mxu0 %v4904_v58  ;;  %1280 = vmatpush1.bf16.msra.mxu1 %v4907_v59 }
  0x84   : > { %1240 = vmatprep.subr.bf16.mxu0 %v4912_v60  ;;  %1281 = vmatprep.subr.bf16.mxu1 %v4915_v61 }
  0x87   : > { %1241 = vmatpush1.bf16.msra.mxu0 %v4925_v63  ;;  %1282 = vmatpush1.bf16.msra.mxu1 %v4928_v1 }
  0x88   : > { %1242 = vmatprep.subr.bf16.mxu0 %v4933_v2  ;;  %1283 = vmatprep.subr.bf16.mxu1 %v4936_v3 }
  0x8b   : > { %1243 = vmatpush1.bf16.msra.mxu0 %v4941_v4  ;;  %1284 = vmatpush1.bf16.msra.mxu1 %v4944_v5 }
  0x8c   : > { %1343 = vmatprep.subr.bf16.mxu0 %v4805_v33  ;;  %1384 = vmatprep.subr.bf16.mxu1 %v4808_v34 }
 0x121   : > { %v773_v17 = vpop.f32.mrb[0].mxu0  ;;  %v846_v18 = vpop.f32.mrb[0].mxu1 }
 0x122   : > { %v5014_v19 = vadd.f32 %v773_v17, %v538_v13  ;;  %v775_v20 = vpop.f32.mrb[1].mxu0  ;;  %v5017_v21 = vadd.f32 %v846_v18, %v5004_v14  ;;  %v848_v22 = vpop.f32.mrb[1].mxu1 }
 0x123   : > { %v5020_v23 = vadd.f32 %v775_v20, %v5008_v15  ;;  %v777_v24 = vpop.f32.mrb[2].mxu0  ;;  %v5023_v25 = vadd.f32 %v848_v22, %v5012_v16  ;;  %v850_v26 = vpop.f32.mrb[2].mxu1 }
 0x124   : > { %v5025_v27 = vadd.f32 %v777_v24, %v538_v13  ;;  %v779_v28 = vpop.f32.mrb[3].mxu0  ;;  %v5028_v29 = vadd.f32 %v850_v26, %v5004_v14  ;;  %v852_v30 = vpop.f32.mrb[3].mxu1 }
 0x125   : > { %v5031_v31 = vadd.f32 %v779_v28, %v5008_v15  ;;  %v5034_v32 = vadd.f32 %v852_v30, %v5012_v16 }
 0x129   : > { %v783_v35 = vpop.f32.mrb[4].mxu0  ;;  %v856_v44 = vpop.f32.mrb[4].mxu1 }
 0x12a   : > { %v5036_v53 = vadd.f32 %v783_v35, %v538_v13  ;;  %v785_v62 = vpop.f32.mrb[5].mxu0  ;;  %v5039_v6 = vadd.f32 %v856_v44, %v5004_v14  ;;  %v858_v10 = vpop.f32.mrb[5].mxu1 }
 0x12b   : > { %v5042_v17 = vadd.f32 %v785_v62, %v5008_v15  ;;  %v787_v18 = vpop.f32.mrb[6].mxu0  ;;  %v5045_v20 = vadd.f32 %v858_v10, %v5012_v16  ;;  %v860_v22 = vpop.f32.mrb[6].mxu1 }
 0x12c   : > { %v5047_v24 = vadd.f32 %v787_v18, %v538_v13  ;;  %v789_v26 = vpop.f32.mrb[7].mxu0  ;;  %v5050_v28 = vadd.f32 %v860_v22, %v5004_v14  ;;  %v862_v30 = vpop.f32.mrb[7].mxu1 }
 0x12d   : > { %v5053_v35 = vadd.f32 %v789_v26, %v5008_v15  ;;  %v5056_v44 = vadd.f32 %v862_v30, %v5012_v16 }
 0x12e   : > { %6177 = vst [vmem:[#allocation10_spill] sm:$0xff] %v5050_v28 }
 0x12f   : > { %6178 = vst [vmem:[#allocation11_spill] sm:$0xff] %v5056_v44 }
 0x131   : > { %v793_v62 = vpop.f32.mrb[8].mxu0  ;;  %v866_v12 = vpop.f32.mrb[8].mxu1 }
 0x132   : > { %v5058_v11 = vadd.f32 %v793_v62, %v538_v13  ;;  %v795_v10 = vpop.f32.mrb[9].mxu0  ;;  %v5061_v9 = vadd.f32 %v866_v12, %v5004_v14  ;;  %v868_v18 = vpop.f32.mrb[9].mxu1 }
 0x133   : > { %v5064_v8 = vadd.f32 %v795_v10, %v5008_v15  ;;  %v797_v22 = vpop.f32.mrb[10].mxu0  ;;  %v5067_v0 = vadd.f32 %v868_v18, %v5012_v16  ;;  %v870_v26 = vpop.f32.mrb[10].mxu1 }
 0x134   : > { %6179 = vst [vmem:[#allocation12_spill] sm:$0xff] %v5058_v11  ;;  %6180 = vst [vmem:[#allocation13_spill] sm:$0xff] %v5061_v9  ;;  %v5069_v7 = vadd.f32 %v797_v22, %v538_v13  ;;  %v799_v30 = vpop.f32.mrb[11].mxu0  ;;  %v5072_v28 = vadd.f32 %v870_v26, %v5004_v14  ;;  %v872_v62 = vpop.f32.mrb[11].mxu1 }
 0x135   : > { %6181 = vst [vmem:[#allocation14_spill] sm:$0xff] %v5064_v8  ;;  %6182 = vst [vmem:[#allocation15_spill] sm:$0xff] %v5067_v0  ;;  %v5075_v11 = vadd.f32 %v799_v30, %v5008_v15  ;;  %v5078_v12 = vadd.f32 %v872_v62, %v5012_v16 }
 0x136   : > { %6183 = vst [vmem:[#allocation16_spill] sm:$0xff] %v5069_v7  ;;  %6184 = vst [vmem:[#allocation17_spill] sm:$0xff] %v5072_v28 }
 0x137   : > { %6185 = vst [vmem:[#allocation18_spill] sm:$0xff] %v5075_v11  ;;  %6186 = vst [vmem:[#allocation19_spill] sm:$0xff] %v5078_v12 }
 0x139   : > { %v803_v10 = vpop.f32.mrb[12].mxu0  ;;  %v876_v9 = vpop.f32.mrb[12].mxu1 }
 0x13a   : > { %v5080_v8 = vadd.f32 %v803_v10, %v538_v13  ;;  %v805_v18 = vpop.f32.mrb[13].mxu0  ;;  %v5083_v0 = vadd.f32 %v876_v9, %v5004_v14  ;;  %v878_v22 = vpop.f32.mrb[13].mxu1 }
 0x13b   : > { %v5086_v7 = vadd.f32 %v805_v18, %v5008_v15  ;;  %v807_v26 = vpop.f32.mrb[14].mxu0  ;;  %v5089_v28 = vadd.f32 %v878_v22, %v5012_v16  ;;  %v880_v30 = vpop.f32.mrb[14].mxu1 }
 0x13c   : > { %6187 = vst [vmem:[#allocation20_spill] sm:$0xff] %v5080_v8  ;;  %6188 = vst [vmem:[#allocation21_spill] sm:$0xff] %v5083_v0  ;;  %v808_v11 = vadd.f32 %v807_v26, %v538_v13  ;;  %v809_v62 = vpop.f32.mrb[15].mxu0  ;;  %v881_v12 = vadd.f32 %v880_v30, %v5004_v14  ;;  %v882_v44 = vpop.f32.mrb[15].mxu1 }
 0x13d   : > { %6189 = vst [vmem:[#allocation22_spill] sm:$0xff] %v5089_v28  ;;  %v810_v10 = vadd.f32 %v809_v62, %v5008_v15  ;;  %v883_v8 = vadd.f32 %v882_v44, %v5012_v16 }
 0x13e   : > { %913 = vst [vmem:[#allocation2 + $0xe0] sm:$0xff] %v808_v11  ;;  %915 = vst [vmem:[#allocation2 + $0xf0] sm:$0xff] %v881_v12 }
 0x13f   : > { %914 = vst [vmem:[#allocation2 + $0xe8] sm:$0xff] %v810_v10  ;;  %916 = vst [vmem:[#allocation2 + $0xf8] sm:$0xff] %v883_v8 }
 0x141   : > { %v1147_v9 = vpop.f32.mrb[16].mxu0  ;;  %v1188_v18 = vpop.f32.mrb[16].mxu1 }
 0x142   : > { %v1195_v0 = vadd.f32 %v1147_v9, %v5014_v19  ;;  %v1197_v22 = vadd.f32 %v1188_v18, %v5017_v21  ;;  %v1149_v28 = vpop.f32.mrb[17].mxu0  ;;  %v1190_v13 = vpop.f32.mrb[17].mxu1 }
 0x143   : > { %v1196_v26 = vadd.f32 %v1149_v28, %v5020_v23  ;;  %v1198_v14 = vadd.f32 %v1190_v13, %v5023_v25  ;;  %v1151_v30 = vpop.f32.mrb[18].mxu0  ;;  %v1192_v15 = vpop.f32.mrb[18].mxu1 }
 0x144   : > { %v3897_v62 = vmul.f32 -1.442695, %v1195_v0  ;;  %v1152_v16 = vpop.f32.mrb[19].mxu0  ;;  %v1193_v11 = vpop.f32.mrb[19].mxu1 }
 0x145   : > { %v3898_v44 = vmul.f32 -1.442695, %v1196_v26  ;;  %v3899_v8 = vmul.f32 -1.442695, %v1198_v14 }
 0x146   : > { %4170 = vpow2.f32 %v3897_v62  ;;  %v6190_v62 = vmov 0  }
 0x147   : > { %4172 = vpow2.f32 %v3898_v44 }
 0x148   : > { %4174 = vpow2.f32 %v3899_v8 }
 0x149   : > { %4176 = vtanh.f32 %v1197_v22 }
 0x150   : > { %v4171_v12 = vpop.eup %4170 }
 0x151   : > { %v4173_v10 = vpop.eup %4172  ;;  %v1202_v19 = vadd.f32 1.0, %v4171_v12 }
 0x152   : > { %v1208_v21 = vadd.f32 1.0, %v4173_v10  ;;  %v4175_v23 = vpop.eup %4174 }
 0x153   : > { %4178 = vrcp.f32 %v1202_v19  ;;  %v4177_v28 = vpop.eup %4176  ;;  %v1215_v0 = vadd.f32 1.0, %v4175_v23 }
 0x154   : > { %4180 = vrcp.f32 %v1208_v21 }
 0x155   : > { %4182 = vrcp.f32 %v1215_v0 }
 0x15d   : > { %v4179_v25 = vpop.eup %4178 }
 0x15e   : > { %v4181_v9 = vpop.eup %4180  ;;  %v1219_v18 = vmul.f32 %v4179_v25, %v4177_v28 }
 0x15f   : > { %v1218_v13 = vmul.f32 0.0, %v4181_v9  ;;  %v4183_v26 = vpop.eup %4182 }
 0x161   : > { %v5098_v30 = vadd.f32 %v1219_v18, %v1218_v13 }
 0x163   : > { %4184 = vtanh.f32 %v5098_v30 }
 0x16d   : > { %v4185_v14 = vpop.eup %4184 }
 0x16e   : > { %v5101_v15 = vmul.f32 %v4185_v14, %v4183_v26 }
 0x170   : > { %v1227_v22 = vpack.c.bf16 %v5101_v15, %v5101_v15 }
 0x172   : > { %1261 = vmatmul.mubr.bf16.vlgmr.msra.gmra.mrb[20].mxu0 %v1227_v22  ;;  %1302 = vmatmul.mubr.bf16.vlgmr.msra.gmra.mrb[20].mxu1 %v1227_v22 }
 0x173   : > { %1344 = vmatpush1.bf16.msra.mxu0 %v4814_v36  ;;  %1385 = vmatpush1.bf16.msra.mxu1 %v4817_v37 }
 0x174   : > { %1345 = vmatprep.subr.bf16.mxu0 %v4820_v38  ;;  %1386 = vmatprep.subr.bf16.mxu1 %v4825_v39 }
 0x175   : > { %1375 = vmatprep.mubr.bf16.mxu0 %v6190_v62  ;;  %1416 = vmatprep.mubr.bf16.mxu1 %v6190_v62 }
 0x177   : > { %1346 = vmatpush1.bf16.msra.mxu0 %v4828_v40  ;;  %1387 = vmatpush1.bf16.msra.mxu1 %v4833_v41 }
 0x178   : > { %1347 = vmatprep.subr.bf16.mxu0 %v4836_v42  ;;  %1388 = vmatprep.subr.bf16.mxu1 %v4841_v43 }
 0x17b   : > { %1348 = vmatpush1.bf16.msra.mxu0 %v4849_v45  ;;  %1389 = vmatpush1.bf16.msra.mxu1 %v4852_v46 }
 0x17c   : > { %1349 = vmatprep.subr.bf16.mxu0 %v4857_v47  ;;  %1390 = vmatprep.subr.bf16.mxu1 %v4862_v48 }
 0x17f   : > { %1350 = vmatpush1.bf16.msra.mxu0 %v4867_v49  ;;  %1391 = vmatpush1.bf16.msra.mxu1 %v4870_v50 }
 0x180   : > { %1351 = vmatprep.subr.bf16.mxu0 %v4875_v51  ;;  %1392 = vmatprep.subr.bf16.mxu1 %v4878_v52 }
 0x183   : > { %1352 = vmatpush1.bf16.msra.mxu0 %v4888_v54  ;;  %1393 = vmatpush1.bf16.msra.mxu1 %v4891_v55 }
 0x184   : > { %1353 = vmatprep.subr.bf16.mxu0 %v4896_v56  ;;  %1394 = vmatprep.subr.bf16.mxu1 %v4899_v57 }
 0x187   : > { %1354 = vmatpush1.bf16.msra.mxu0 %v4904_v58  ;;  %1395 = vmatpush1.bf16.msra.mxu1 %v4907_v59 }
 0x188   : > { %1355 = vmatprep.subr.bf16.mxu0 %v4912_v60  ;;  %1396 = vmatprep.subr.bf16.mxu1 %v4915_v61 }
 0x18b   : > { %1356 = vmatpush1.bf16.msra.mxu0 %v4925_v63  ;;  %1397 = vmatpush1.bf16.msra.mxu1 %v4928_v1 }
 0x18c   : > { %1357 = vmatprep.subr.bf16.mxu0 %v4933_v2  ;;  %1398 = vmatprep.subr.bf16.mxu1 %v4936_v3 }
 0x18f   : > { %1358 = vmatpush1.bf16.msra.mxu0 %v4941_v4  ;;  %1399 = vmatpush1.bf16.msra.mxu1 %v4944_v5 }
 0x190   : > { %1458 = vmatprep.subr.bf16.mxu0 %v4805_v33  ;;  %1499 = vmatprep.subr.bf16.mxu1 %v4808_v34 }
 0x245   : > { %v1262_v16 = vpop.f32.mrb[20].mxu0  ;;  %v1303_v11 = vpop.f32.mrb[20].mxu1 }
 0x246   : > { %v1310_v44 = vadd.f32 %v1262_v16, %v5025_v27  ;;  %v1264_v8 = vpop.f32.mrb[21].mxu0  ;;  %v1305_v12 = vpop.f32.mrb[21].mxu1  ;;  %v1312_v13 = vadd.f32 %v1303_v11, %v5028_v29 }
 0x247   : > { %v1311_v10 = vadd.f32 %v1264_v8, %v5031_v31  ;;  %v1266_v19 = vpop.f32.mrb[22].mxu0  ;;  %v1307_v21 = vpop.f32.mrb[22].mxu1  ;;  %v1313_v18 = vadd.f32 %v1305_v12, %v5034_v32 }
 0x248   : > { %v3900_v23 = vmul.f32 -1.442695, %v1310_v44  ;;  %v1267_v28 = vpop.f32.mrb[23].mxu0  ;;  %v1308_v25 = vpop.f32.mrb[23].mxu1 }
 0x249   : > { %v3901_v9 = vmul.f32 -1.442695, %v1311_v10  ;;  %v3902_v0 = vmul.f32 -1.442695, %v1313_v18 }
 0x24a   : > { %4186 = vpow2.f32 %v3900_v23 }
 0x24b   : > { %4188 = vpow2.f32 %v3901_v9 }
 0x24c   : > { %4190 = vpow2.f32 %v3902_v0 }
 0x24d   : > { %4192 = vtanh.f32 %v1312_v13 }
 0x254   : > { %v4187_v26 = vpop.eup %4186 }
 0x255   : > { %v4189_v14 = vpop.eup %4188  ;;  %v1317_v27 = vadd.f32 1.0, %v4187_v26 }
 0x256   : > { %v1323_v22 = vadd.f32 1.0, %v4189_v14  ;;  %v4191_v31 = vpop.eup %4190 }
 0x257   : > { %4194 = vrcp.f32 %v1317_v27  ;;  %v4193_v16 = vpop.eup %4192  ;;  %v1330_v19 = vadd.f32 1.0, %v4191_v31 }
 0x258   : > { %4196 = vrcp.f32 %v1323_v22 }
 0x259   : > { %4198 = vrcp.f32 %v1330_v19 }
 0x261   : > { %v4195_v44 = vpop.eup %4194 }
 0x262   : > { %v4197_v8 = vpop.eup %4196  ;;  %v1334_v10 = vmul.f32 %v4195_v44, %v4193_v16 }
 0x263   : > { %v1333_v21 = vmul.f32 %v4197_v8, %v5098_v30  ;;  %v4199_v29 = vpop.eup %4198 }
 0x265   : > { %v5144_v32 = vadd.f32 %v1334_v10, %v1333_v21 }
 0x267   : > { %4200 = vtanh.f32 %v5144_v32 }
 0x271   : > { %v4201_v11 = vpop.eup %4200 }
 0x272   : > { %v5147_v12 = vmul.f32 %v4201_v11, %v4199_v29 }
 0x274   : > { %v1342_v23 = vpack.c.bf16 %v5147_v12, %v5147_v12 }
 0x276   : > { %1376 = vmatmul.mubr.bf16.vlgmr.msra.gmra.mrb[24].mxu0 %v1342_v23  ;;  %1417 = vmatmul.mubr.bf16.vlgmr.msra.gmra.mrb[24].mxu1 %v1342_v23 }
 0x277   : > { %1459 = vmatpush1.bf16.msra.mxu0 %v4814_v36  ;;  %1500 = vmatpush1.bf16.msra.mxu1 %v4817_v37 }
 0x278   : > { %1460 = vmatprep.subr.bf16.mxu0 %v4820_v38  ;;  %1501 = vmatprep.subr.bf16.mxu1 %v4825_v39 }
 0x279   : > { %1490 = vmatprep.mubr.bf16.mxu0 %v6190_v62  ;;  %1531 = vmatprep.mubr.bf16.mxu1 %v6190_v62 }
 0x27b   : > { %1461 = vmatpush1.bf16.msra.mxu0 %v4828_v40  ;;  %1502 = vmatpush1.bf16.msra.mxu1 %v4833_v41 }
 0x27c   : > { %1462 = vmatprep.subr.bf16.mxu0 %v4836_v42  ;;  %1503 = vmatprep.subr.bf16.mxu1 %v4841_v43 }
 0x27f   : > { %1463 = vmatpush1.bf16.msra.mxu0 %v4849_v45  ;;  %1504 = vmatpush1.bf16.msra.mxu1 %v4852_v46 }
 0x280   : > { %1464 = vmatprep.subr.bf16.mxu0 %v4857_v47  ;;  %1505 = vmatprep.subr.bf16.mxu1 %v4862_v48 }
 0x283   : > { %1465 = vmatpush1.bf16.msra.mxu0 %v4867_v49  ;;  %1506 = vmatpush1.bf16.msra.mxu1 %v4870_v50 }
 0x284   : > { %1466 = vmatprep.subr.bf16.mxu0 %v4875_v51  ;;  %1507 = vmatprep.subr.bf16.mxu1 %v4878_v52 }
 0x287   : > { %1467 = vmatpush1.bf16.msra.mxu0 %v4888_v54  ;;  %1508 = vmatpush1.bf16.msra.mxu1 %v4891_v55 }
 0x288   : > { %1468 = vmatprep.subr.bf16.mxu0 %v4896_v56  ;;  %1509 = vmatprep.subr.bf16.mxu1 %v4899_v57 }
 0x28b   : > { %1469 = vmatpush1.bf16.msra.mxu0 %v4904_v58  ;;  %1510 = vmatpush1.bf16.msra.mxu1 %v4907_v59 }
 0x28c   : > { %1470 = vmatprep.subr.bf16.mxu0 %v4912_v60  ;;  %1511 = vmatprep.subr.bf16.mxu1 %v4915_v61 }
 0x28f   : > { %1471 = vmatpush1.bf16.msra.mxu0 %v4925_v63  ;;  %1512 = vmatpush1.bf16.msra.mxu1 %v4928_v1 }
 0x290   : > { %1472 = vmatprep.subr.bf16.mxu0 %v4933_v2  ;;  %1513 = vmatprep.subr.bf16.mxu1 %v4936_v3 }
 0x293   : > { %1473 = vmatpush1.bf16.msra.mxu0 %v4941_v4  ;;  %1514 = vmatpush1.bf16.msra.mxu1 %v4944_v5 }
 0x294   : > { %1573 = vmatprep.subr.bf16.mxu0 %v4805_v33  ;;  %1614 = vmatprep.subr.bf16.mxu1 %v4808_v34 }
 0x349   : > { %v1377_v30 = vpop.f32.mrb[24].mxu0  ;;  %v1418_v28 = vpop.f32.mrb[24].mxu1 }
 0x34a   : > { %v1425_v25 = vadd.f32 %v1377_v30, %v5036_v53  ;;  %v1379_v9 = vpop.f32.mrb[25].mxu0  ;;  %v1420_v18 = vpop.f32.mrb[25].mxu1  ;;  %v1427_v8 = vadd.f32 %v1418_v28, %v5039_v6 }
 0x34b   : > { %v1426_v0 = vadd.f32 %v1379_v9, %v5042_v17  ;;  %v1381_v13 = vpop.f32.mrb[26].mxu0  ;;  %v1422_v26 = vpop.f32.mrb[26].mxu1  ;;  %v1428_v16 = vadd.f32 %v1420_v18, %v5045_v20 }
 0x34c   : > { %v3903_v14 = vmul.f32 -1.442695, %v1425_v25  ;;  %v1382_v27 = vpop.f32.mrb[27].mxu0  ;;  %v1423_v22 = vpop.f32.mrb[27].mxu1 }
 0x34d   : > { %v3904_v31 = vmul.f32 -1.442695, %v1426_v0  ;;  %v3905_v44 = vmul.f32 -1.442695, %v1428_v16 }
 0x34e   : > { %4202 = vpow2.f32 %v3903_v14 }
 0x34f   : > { %4204 = vpow2.f32 %v3904_v31 }
 0x350   : > { %4206 = vpow2.f32 %v3905_v44 }
 0x351   : > { %4208 = vtanh.f32 %v1427_v8 }
 0x358   : > { %v4203_v10 = vpop.eup %4202 }
 0x359   : > { %v4205_v19 = vpop.eup %4204  ;;  %v1432_v53 = vadd.f32 1.0, %v4203_v10  ;;  %v6191_v10 = vld [vmem:[#allocation11_spill] sm:$0xff] }
 0x35a   : > { %v1438_v21 = vadd.f32 1.0, %v4205_v19  ;;  %v4207_v17 = vpop.eup %4206 }
 0x35b   : > { %4210 = vrcp.f32 %v1432_v53  ;;  %v4209_v29 = vpop.eup %4208  ;;  %v1445_v25 = vadd.f32 1.0, %v4207_v17 }
 0x35c   : > { %4212 = vrcp.f32 %v1438_v21 }
 0x35d   : > { %4214 = vrcp.f32 %v1445_v25 }
 0x365   : > { %v4211_v11 = vpop.eup %4210 }
 0x366   : > { %v4213_v23 = vpop.eup %4212  ;;  %v1449_v30 = vmul.f32 %v4211_v11, %v4209_v29 }
 0x367   : > { %v1448_v9 = vmul.f32 %v4213_v23, %v5144_v32  ;;  %v4215_v6 = vpop.eup %4214 }
 0x369   : > { %v5190_v20 = vadd.f32 %v1449_v30, %v1448_v9 }
 0x36b   : > { %4216 = vtanh.f32 %v5190_v20 }
 0x375   : > { %v4217_v28 = vpop.eup %4216 }
 0x376   : > { %v5193_v18 = vmul.f32 %v4217_v28, %v4215_v6 }
 0x378   : > { %v1457_v0 = vpack.c.bf16 %v5193_v18, %v5193_v18 }
 0x37a   : > { %1491 = vmatmul.mubr.bf16.vlgmr.msra.gmra.mrb[28].mxu0 %v1457_v0  ;;  %1532 = vmatmul.mubr.bf16.vlgmr.msra.gmra.mrb[28].mxu1 %v1457_v0 }
 0x37b   : > { %1574 = vmatpush1.bf16.msra.mxu0 %v4814_v36  ;;  %1615 = vmatpush1.bf16.msra.mxu1 %v4817_v37 }
 0x37c   : > { %1575 = vmatprep.subr.bf16.mxu0 %v4820_v38  ;;  %1616 = vmatprep.subr.bf16.mxu1 %v4825_v39 }
 0x37d   : > { %1605 = vmatprep.mubr.bf16.mxu0 %v6190_v62  ;;  %1646 = vmatprep.mubr.bf16.mxu1 %v6190_v62 }
 0x37f   : > { %1576 = vmatpush1.bf16.msra.mxu0 %v4828_v40  ;;  %1617 = vmatpush1.bf16.msra.mxu1 %v4833_v41 }
 0x380   : > { %1577 = vmatprep.subr.bf16.mxu0 %v4836_v42  ;;  %1618 = vmatprep.subr.bf16.mxu1 %v4841_v43 }
 0x383   : > { %1578 = vmatpush1.bf16.msra.mxu0 %v4849_v45  ;;  %1619 = vmatpush1.bf16.msra.mxu1 %v4852_v46 }
 0x384   : > { %1579 = vmatprep.subr.bf16.mxu0 %v4857_v47  ;;  %1620 = vmatprep.subr.bf16.mxu1 %v4862_v48 }
 0x387   : > { %1580 = vmatpush1.bf16.msra.mxu0 %v4867_v49  ;;  %1621 = vmatpush1.bf16.msra.mxu1 %v4870_v50 }
 0x388   : > { %1581 = vmatprep.subr.bf16.mxu0 %v4875_v51  ;;  %1622 = vmatprep.subr.bf16.mxu1 %v4878_v52 }
 0x38b   : > { %1582 = vmatpush1.bf16.msra.mxu0 %v4888_v54  ;;  %1623 = vmatpush1.bf16.msra.mxu1 %v4891_v55 }
 0x38c   : > { %1583 = vmatprep.subr.bf16.mxu0 %v4896_v56  ;;  %1624 = vmatprep.subr.bf16.mxu1 %v4899_v57 }
 0x38f   : > { %1584 = vmatpush1.bf16.msra.mxu0 %v4904_v58  ;;  %1625 = vmatpush1.bf16.msra.mxu1 %v4907_v59 }
 0x390   : > { %1585 = vmatprep.subr.bf16.mxu0 %v4912_v60  ;;  %1626 = vmatprep.subr.bf16.mxu1 %v4915_v61 }
 0x393   : > { %1586 = vmatpush1.bf16.msra.mxu0 %v4925_v63  ;;  %1627 = vmatpush1.bf16.msra.mxu1 %v4928_v1 }
 0x394   : > { %1587 = vmatprep.subr.bf16.mxu0 %v4933_v2  ;;  %1628 = vmatprep.subr.bf16.mxu1 %v4936_v3 }
 0x397   : > { %1588 = vmatpush1.bf16.msra.mxu0 %v4941_v4  ;;  %1629 = vmatpush1.bf16.msra.mxu1 %v4944_v5 }
 0x398   : > { %1688 = vmatprep.subr.bf16.mxu0 %v4805_v33  ;;  %1729 = vmatprep.subr.bf16.mxu1 %v4808_v34  ;;  %v6192_v34 = vld [vmem:[#allocation10_spill] sm:$0xff] }
 0x44d   : > { %v1492_v36 = vpop.f32.mrb[28].mxu0  ;;  %v1533_v37 = vpop.f32.mrb[28].mxu1 }
 0x44e   : > { %v1540_v32 = vadd.f32 %v1492_v36, %v5047_v24  ;;  %v1494_v13 = vpop.f32.mrb[29].mxu0  ;;  %v1535_v26 = vpop.f32.mrb[29].mxu1  ;;  %v1542_v53 = vadd.f32 %v1533_v37, %v6192_v34  ;;  %v5314_v34 = vld [vmem:[%s4793_s27 + $0x20] ss:$16 sps:$4 sm:$0xff]  }
 0x44f   : > { %v1541_v14 = vadd.f32 %v1494_v13, %v5053_v35  ;;  %v1496_v27 = vpop.f32.mrb[30].mxu0  ;;  %v1537_v22 = vpop.f32.mrb[30].mxu1  ;;  %v1543_v33 = vadd.f32 %v1535_v26, %v6191_v10  ;;  %v5244_v13 = vld [vmem:[%s4793_s27] ss:$16 sps:$4 sm:$0xff]   ;;  %v5248_v26 = vld [vmem:[%s4793_s27 + $0x8] ss:$16 sps:$4 sm:$0xff]  }
 0x450   : > { %v3906_v31 = vmul.f32 -1.442695, %v1540_v32  ;;  %v1497_v16 = vpop.f32.mrb[31].mxu0  ;;  %v1538_v44 = vpop.f32.mrb[31].mxu1 }
 0x451   : > { %v3907_v8 = vmul.f32 -1.442695, %v1541_v14  ;;  %v3908_v19 = vmul.f32 -1.442695, %v1543_v33  ;;  %v5304_v33 = vld [vmem:[%s4793_s27 + $0x24] ss:$16 sps:$4 sm:$0xff]  }
 0x452   : > { %4218 = vpow2.f32 %v3906_v31 }
 0x453   : > { %4220 = vpow2.f32 %v3907_v8 }
 0x454   : > { %4222 = vpow2.f32 %v3908_v19  ;;  %v5308_v19 = vld [vmem:[%s4793_s27 + $0x2c] ss:$16 sps:$4 sm:$0xff]  }
 0x455   : > { %4224 = vtanh.f32 %v1542_v53  ;;  %v5318_v53 = vld [vmem:[%s4793_s27 + $0x28] ss:$16 sps:$4 sm:$0xff]  }
 0x45c   : > { %v4219_v21 = vpop.eup %4218 }
 0x45d   : > { %v4221_v17 = vpop.eup %4220  ;;  %v1547_v24 = vadd.f32 1.0, %v4219_v21  ;;  %v5322_v21 = vld [vmem:[%s4793_s27 + $0x44] ss:$16 sps:$4 sm:$0xff]  }
 0x45e   : > { %v1553_v29 = vadd.f32 1.0, %v4221_v17  ;;  %v4223_v35 = vpop.eup %4222  ;;  %v5326_v17 = vld [vmem:[%s4793_s27 + $0x4c] ss:$16 sps:$4 sm:$0xff]  }
 0x45f   : > { %4226 = vrcp.f32 %v1547_v24  ;;  %v4225_v11 = vpop.eup %4224  ;;  %v1560_v9 = vadd.f32 1.0, %v4223_v35  ;;  %v5330_v24 = vld [vmem:[%s4793_s27 + $0x40] ss:$16 sps:$4 sm:$0xff]   ;;  %v5338_v35 = vld [vmem:[%s4793_s27 + $0x64] ss:$16 sps:$4 sm:$0xff]  }
 0x460   : > { %4228 = vrcp.f32 %v1553_v29  ;;  %v5334_v29 = vld [vmem:[%s4793_s27 + $0x48] ss:$16 sps:$4 sm:$0xff]  }
 0x461   : > { %4230 = vrcp.f32 %v1560_v9  ;;  %v5358_v9 = vld [vmem:[%s4793_s27 + $0x8c] ss:$16 sps:$4 sm:$0xff]  }
 0x469   : > { %v4227_v23 = vpop.eup %4226 }
 0x46a   : > { %v4229_v30 = vpop.eup %4228  ;;  %v1564_v25 = vmul.f32 %v4227_v23, %v4225_v11  ;;  %v5342_v11 = vld [vmem:[%s4793_s27 + $0x6c] ss:$16 sps:$4 sm:$0xff]   ;;  %v5346_v23 = vld [vmem:[%s4793_s27 + $0x60] ss:$16 sps:$4 sm:$0xff]  }
 0x46b   : > { %v1563_v6 = vmul.f32 %v4229_v30, %v5190_v20  ;;  %v4231_v0 = vpop.eup %4230  ;;  %v5350_v30 = vld [vmem:[%s4793_s27 + $0x68] ss:$16 sps:$4 sm:$0xff]  }
 0x46d   : > { %v5236_v28 = vadd.f32 %v1564_v25, %v1563_v6  ;;  %v5354_v25 = vld [vmem:[%s4793_s27 + $0x84] ss:$16 sps:$4 sm:$0xff]   ;;  %v5362_v6 = vld [vmem:[%s4793_s27 + $0x80] ss:$16 sps:$4 sm:$0xff]  }
 0x46f   : > { %4232 = vtanh.f32 %v5236_v28 }
 0x479   : > { %v4233_v36 = vpop.eup %4232 }
 0x47a   : > { %v5239_v37 = vmul.f32 %v4233_v36, %v4231_v0  ;;  %v5370_v0 = vld [vmem:[%s4793_s27 + $0xa4] ss:$16 sps:$4 sm:$0xff]   ;;  %v5374_v36 = vld [vmem:[%s4793_s27 + $0xac] ss:$16 sps:$4 sm:$0xff]  }
 0x47c   : > { %v1572_v32 = vpack.c.bf16 %v5239_v37, %v5239_v37 }
 0x47e   : > { %1606 = vmatmul.mubr.bf16.vlgmr.msra.gmra.mrb[32].mxu0 %v1572_v32  ;;  %1647 = vmatmul.mubr.bf16.vlgmr.msra.gmra.mrb[32].mxu1 %v1572_v32  ;;  %v5378_v32 = vld [vmem:[%s4793_s27 + $0xa0] ss:$16 sps:$4 sm:$0xff]  }
 0x47f   : > { %1689 = vmatpush1.bf16.msra.mxu0 %v5244_v13  ;;  %1730 = vmatpush1.bf16.msra.mxu1 %v5248_v26 }
 0x480   : > { %1690 = vmatprep.subr.bf16.mxu0 %v4820_v38  ;;  %1731 = vmatprep.subr.bf16.mxu1 %v4825_v39  ;;  %v5282_v38 = vld [vmem:[%s4793_s27 + $0x4] ss:$16 sps:$4 sm:$0xff]   ;;  %v5286_v39 = vld [vmem:[%s4793_s27 + $0xc] ss:$16 sps:$4 sm:$0xff]  }
 0x481   : > { %1720 = vmatprep.mubr.bf16.mxu0 %v6190_v62  ;;  %1761 = vmatprep.mubr.bf16.mxu1 %v6190_v62 }
 0x483   : > { %1691 = vmatpush1.bf16.msra.mxu0 %v4828_v40  ;;  %1732 = vmatpush1.bf16.msra.mxu1 %v4833_v41 }
 0x484   : > { %1692 = vmatprep.subr.bf16.mxu0 %v4836_v42  ;;  %1733 = vmatprep.subr.bf16.mxu1 %v4841_v43  ;;  %v6193_v42 = vld [vmem:[#allocation12_spill] sm:$0xff] }
 0x487   : > { %1693 = vmatpush1.bf16.msra.mxu0 %v4849_v45  ;;  %1734 = vmatpush1.bf16.msra.mxu1 %v4852_v46 }
 0x488   : > { %1694 = vmatprep.subr.bf16.mxu0 %v4857_v47  ;;  %1735 = vmatprep.subr.bf16.mxu1 %v4862_v48  ;;  %v6194_v47 = vld [vmem:[#allocation14_spill] sm:$0xff] }
 0x48b   : > { %1695 = vmatpush1.bf16.msra.mxu0 %v4867_v49  ;;  %1736 = vmatpush1.bf16.msra.mxu1 %v4870_v50 }
 0x48c   : > { %1696 = vmatprep.subr.bf16.mxu0 %v4875_v51  ;;  %1737 = vmatprep.subr.bf16.mxu1 %v4878_v52 }
 0x48f   : > { %1697 = vmatpush1.bf16.msra.mxu0 %v4888_v54  ;;  %1738 = vmatpush1.bf16.msra.mxu1 %v4891_v55 }
 0x490   : > { %1698 = vmatprep.subr.bf16.mxu0 %v4896_v56  ;;  %1739 = vmatprep.subr.bf16.mxu1 %v4899_v57  ;;  %v6195_v56 = vld [vmem:[#allocation15_spill] sm:$0xff] }
 0x493   : > { %1699 = vmatpush1.bf16.msra.mxu0 %v4904_v58  ;;  %1740 = vmatpush1.bf16.msra.mxu1 %v4907_v59  ;;  %v6196_v59 = vld [vmem:[#allocation13_spill] sm:$0xff] }
 0x494   : > { %1700 = vmatprep.subr.bf16.mxu0 %v4912_v60  ;;  %1741 = vmatprep.subr.bf16.mxu1 %v4915_v61 }
 0x497   : > { %1701 = vmatpush1.bf16.msra.mxu0 %v4925_v63  ;;  %1742 = vmatpush1.bf16.msra.mxu1 %v4928_v1 }
 0x498   : > { %1702 = vmatprep.subr.bf16.mxu0 %v4933_v2  ;;  %1743 = vmatprep.subr.bf16.mxu1 %v4936_v3 }
 0x49b   : > { %1703 = vmatpush1.bf16.msra.mxu0 %v4941_v4  ;;  %1744 = vmatpush1.bf16.msra.mxu1 %v4944_v5 }
 0x49c   : > { %1803 = vmatprep.subr.bf16.mxu0 %v5282_v38  ;;  %1844 = vmatprep.subr.bf16.mxu1 %v5286_v39 }
 0x551   : > { %v1607_v40 = vpop.f32.mrb[32].mxu0  ;;  %v1648_v41 = vpop.f32.mrb[32].mxu1 }
 0x552   : > { %v1655_v43 = vadd.f32 %v1607_v40, %v6193_v42  ;;  %v1609_v45 = vpop.f32.mrb[33].mxu0  ;;  %v1650_v46 = vpop.f32.mrb[33].mxu1  ;;  %v1657_v60 = vadd.f32 %v1648_v41, %v6196_v59  ;;  %v5382_v40 = vld [vmem:[%s4793_s27 + $0xa8] ss:$16 sps:$4 sm:$0xff]   ;;  %v5386_v41 = vld [vmem:[%s4793_s27 + $0xc4] ss:$16 sps:$4 sm:$0xff]  }
 0x553   : > { %v1656_v48 = vadd.f32 %v1609_v45, %v6194_v47  ;;  %v1611_v49 = vpop.f32.mrb[34].mxu0  ;;  %v1652_v50 = vpop.f32.mrb[34].mxu1  ;;  %v1658_v57 = vadd.f32 %v1650_v46, %v6195_v56  ;;  %v5390_v42 = vld [vmem:[%s4793_s27 + $0xcc] ss:$16 sps:$4 sm:$0xff]   ;;  %v5398_v45 = vld [vmem:[%s4793_s27 + $0xc8] ss:$16 sps:$4 sm:$0xff]  }
 0x554   : > { %v3909_v51 = vmul.f32 -1.442695, %v1655_v43  ;;  %v1612_v52 = vpop.f32.mrb[35].mxu0  ;;  %v1653_v54 = vpop.f32.mrb[35].mxu1  ;;  %v5394_v43 = vld [vmem:[%s4793_s27 + $0xc0] ss:$16 sps:$4 sm:$0xff]  }
 0x555   : > { %v3910_v55 = vmul.f32 -1.442695, %v1656_v48  ;;  %v3911_v58 = vmul.f32 -1.442695, %v1658_v57  ;;  %v5402_v46 = vld [vmem:[%s4793_s27 + $0xe4] ss:$16 sps:$4 sm:$0xff]  }
 0x556   : > { %4234 = vpow2.f32 %v3909_v51  ;;  %v5406_v47 = vld [vmem:[%s4793_s27 + $0xec] ss:$16 sps:$4 sm:$0xff]   ;;  %v5410_v48 = vld [vmem:[%s4793_s27 + $0xe0] ss:$16 sps:$4 sm:$0xff]   ;;  %v5414_v49 = vld [vmem:[%s4793_s27 + $0xe8] ss:$16 sps:$4 sm:$0xff]  }
 0x557   : > { %4236 = vpow2.f32 %v3910_v55  ;;  %v6197_v52 = vld [vmem:[#allocation16_spill] sm:$0xff]  ;;  %v6198_v57 = vld [vmem:[#allocation18_spill] sm:$0xff] }
 0x558   : > { %4238 = vpow2.f32 %v3911_v58 }
 0x559   : > { %4240 = vtanh.f32 %v1657_v60 }
 0x560   : > { %v4235_v61 = vpop.eup %4234 }
 0x561   : > { %v4237_v63 = vpop.eup %4236  ;;  %v1662_v1 = vadd.f32 1.0, %v4235_v61 }
 0x562   : > { %v1668_v2 = vadd.f32 1.0, %v4237_v63  ;;  %v4239_v3 = vpop.eup %4238 }
 0x563   : > { %4242 = vrcp.f32 %v1662_v1  ;;  %v4241_v4 = vpop.eup %4240  ;;  %v1675_v27 = vadd.f32 1.0, %v4239_v3  ;;  %v6199_v3 = vld [vmem:[#allocation19_spill] sm:$0xff] }
 0x564   : > { %4244 = vrcp.f32 %v1668_v2 }
 0x565   : > { %4246 = vrcp.f32 %v1675_v27 }
 0x56d   : > { %v4243_v5 = vpop.eup %4242 }
 0x56e   : > { %v4245_v20 = vpop.eup %4244  ;;  %v1679_v14 = vmul.f32 %v4243_v5, %v4241_v4 }
 0x56f   : > { %v1678_v22 = vmul.f32 %v4245_v20, %v5236_v28  ;;  %v4247_v16 = vpop.eup %4246  ;;  %v5366_v28 = vld [vmem:[%s4793_s27 + $0x88] ss:$16 sps:$4 sm:$0xff]   ;;  %s5469_s27 = sld [smem:[#allocation6 + %s4707_s26]] }
 0x571   : > { %v5294_v31 = vadd.f32 %v1679_v14, %v1678_v22 }
 0x573   : > { %4248 = vtanh.f32 %v5294_v31 }
 0x575   : > { %p3921_p3 = scmp.le.s32.totalorder %s5469_s27, 1 }
 0x576   : > { %2034 = vst [vmem:[#allocation3] sm:$0xff] (!%p3921_p3), %v5101_v15  ;;  %2035 = vst [vmem:[#allocation3 + $0x8] sm:$0xff] (!%p3921_p3), %v5147_v12 }
 0x577   : > { %2036 = vst [vmem:[#allocation3 + $0x10] sm:$0xff] (!%p3921_p3), %v5193_v18  ;;  %2037 = vst [vmem:[#allocation3 + $0x18] sm:$0xff] (!%p3921_p3), %v5239_v37 }
 0x57d   : > { %v4249_v44 = vpop.eup %4248 }
 0x57e   : > { %v5297_v8 = vmul.f32 %v4249_v44, %v4247_v16 }
 0x580   : > { %v1687_v10 = vpack.c.bf16 %v5297_v8, %v5297_v8  ;;  %2038 = vst [vmem:[#allocation3 + $0x20] sm:$0xff] (!%p3921_p3), %v5297_v8 }
 0x582   : > { %1721 = vmatmul.mubr.bf16.vlgmr.msra.gmra.mrb[36].mxu0 %v1687_v10  ;;  %1762 = vmatmul.mubr.bf16.vlgmr.msra.gmra.mrb[36].mxu1 %v1687_v10 }
 0x583   : > { %1804 = vmatpush1.bf16.msra.mxu0 %v5244_v13  ;;  %1845 = vmatpush1.bf16.msra.mxu1 %v5248_v26 }
 0x584   : > { %1805 = vmatprep.subr.bf16.mxu0 %v5304_v33  ;;  %1846 = vmatprep.subr.bf16.mxu1 %v5308_v19 }
 0x585   : > { %1835 = vmatprep.mubr.bf16.mxu0 %v6190_v62  ;;  %1876 = vmatprep.mubr.bf16.mxu1 %v6190_v62 }
 0x587   : > { %1806 = vmatpush1.bf16.msra.mxu0 %v5314_v34  ;;  %1847 = vmatpush1.bf16.msra.mxu1 %v5318_v53 }
 0x588   : > { %1807 = vmatprep.subr.bf16.mxu0 %v5322_v21  ;;  %1848 = vmatprep.subr.bf16.mxu1 %v5326_v17 }
 0x58b   : > { %1808 = vmatpush1.bf16.msra.mxu0 %v5330_v24  ;;  %1849 = vmatpush1.bf16.msra.mxu1 %v5334_v29 }
 0x58c   : > { %1809 = vmatprep.subr.bf16.mxu0 %v5338_v35  ;;  %1850 = vmatprep.subr.bf16.mxu1 %v5342_v11 }
 0x58f   : > { %1810 = vmatpush1.bf16.msra.mxu0 %v5346_v23  ;;  %1851 = vmatpush1.bf16.msra.mxu1 %v5350_v30 }
 0x590   : > { %1811 = vmatprep.subr.bf16.mxu0 %v5354_v25  ;;  %1852 = vmatprep.subr.bf16.mxu1 %v5358_v9 }
 0x593   : > { %1812 = vmatpush1.bf16.msra.mxu0 %v5362_v6  ;;  %1853 = vmatpush1.bf16.msra.mxu1 %v5366_v28 }
 0x594   : > { %1813 = vmatprep.subr.bf16.mxu0 %v5370_v0  ;;  %1854 = vmatprep.subr.bf16.mxu1 %v5374_v36 }
 0x597   : > { %1814 = vmatpush1.bf16.msra.mxu0 %v5378_v32  ;;  %1855 = vmatpush1.bf16.msra.mxu1 %v5382_v40 }
 0x598   : > { %1815 = vmatprep.subr.bf16.mxu0 %v5386_v41  ;;  %1856 = vmatprep.subr.bf16.mxu1 %v5390_v42 }
 0x59b   : > { %1816 = vmatpush1.bf16.msra.mxu0 %v5394_v43  ;;  %1857 = vmatpush1.bf16.msra.mxu1 %v5398_v45 }
 0x59c   : > { %1817 = vmatprep.subr.bf16.mxu0 %v5402_v46  ;;  %1858 = vmatprep.subr.bf16.mxu1 %v5406_v47 }
 0x59f   : > { %1818 = vmatpush1.bf16.msra.mxu0 %v5410_v48  ;;  %1859 = vmatpush1.bf16.msra.mxu1 %v5414_v49 }
 0x5a0   : > { %1918 = vmatprep.subr.bf16.mxu0 %v5282_v38  ;;  %1959 = vmatprep.subr.bf16.mxu1 %v5286_v39  ;;  %v6200_v39 = vld [vmem:[#allocation17_spill] sm:$0xff] }
 0x655   : > { %v1722_v50 = vpop.f32.mrb[36].mxu0  ;;  %v1763_v51 = vpop.f32.mrb[36].mxu1 }
 0x656   : > { %v1770_v54 = vadd.f32 %v1722_v50, %v6197_v52  ;;  %v1724_v55 = vpop.f32.mrb[37].mxu0  ;;  %v1765_v56 = vpop.f32.mrb[37].mxu1  ;;  %v1772_v5 = vadd.f32 %v1763_v51, %v6200_v39 }
 0x657   : > { %v1771_v58 = vadd.f32 %v1724_v55, %v6198_v57  ;;  %v1726_v59 = vpop.f32.mrb[38].mxu0  ;;  %v1767_v60 = vpop.f32.mrb[38].mxu1  ;;  %v1773_v38 = vadd.f32 %v1765_v56, %v6199_v3  ;;  %v1914_v3 = vld [vmem:[#allocation2 + $0xe8] sm:$0xff] }
 0x658   : > { %v3912_v61 = vmul.f32 -1.442695, %v1770_v54  ;;  %v1727_v63 = vpop.f32.mrb[39].mxu0  ;;  %v1768_v1 = vpop.f32.mrb[39].mxu1 }
 0x659   : > { %v3913_v2 = vmul.f32 -1.442695, %v1771_v58  ;;  %v3914_v4 = vmul.f32 -1.442695, %v1773_v38 }
 0x65a   : > { %4250 = vpow2.f32 %v3912_v61  ;;  %v1913_v61 = vld [vmem:[#allocation2 + $0xe0] sm:$0xff] }
 0x65b   : > { %4252 = vpow2.f32 %v3913_v2 }
 0x65c   : > { %4254 = vpow2.f32 %v3914_v4 }
 0x65d   : > { %4256 = vtanh.f32 %v1772_v5 }
 0x664   : > { %v4251_v20 = vpop.eup %4250 }
 0x665   : > { %v4253_v14 = vpop.eup %4252  ;;  %v1777_v27 = vadd.f32 1.0, %v4251_v20 }
 0x666   : > { %v1783_v22 = vadd.f32 1.0, %v4253_v14  ;;  %v4255_v16 = vpop.eup %4254 }
 0x667   : > { %4258 = vrcp.f32 %v1777_v27  ;;  %v4257_v44 = vpop.eup %4256  ;;  %v1790_v54 = vadd.f32 1.0, %v4255_v16 }
 0x668   : > { %4260 = vrcp.f32 %v1783_v22 }
 0x669   : > { %4262 = vrcp.f32 %v1790_v54 }
 0x671   : > { %v4259_v10 = vpop.eup %4258 }
 0x672   : > { %v4261_v50 = vpop.eup %4260  ;;  %v1794_v52 = vmul.f32 %v4259_v10, %v4257_v44  ;;  %v1916_v44 = vld [vmem:[#allocation2 + $0xf8] sm:$0xff] }
 0x673   : > { %v1793_v55 = vmul.f32 %v4261_v50, %v5294_v31  ;;  %v4263_v51 = vpop.eup %4262 }
 0x675   : > { %v5424_v56 = vadd.f32 %v1794_v52, %v1793_v55  ;;  %v4330_v52 = vld [vmem:[#allocation2 + $0xf0] sm:$0xff] }
 0x677   : > { %4264 = vtanh.f32 %v5424_v56 }
 0x681   : > { %v4265_v57 = vpop.eup %4264 }
 0x682   : > { %v5427_v58 = vmul.f32 %v4265_v57, %v4263_v51 }
 0x684   : > { %v1802_v59 = vpack.c.bf16 %v5427_v58, %v5427_v58  ;;  %2039 = vst [vmem:[#allocation3 + $0x28] sm:$0xff] (!%p3921_p3), %v5427_v58 }
 0x686   : > { %1836 = vmatmul.mubr.bf16.vlgmr.msra.gmra.mrb[40].mxu0 %v1802_v59  ;;  %1877 = vmatmul.mubr.bf16.vlgmr.msra.gmra.mrb[40].mxu1 %v1802_v59 }
 0x687   : > { %1919 = vmatpush1.bf16.msra.mxu0 %v5244_v13  ;;  %1960 = vmatpush1.bf16.msra.mxu1 %v5248_v26  ;;  %v6201_v26 = vld [vmem:[#allocation20_spill] sm:$0xff] }
 0x688   : > { %1920 = vmatprep.subr.bf16.mxu0 %v5304_v33  ;;  %1961 = vmatprep.subr.bf16.mxu1 %v5308_v19 }
 0x689   : > { %1950 = vmatprep.mubr.bf16.mxu0 %v6190_v62  ;;  %1991 = vmatprep.mubr.bf16.mxu1 %v6190_v62 }
 0x68b   : > { %1921 = vmatpush1.bf16.msra.mxu0 %v5314_v34  ;;  %1962 = vmatpush1.bf16.msra.mxu1 %v5318_v53 }
 0x68c   : > { %1922 = vmatprep.subr.bf16.mxu0 %v5322_v21  ;;  %1963 = vmatprep.subr.bf16.mxu1 %v5326_v17 }
 0x68f   : > { %1923 = vmatpush1.bf16.msra.mxu0 %v5330_v24  ;;  %1964 = vmatpush1.bf16.msra.mxu1 %v5334_v29 }
 0x690   : > { %1924 = vmatprep.subr.bf16.mxu0 %v5338_v35  ;;  %1965 = vmatprep.subr.bf16.mxu1 %v5342_v11  ;;  %v6202_v11 = vld [vmem:[#allocation22_spill] sm:$0xff] }
 0x693   : > { %1925 = vmatpush1.bf16.msra.mxu0 %v5346_v23  ;;  %1966 = vmatpush1.bf16.msra.mxu1 %v5350_v30 }
 0x694   : > { %1926 = vmatprep.subr.bf16.mxu0 %v5354_v25  ;;  %1967 = vmatprep.subr.bf16.mxu1 %v5358_v9  ;;  %v6203_v25 = vld [vmem:[#allocation21_spill] sm:$0xff] }
 0x697   : > { %1927 = vmatpush1.bf16.msra.mxu0 %v5362_v6  ;;  %1968 = vmatpush1.bf16.msra.mxu1 %v5366_v28 }
 0x698   : > { %1928 = vmatprep.subr.bf16.mxu0 %v5370_v0  ;;  %1969 = vmatprep.subr.bf16.mxu1 %v5374_v36 }
 0x69b   : > { %1929 = vmatpush1.bf16.msra.mxu0 %v5378_v32  ;;  %1970 = vmatpush1.bf16.msra.mxu1 %v5382_v40 }
 0x69c   : > { %1930 = vmatprep.subr.bf16.mxu0 %v5386_v41  ;;  %1971 = vmatprep.subr.bf16.mxu1 %v5390_v42 }
 0x69f   : > { %1931 = vmatpush1.bf16.msra.mxu0 %v5394_v43  ;;  %1972 = vmatpush1.bf16.msra.mxu1 %v5398_v45 }
 0x6a0   : > { %1932 = vmatprep.subr.bf16.mxu0 %v5402_v46  ;;  %1973 = vmatprep.subr.bf16.mxu1 %v5406_v47 }
 0x6a3   : > { %1933 = vmatpush1.bf16.msra.mxu0 %v5410_v48  ;;  %1974 = vmatpush1.bf16.msra.mxu1 %v5414_v49 }
 0x759   : > { %v1837_v62 = vpop.f32.mrb[40].mxu0  ;;  %v1878_v13 = vpop.f32.mrb[40].mxu1 }
 0x75a   : > { %v1885_v31 = vadd.f32 %v1837_v62, %v6201_v26  ;;  %v1839_v33 = vpop.f32.mrb[41].mxu0  ;;  %v1880_v19 = vpop.f32.mrb[41].mxu1  ;;  %v1887_v9 = vadd.f32 %v1878_v13, %v6203_v25 }
 0x75b   : > { %v1886_v34 = vadd.f32 %v1839_v33, %v5086_v7  ;;  %v1841_v53 = vpop.f32.mrb[42].mxu0  ;;  %v1882_v21 = vpop.f32.mrb[42].mxu1  ;;  %v1888_v23 = vadd.f32 %v1880_v19, %v6202_v11 }
 0x75c   : > { %v3915_v17 = vmul.f32 -1.442695, %v1885_v31  ;;  %v1842_v24 = vpop.f32.mrb[43].mxu0  ;;  %v1883_v29 = vpop.f32.mrb[43].mxu1 }
 0x75d   : > { %v3916_v35 = vmul.f32 -1.442695, %v1886_v34  ;;  %v3917_v30 = vmul.f32 -1.442695, %v1888_v23 }
 0x75e   : > { %4266 = vpow2.f32 %v3915_v17 }
 0x75f   : > { %4268 = vpow2.f32 %v3916_v35 }
 0x760   : > { %4270 = vpow2.f32 %v3917_v30 }
 0x761   : > { %4272 = vtanh.f32 %v1887_v9 }
 0x768   : > { %v4267_v6 = vpop.eup %4266 }
 0x769   : > { %v4269_v28 = vpop.eup %4268  ;;  %v1892_v0 = vadd.f32 1.0, %v4267_v6 }
 0x76a   : > { %v1898_v36 = vadd.f32 1.0, %v4269_v28  ;;  %v4271_v7 = vpop.eup %4270 }
 0x76b   : > { %4274 = vrcp.f32 %v1892_v0  ;;  %v4273_v32 = vpop.eup %4272  ;;  %v1905_v43 = vadd.f32 1.0, %v4271_v7 }
 0x76c   : > { %4276 = vrcp.f32 %v1898_v36 }
 0x76d   : > { %4278 = vrcp.f32 %v1905_v43 }
 0x775   : > { %v4275_v40 = vpop.eup %4274 }
 0x776   : > { %v4277_v41 = vpop.eup %4276  ;;  %v1909_v42 = vmul.f32 %v4275_v40, %v4273_v32 }
 0x777   : > { %v1908_v45 = vmul.f32 %v4277_v41, %v5424_v56  ;;  %v4279_v47 = vpop.eup %4278 }
 0x779   : > { %v1910_v46 = vadd.f32 %v1909_v42, %v1908_v45 }
 0x77b   : > { %4280 = vtanh.f32 %v1910_v46 }
 0x785   : > { %v4281_v48 = vpop.eup %4280 }
 0x786   : > { %v1912_v49 = vmul.f32 %v4281_v48, %v4279_v47 }
 0x788   : > { %v1917_v60 = vpack.c.bf16 %v1912_v49, %v1912_v49  ;;  %2040 = vst [vmem:[#allocation3 + $0x30] sm:$0xff] (!%p3921_p3), %v1912_v49 }
 0x78a   : > { %1951 = vmatmul.mubr.bf16.vlgmr.msra.gmra.mrb[44].mxu0 %v1917_v60  ;;  %1992 = vmatmul.mubr.bf16.vlgmr.msra.gmra.mrb[44].mxu1 %v1917_v60 }
 0x85d   : > { %v1952_v63 = vpop.f32.mrb[44].mxu0  ;;  %v1993_v1 = vpop.f32.mrb[44].mxu1 }
 0x85e   : > { %v2000_v2 = vadd.f32 %v1952_v63, %v1913_v61  ;;  %v1954_v38 = vpop.f32.mrb[45].mxu0  ;;  %v1995_v4 = vpop.f32.mrb[45].mxu1  ;;  %v2002_v54 = vadd.f32 %v4330_v52, %v1993_v1 }
 0x85f   : > { %v2001_v39 = vadd.f32 %v1954_v38, %v1914_v3  ;;  %v1956_v5 = vpop.f32.mrb[46].mxu0  ;;  %v1997_v20 = vpop.f32.mrb[46].mxu1  ;;  %v2003_v10 = vadd.f32 %v1995_v4, %v1916_v44 }
 0x860   : > { %v3918_v14 = vmul.f32 -1.442695, %v2000_v2  ;;  %v1957_v27 = vpop.f32.mrb[47].mxu0  ;;  %v1998_v22 = vpop.f32.mrb[47].mxu1 }
 0x861   : > { %v3919_v16 = vmul.f32 -1.442695, %v2001_v39  ;;  %v3920_v50 = vmul.f32 -1.442695, %v2003_v10 }
 0x862   : > { %4282 = vpow2.f32 %v3918_v14 }
 0x863   : > { %4284 = vpow2.f32 %v3919_v16 }
 0x864   : > { %4286 = vpow2.f32 %v3920_v50 }
 0x865   : > { %4288 = vtanh.f32 %v2002_v54 }
 0x86c   : > { %v4283_v55 = vpop.eup %4282 }
 0x86d   : > { %v4285_v56 = vpop.eup %4284  ;;  %v2007_v51 = vadd.f32 1.0, %v4283_v55 }
 0x86e   : > { %v2013_v57 = vadd.f32 1.0, %v4285_v56  ;;  %v4287_v59 = vpop.eup %4286 }
 0x86f   : > { %4290 = vrcp.f32 %v2007_v51  ;;  %v4289_v62 = vpop.eup %4288  ;;  %v2020_v33 = vadd.f32 1.0, %v4287_v59 }
 0x870   : > { %4292 = vrcp.f32 %v2013_v57 }
 0x871   : > { %4294 = vrcp.f32 %v2020_v33 }
 0x879   : > { %v4291_v13 = vpop.eup %4290 }
 0x87a   : > { %v4293_v26 = vpop.eup %4292  ;;  %v2024_v31 = vmul.f32 %v4291_v13, %v4289_v62 }
 0x87b   : > { %v2023_v19 = vmul.f32 %v4293_v26, %v1910_v46  ;;  %v4295_v53 = vpop.eup %4294 }
 0x87d   : > { %v2025_v34 = vadd.f32 %v2024_v31, %v2023_v19 }
 0x87f   : > { %4296 = vtanh.f32 %v2025_v34 }
 0x886   : > { %2033 = sbr.rel (%p3921_p3) target bundleno = 2189 (0x88d), region = 60 }
 0x889   : > { %v4297_v21 = vpop.eup %4296 }
 0x88a   : > { %v2027_v17 = vmul.f32 %v4297_v21, %v4295_v53 }
 0x88c   : > { %2028 = vst [vmem:[#allocation4] sm:$0xff] %v2027_v17  ;;  %2041 = vst [vmem:[#allocation3 + $0x38] sm:$0xff] (!%p3921_p3), %v2027_v17 }
 0x88d PF: > { %s2042_s14 = sld [smem:[#allocation6 + %s4707_s26]] }
 0x893   : > { %p3922_p4 = scmp.le.s32.totalorder %s2042_s14, 1 }
 0x895   : > { %2046 = sbr.rel (%p3922_p4) target bundleno = 4349 (0x10fd), region = 64 }
 0x89c   : > { %v4331_v15 = vld [vmem:[%s4751_s0 + $0x4] ss:$16 sps:$4 sm:$0xff]   ;;  %v4333_v12 = vld [vmem:[%s4751_s0 + $0xc] ss:$16 sps:$4 sm:$0xff]   ;;  %v6173_v18 = vmov 0  }
 0x89d   : > { %2305 = vmatprep.mubr.bf16.mxu0 %v6173_v18  ;;  %2378 = vmatprep.mubr.bf16.mxu1 %v6173_v18  ;;  %v4335_v37 = vld [vmem:[%s4751_s0] ss:$16 sps:$4 sm:$0xff]   ;;  %v4336_v8 = vld [vmem:[%s4751_s0 + $0x8] ss:$16 sps:$4 sm:$0xff]   ;;  %v4337_v58 = vld [vmem:[%s4751_s0 + $0x24] ss:$16 sps:$4 sm:$0xff]  }
 0x89e   : > { %2273 = vmatprep.subr.bf16.mxu0 %v4331_v15  ;;  %2346 = vmatprep.subr.bf16.mxu1 %v4333_v12  ;;  %v4339_v24 = vld [vmem:[%s4751_s0 + $0x2c] ss:$16 sps:$4 sm:$0xff]   ;;  %v4341_v29 = vld [vmem:[%s4751_s0 + $0x20] ss:$16 sps:$4 sm:$0xff]   ;;  %v4342_v35 = vld [vmem:[%s4751_s0 + $0x28] ss:$16 sps:$4 sm:$0xff]  }
 0x89f   : > { %2274 = vmatpush1.bf16.msra.mxu0 %v4335_v37  ;;  %2347 = vmatpush1.bf16.msra.mxu1 %v4336_v8  ;;  %v4343_v11 = vld [vmem:[%s4751_s0 + $0x44] ss:$16 sps:$4 sm:$0xff]   ;;  %v4345_v23 = vld [vmem:[%s4751_s0 + $0x4c] ss:$16 sps:$4 sm:$0xff]   ;;  %v4347_v30 = vld [vmem:[%s4751_s0 + $0x40] ss:$16 sps:$4 sm:$0xff]  }
 0x8a0   : > { %2275 = vmatprep.subr.bf16.mxu0 %v4337_v58  ;;  %2348 = vmatprep.subr.bf16.mxu1 %v4339_v24  ;;  %v4348_v25 = vld [vmem:[%s4751_s0 + $0x48] ss:$16 sps:$4 sm:$0xff]   ;;  %v4349_v9 = vld [vmem:[%s4751_s0 + $0x64] ss:$16 sps:$4 sm:$0xff]   ;;  %v4351_v6 = vld [vmem:[%s4751_s0 + $0x6c] ss:$16 sps:$4 sm:$0xff]  }
 0x8a1   : > { %v4353_v28 = vld [vmem:[%s4751_s0 + $0x60] ss:$16 sps:$4 sm:$0xff]   ;;  %v4354_v0 = vld [vmem:[%s4751_s0 + $0x68] ss:$16 sps:$4 sm:$0xff]   ;;  %v4355_v36 = vld [vmem:[%s4751_s0 + $0x84] ss:$16 sps:$4 sm:$0xff]  }
 0x8a2   : > { %v4357_v7 = vld [vmem:[%s4751_s0 + $0x8c] ss:$16 sps:$4 sm:$0xff]   ;;  %v4359_v32 = vld [vmem:[%s4751_s0 + $0x80] ss:$16 sps:$4 sm:$0xff]   ;;  %v4360_v40 = vld [vmem:[%s4751_s0 + $0x88] ss:$16 sps:$4 sm:$0xff]  }
 0x8a3   : > { %2276 = vmatpush1.bf16.msra.mxu0 %v4341_v29  ;;  %2349 = vmatpush1.bf16.msra.mxu1 %v4342_v35  ;;  %v4361_v41 = vld [vmem:[%s4751_s0 + $0xa4] ss:$16 sps:$4 sm:$0xff]   ;;  %v4363_v42 = vld [vmem:[%s4751_s0 + $0xac] ss:$16 sps:$4 sm:$0xff]   ;;  %v4365_v43 = vld [vmem:[%s4751_s0 + $0xa0] ss:$16 sps:$4 sm:$0xff]  }
 0x8a4   : > { %2277 = vmatprep.subr.bf16.mxu0 %v4343_v11  ;;  %2350 = vmatprep.subr.bf16.mxu1 %v4345_v23  ;;  %v4366_v45 = vld [vmem:[%s4751_s0 + $0xa8] ss:$16 sps:$4 sm:$0xff]   ;;  %v4367_v46 = vld [vmem:[%s4751_s0 + $0xc4] ss:$16 sps:$4 sm:$0xff]   ;;  %v4369_v47 = vld [vmem:[%s4751_s0 + $0xcc] ss:$16 sps:$4 sm:$0xff]  }
 0x8a5   : > { %v4371_v48 = vld [vmem:[%s4751_s0 + $0xc0] ss:$16 sps:$4 sm:$0xff]   ;;  %v4372_v49 = vld [vmem:[%s4751_s0 + $0xc8] ss:$16 sps:$4 sm:$0xff]   ;;  %v4373_v60 = vld [vmem:[%s4751_s0 + $0xe4] ss:$16 sps:$4 sm:$0xff]  }
 0x8a6   : > { %v4375_v61 = vld [vmem:[%s4751_s0 + $0xec] ss:$16 sps:$4 sm:$0xff]   ;;  %v4377_v63 = vld [vmem:[%s4751_s0 + $0xe0] ss:$16 sps:$4 sm:$0xff]   ;;  %v4378_v1 = vld [vmem:[%s4751_s0 + $0xe8] ss:$16 sps:$4 sm:$0xff]  }
 0x8a7   : > { %2278 = vmatpush1.bf16.msra.mxu0 %v4347_v30  ;;  %2351 = vmatpush1.bf16.msra.mxu1 %v4348_v25  ;;  %v2047_v2 = vld [vmem:[#allocation3] sm:$0xff]  ;;  %v2048_v3 = vld [vmem:[#allocation3 + $0x8] sm:$0xff]  ;;  %v2049_v44 = vld [vmem:[#allocation3 + $0x10] sm:$0xff] }
 0x8a8   : > { %2279 = vmatprep.subr.bf16.mxu0 %v4349_v9  ;;  %2352 = vmatprep.subr.bf16.mxu1 %v4351_v6  ;;  %v5514_v38 = vld [vmem:[%s4757_s15 + $0x4] ss:$16 sps:$4 sm:$0xff]   ;;  %v5517_v4 = vld [vmem:[%s4757_s15 + $0xc] ss:$16 sps:$4 sm:$0xff]   ;;  %v2055_v39 = vpack.c.bf16 %v2048_v3, %v2047_v2  ;;  %v5520_v5 = vld [vmem:[%s4757_s15] ss:$16 sps:$4 sm:$0xff]  }
 0x8a9   : > { %v5523_v20 = vld [vmem:[%s4757_s15 + $0x8] ss:$16 sps:$4 sm:$0xff]   ;;  %v5528_v14 = vld [vmem:[%s4757_s15 + $0x24] ss:$16 sps:$4 sm:$0xff]   ;;  %v5531_v27 = vld [vmem:[%s4757_s15 + $0x2c] ss:$16 sps:$4 sm:$0xff]  }
 0x8aa   : > { %v5534_v22 = vld [vmem:[%s4757_s15 + $0x20] ss:$16 sps:$4 sm:$0xff]   ;;  %v5537_v16 = vld [vmem:[%s4757_s15 + $0x28] ss:$16 sps:$4 sm:$0xff]   ;;  %v5542_v50 = vld [vmem:[%s4757_s15 + $0x44] ss:$16 sps:$4 sm:$0xff]  }
 0x8ab   : > { %2280 = vmatpush1.bf16.msra.mxu0 %v4353_v28  ;;  %2353 = vmatpush1.bf16.msra.mxu1 %v4354_v0  ;;  %v2050_v10 = vld [vmem:[#allocation3 + $0x18] sm:$0xff]  ;;  %v5552_v55 = vld [vmem:[%s4757_s15 + $0x40] ss:$16 sps:$4 sm:$0xff]   ;;  %v5560_v51 = vld [vmem:[%s4757_s15 + $0x64] ss:$16 sps:$4 sm:$0xff]  }
 0x8ac   : > { %2281 = vmatprep.subr.bf16.mxu0 %v4355_v36  ;;  %2354 = vmatprep.subr.bf16.mxu1 %v4357_v7  ;;  %v5547_v52 = vld [vmem:[%s4757_s15 + $0x4c] ss:$16 sps:$4 sm:$0xff]   ;;  %v2056_v54 = vpack.c.bf16 %v2050_v10, %v2049_v44  ;;  %v5555_v56 = vld [vmem:[%s4757_s15 + $0x48] ss:$16 sps:$4 sm:$0xff]   ;;  %v5568_v59 = vld [vmem:[%s4757_s15 + $0x60] ss:$16 sps:$4 sm:$0xff]  }
 0x8ad   : > { %v5565_v57 = vld [vmem:[%s4757_s15 + $0x6c] ss:$16 sps:$4 sm:$0xff]   ;;  %v5571_v62 = vld [vmem:[%s4757_s15 + $0x68] ss:$16 sps:$4 sm:$0xff]   ;;  %v2051_v13 = vld [vmem:[#allocation3 + $0x20] sm:$0xff] }
 0x8ae   : > { %v2052_v26 = vld [vmem:[#allocation3 + $0x28] sm:$0xff]  ;;  %v5578_v31 = vld [vmem:[%s4757_s15 + $0x84] ss:$16 sps:$4 sm:$0xff]   ;;  %v5588_v34 = vld [vmem:[%s4757_s15 + $0x80] ss:$16 sps:$4 sm:$0xff]  }
 0x8af   : > { %2282 = vmatpush1.bf16.msra.mxu0 %v4359_v32  ;;  %2355 = vmatpush1.bf16.msra.mxu1 %v4360_v40  ;;  %v5581_v33 = vld [vmem:[%s4757_s15 + $0x8c] ss:$16 sps:$4 sm:$0xff]   ;;  %v2057_v19 = vpack.c.bf16 %v2052_v26, %v2051_v13  ;;  %v5591_v53 = vld [vmem:[%s4757_s15 + $0x88] ss:$16 sps:$4 sm:$0xff]   ;;  %v5596_v21 = vld [vmem:[%s4757_s15 + $0xa4] ss:$16 sps:$4 sm:$0xff]  }
 0x8b0   : > { %2283 = vmatprep.subr.bf16.mxu0 %v4361_v41  ;;  %2356 = vmatprep.subr.bf16.mxu1 %v4363_v42  ;;  %v5599_v17 = vld [vmem:[%s4757_s15 + $0xac] ss:$16 sps:$4 sm:$0xff]   ;;  %v5602_v15 = vld [vmem:[%s4757_s15 + $0xa0] ss:$16 sps:$4 sm:$0xff]   ;;  %v5607_v12 = vld [vmem:[%s4757_s15 + $0xa8] ss:$16 sps:$4 sm:$0xff]  }
 0x8b1   : > { %v2053_v37 = vld [vmem:[#allocation3 + $0x30] sm:$0xff]  ;;  %v2054_v8 = vld [vmem:[#allocation3 + $0x38] sm:$0xff]  ;;  %v2091_v6 = vld [vmem:[%s4777_s25] sm:$0xf] }
 0x8b2   : > { %v5612_v58 = vld [vmem:[%s4757_s15 + $0xc4] ss:$16 sps:$4 sm:$0xff]   ;;  %v5615_v24 = vld [vmem:[%s4757_s15 + $0xcc] ss:$16 sps:$4 sm:$0xff]   ;;  %v2058_v29 = vpack.c.bf16 %v2054_v8, %v2053_v37  ;;  %v5622_v35 = vld [vmem:[%s4757_s15 + $0xc0] ss:$16 sps:$4 sm:$0xff]  }
 0x8b3   : > { %2284 = vmatpush1.bf16.msra.mxu0 %v4365_v43  ;;  %2357 = vmatpush1.bf16.msra.mxu1 %v4366_v45  ;;  %v5625_v11 = vld [vmem:[%s4757_s15 + $0xc8] ss:$16 sps:$4 sm:$0xff]   ;;  %v5630_v23 = vld [vmem:[%s4757_s15 + $0xe4] ss:$16 sps:$4 sm:$0xff]   ;;  %v5633_v30 = vld [vmem:[%s4757_s15 + $0xec] ss:$16 sps:$4 sm:$0xff]  }
 0x8b4   : > { %2285 = vmatprep.subr.bf16.mxu0 %v4367_v46  ;;  %2358 = vmatprep.subr.bf16.mxu1 %v4369_v47  ;;  %v5638_v25 = vld [vmem:[%s4757_s15 + $0xe0] ss:$16 sps:$4 sm:$0xff]   ;;  %v5641_v9 = vld [vmem:[%s4757_s15 + $0xe8] ss:$16 sps:$4 sm:$0xff]  }
 0x8b5   : > { %v6204_v28 = vld [vmem:[#allocation9_spill] sm:$0xff] }
 0x8b6   : > { %v6205_v0 = vsub.s32 0, %v6204_v28  ;;  %v6206_v7 = vsub.s32 2, %v6204_v28  ;;  %v6207_v40 = vsub.s32 1, %v6204_v28  ;;  %v6208_v42 = vsub.s32 3, %v6204_v28 }
 0x8b7   : > { %2286 = vmatpush1.bf16.msra.mxu0 %v4371_v48  ;;  %2359 = vmatpush1.bf16.msra.mxu1 %v4372_v49 }
 0x8b8   : > { %2287 = vmatprep.subr.bf16.mxu0 %v4373_v60  ;;  %2360 = vmatprep.subr.bf16.mxu1 %v4375_v61  ;;  %v2096_v36 = vrot.slane %v2091_v6, %v6205_v0  ;;  %v5692_v32 = vrot.slane %v2091_v6, %v6206_v7  ;;  %v5696_v41 = vrot.slane %v2091_v6, %v6207_v40 }
 0x8b9   : > { %v5700_v43 = vrot.slane %v2091_v6, %v6208_v42 }
 0x8bb   : > { %2288 = vmatpush1.bf16.msra.mxu0 %v4377_v63  ;;  %2361 = vmatpush1.bf16.msra.mxu1 %v4378_v1 }
 0x8bc   : > { %2647 = vmatprep.subr.bf16.mxu0 %v5514_v38  ;;  %2688 = vmatprep.subr.bf16.mxu1 %v5517_v4 }
 0x8be   : > { %2306 = vmatmul.mubr.bf16.vlgmr.msra.gmra.mrb[0].mxu0 %v2055_v39  ;;  %2379 = vmatmul.mubr.bf16.vlgmr.msra.gmra.mrb[0].mxu1 %v2055_v39 }
 0x8bf   : > { %2648 = vmatpush1.bf16.msra.mxu0 %v5520_v5  ;;  %2689 = vmatpush1.bf16.msra.mxu1 %v5523_v20 }
 0x8c0   : > { %2649 = vmatprep.subr.bf16.mxu0 %v5528_v14  ;;  %2690 = vmatprep.subr.bf16.mxu1 %v5531_v27 }
 0x8c1   : > { %2315 = vmatprep.mubr.bf16.mxu0 %v6173_v18  ;;  %2388 = vmatprep.mubr.bf16.mxu1 %v6173_v18 }
 0x8c3   : > { %2650 = vmatpush1.bf16.msra.mxu0 %v5534_v22  ;;  %2691 = vmatpush1.bf16.msra.mxu1 %v5537_v16 }
 0x8c4   : > { %2651 = vmatprep.subr.bf16.mxu0 %v5542_v50  ;;  %2692 = vmatprep.subr.bf16.mxu1 %v5547_v52 }
 0x8c6   : > { %2316 = vmatmul.mubr.bf16.gmra.mrb[4].mxu0 %v2056_v54  ;;  %2389 = vmatmul.mubr.bf16.gmra.mrb[4].mxu1 %v2056_v54 }
 0x8c7   : > { %2652 = vmatpush1.bf16.msra.mxu0 %v5552_v55  ;;  %2693 = vmatpush1.bf16.msra.mxu1 %v5555_v56 }
 0x8c8   : > { %2653 = vmatprep.subr.bf16.mxu0 %v5560_v51  ;;  %2694 = vmatprep.subr.bf16.mxu1 %v5565_v57 }
 0x8c9   : > { %2325 = vmatprep.mubr.bf16.mxu0 %v6173_v18  ;;  %2398 = vmatprep.mubr.bf16.mxu1 %v6173_v18 }
 0x8cb   : > { %2654 = vmatpush1.bf16.msra.mxu0 %v5568_v59  ;;  %2695 = vmatpush1.bf16.msra.mxu1 %v5571_v62 }
 0x8cc   : > { %2655 = vmatprep.subr.bf16.mxu0 %v5578_v31  ;;  %2696 = vmatprep.subr.bf16.mxu1 %v5581_v33 }
 0x8ce   : > { %2326 = vmatmul.mubr.bf16.gmra.mrb[8].mxu0 %v2057_v19  ;;  %2399 = vmatmul.mubr.bf16.gmra.mrb[8].mxu1 %v2057_v19 }
 0x8cf   : > { %2656 = vmatpush1.bf16.msra.mxu0 %v5588_v34  ;;  %2697 = vmatpush1.bf16.msra.mxu1 %v5591_v53 }
 0x8d0   : > { %2657 = vmatprep.subr.bf16.mxu0 %v5596_v21  ;;  %2698 = vmatprep.subr.bf16.mxu1 %v5599_v17 }
 0x8d1   : > { %2335 = vmatprep.mubr.bf16.mxu0 %v6173_v18  ;;  %2408 = vmatprep.mubr.bf16.mxu1 %v6173_v18 }
 0x8d3   : > { %2658 = vmatpush1.bf16.msra.mxu0 %v5602_v15  ;;  %2699 = vmatpush1.bf16.msra.mxu1 %v5607_v12 }
 0x8d4   : > { %2659 = vmatprep.subr.bf16.mxu0 %v5612_v58  ;;  %2700 = vmatprep.subr.bf16.mxu1 %v5615_v24 }
 0x8d6   : > { %2336 = vmatmul.mubr.bf16.gmra.mrb[12].mxu0 %v2058_v29  ;;  %2409 = vmatmul.mubr.bf16.gmra.mrb[12].mxu1 %v2058_v29 }
 0x8d7   : > { %2660 = vmatpush1.bf16.msra.mxu0 %v5622_v35  ;;  %2701 = vmatpush1.bf16.msra.mxu1 %v5625_v11 }
 0x8d8   : > { %2661 = vmatprep.subr.bf16.mxu0 %v5630_v23  ;;  %2702 = vmatprep.subr.bf16.mxu1 %v5633_v30 }
 0x8d9   : > { %2679 = vmatprep.mubr.bf16.mxu0 %v6173_v18  ;;  %2720 = vmatprep.mubr.bf16.mxu1 %v6173_v18 }
 0x8db   : > { %2662 = vmatpush1.bf16.msra.mxu0 %v5638_v25  ;;  %2703 = vmatpush1.bf16.msra.mxu1 %v5641_v9 }
 0x8dc   : > { %2762 = vmatprep.subr.bf16.mxu0 %v5514_v38  ;;  %2803 = vmatprep.subr.bf16.mxu1 %v5517_v4 }
 0x8de   : > { %2680 = vmatmul.mubr.bf16.vlgmr.msra.gmra.mrb[16].mxu0 %v6173_v18  ;;  %2721 = vmatmul.mubr.bf16.vlgmr.msra.gmra.mrb[16].mxu1 %v6173_v18 }
 0x8df   : > { %2763 = vmatpush1.bf16.msra.mxu0 %v5520_v5  ;;  %2804 = vmatpush1.bf16.msra.mxu1 %v5523_v20 }
 0x8e0   : > { %2764 = vmatprep.subr.bf16.mxu0 %v5528_v14  ;;  %2805 = vmatprep.subr.bf16.mxu1 %v5531_v27 }
 0x8e1   : > { %2794 = vmatprep.mubr.bf16.mxu0 %v6173_v18  ;;  %2835 = vmatprep.mubr.bf16.mxu1 %v6173_v18 }
 0x8e3   : > { %2765 = vmatpush1.bf16.msra.mxu0 %v5534_v22  ;;  %2806 = vmatpush1.bf16.msra.mxu1 %v5537_v16 }
 0x8e4   : > { %2766 = vmatprep.subr.bf16.mxu0 %v5542_v50  ;;  %2807 = vmatprep.subr.bf16.mxu1 %v5547_v52 }
 0x8e7   : > { %2767 = vmatpush1.bf16.msra.mxu0 %v5552_v55  ;;  %2808 = vmatpush1.bf16.msra.mxu1 %v5555_v56 }
 0x8e8   : > { %2768 = vmatprep.subr.bf16.mxu0 %v5560_v51  ;;  %2809 = vmatprep.subr.bf16.mxu1 %v5565_v57 }
 0x8eb   : > { %2769 = vmatpush1.bf16.msra.mxu0 %v5568_v59  ;;  %2810 = vmatpush1.bf16.msra.mxu1 %v5571_v62 }
 0x8ec   : > { %2770 = vmatprep.subr.bf16.mxu0 %v5578_v31  ;;  %2811 = vmatprep.subr.bf16.mxu1 %v5581_v33 }
 0x8ef   : > { %2771 = vmatpush1.bf16.msra.mxu0 %v5588_v34  ;;  %2812 = vmatpush1.bf16.msra.mxu1 %v5591_v53 }
 0x8f0   : > { %2772 = vmatprep.subr.bf16.mxu0 %v5596_v21  ;;  %2813 = vmatprep.subr.bf16.mxu1 %v5599_v17 }
 0x8f3   : > { %2773 = vmatpush1.bf16.msra.mxu0 %v5602_v15  ;;  %2814 = vmatpush1.bf16.msra.mxu1 %v5607_v12 }
 0x8f4   : > { %2774 = vmatprep.subr.bf16.mxu0 %v5612_v58  ;;  %2815 = vmatprep.subr.bf16.mxu1 %v5615_v24 }
 0x8f7   : > { %2775 = vmatpush1.bf16.msra.mxu0 %v5622_v35  ;;  %2816 = vmatpush1.bf16.msra.mxu1 %v5625_v11 }
 0x8f8   : > { %2776 = vmatprep.subr.bf16.mxu0 %v5630_v23  ;;  %2817 = vmatprep.subr.bf16.mxu1 %v5633_v30 }
 0x8fb   : > { %2777 = vmatpush1.bf16.msra.mxu0 %v5638_v25  ;;  %2818 = vmatpush1.bf16.msra.mxu1 %v5641_v9 }
 0x8fc   : > { %2877 = vmatprep.subr.bf16.mxu0 %v5514_v38  ;;  %2918 = vmatprep.subr.bf16.mxu1 %v5517_v4 }
 0x991   : > { %v2307_v45 = vpop.f32.mrb[0].mxu0  ;;  %v2380_v46 = vpop.f32.mrb[0].mxu1 }
 0x992   : > { %v5702_v47 = vadd.f32 %v2307_v45, %v2096_v36  ;;  %v2309_v48 = vpop.f32.mrb[1].mxu0  ;;  %v5705_v49 = vadd.f32 %v2380_v46, %v5692_v32  ;;  %v2382_v60 = vpop.f32.mrb[1].mxu1 }
 0x993   : > { %v5708_v61 = vadd.f32 %v2309_v48, %v5696_v41  ;;  %v2311_v63 = vpop.f32.mrb[2].mxu0  ;;  %v5711_v1 = vadd.f32 %v2382_v60, %v5700_v43  ;;  %v2384_v2 = vpop.f32.mrb[2].mxu1 }
 0x994   : > { %v5713_v3 = vadd.f32 %v2311_v63, %v2096_v36  ;;  %v2313_v39 = vpop.f32.mrb[3].mxu0  ;;  %v5716_v44 = vadd.f32 %v2384_v2, %v5692_v32  ;;  %v2386_v10 = vpop.f32.mrb[3].mxu1 }
 0x995   : > { %v5719_v54 = vadd.f32 %v2313_v39, %v5696_v41  ;;  %v5722_v13 = vadd.f32 %v2386_v10, %v5700_v43 }
 0x999   : > { %v2317_v26 = vpop.f32.mrb[4].mxu0  ;;  %v2390_v19 = vpop.f32.mrb[4].mxu1 }
 0x99a   : > { %v5724_v37 = vadd.f32 %v2317_v26, %v2096_v36  ;;  %v2319_v8 = vpop.f32.mrb[5].mxu0  ;;  %v5727_v29 = vadd.f32 %v2390_v19, %v5692_v32  ;;  %v2392_v6 = vpop.f32.mrb[5].mxu1 }
 0x99b   : > { %v5730_v28 = vadd.f32 %v2319_v8, %v5696_v41  ;;  %v2321_v0 = vpop.f32.mrb[6].mxu0  ;;  %v5733_v7 = vadd.f32 %v2392_v6, %v5700_v43  ;;  %v2394_v40 = vpop.f32.mrb[6].mxu1 }
 0x99c   : > { %v5735_v42 = vadd.f32 %v2321_v0, %v2096_v36  ;;  %v2323_v45 = vpop.f32.mrb[7].mxu0  ;;  %v5738_v46 = vadd.f32 %v2394_v40, %v5692_v32  ;;  %v2396_v48 = vpop.f32.mrb[7].mxu1 }
 0x99d   : > { %v5741_v60 = vadd.f32 %v2323_v45, %v5696_v41  ;;  %v5744_v63 = vadd.f32 %v2396_v48, %v5700_v43 }
 0x99e   : > { %6209 = vst [vmem:[#allocation23_spill] sm:$0xff] %v5738_v46 }
 0x9a1   : > { %v2327_v2 = vpop.f32.mrb[8].mxu0  ;;  %v2400_v39 = vpop.f32.mrb[8].mxu1 }
 0x9a2   : > { %v5746_v10 = vadd.f32 %v2327_v2, %v2096_v36  ;;  %v2329_v26 = vpop.f32.mrb[9].mxu0  ;;  %v5749_v19 = vadd.f32 %v2400_v39, %v5692_v32  ;;  %v2402_v8 = vpop.f32.mrb[9].mxu1 }
 0x9a3   : > { %v5752_v6 = vadd.f32 %v2329_v26, %v5696_v41  ;;  %v2331_v0 = vpop.f32.mrb[10].mxu0  ;;  %v5755_v40 = vadd.f32 %v2402_v8, %v5700_v43  ;;  %v2404_v45 = vpop.f32.mrb[10].mxu1 }
 0x9a4   : > { %6210 = vst [vmem:[#allocation24_spill] sm:$0xff] %v5746_v10  ;;  %6211 = vst [vmem:[#allocation25_spill] sm:$0xff] %v5749_v19  ;;  %v5757_v18 = vadd.f32 %v2331_v0, %v2096_v36  ;;  %v2333_v48 = vpop.f32.mrb[11].mxu0  ;;  %v5760_v46 = vadd.f32 %v2404_v45, %v5692_v32  ;;  %v2406_v2 = vpop.f32.mrb[11].mxu1 }
 0x9a5   : > { %6212 = vst [vmem:[#allocation26_spill] sm:$0xff] %v5752_v6  ;;  %6213 = vst [vmem:[#allocation27_spill] sm:$0xff] %v5755_v40  ;;  %v5763_v10 = vadd.f32 %v2333_v48, %v5696_v41  ;;  %v5766_v39 = vadd.f32 %v2406_v2, %v5700_v43 }
 0x9a6   : > { %6214 = vst [vmem:[#allocation28_spill] sm:$0xff] %v5757_v18  ;;  %6215 = vst [vmem:[#allocation29_spill] sm:$0xff] %v5760_v46 }
 0x9a7   : > { %6216 = vst [vmem:[#allocation30_spill] sm:$0xff] %v5763_v10  ;;  %6217 = vst [vmem:[#allocation31_spill] sm:$0xff] %v5766_v39 }
 0x9a9   : > { %v2337_v26 = vpop.f32.mrb[12].mxu0  ;;  %v2410_v19 = vpop.f32.mrb[12].mxu1 }
 0x9aa   : > { %v5768_v6 = vadd.f32 %v2337_v26, %v2096_v36  ;;  %v2339_v8 = vpop.f32.mrb[13].mxu0  ;;  %v5771_v40 = vadd.f32 %v2410_v19, %v5692_v32  ;;  %v2412_v0 = vpop.f32.mrb[13].mxu1 }
 0x9ab   : > { %v5774_v18 = vadd.f32 %v2339_v8, %v5696_v41  ;;  %v2341_v45 = vpop.f32.mrb[14].mxu0  ;;  %v5777_v46 = vadd.f32 %v2412_v0, %v5700_v43  ;;  %v2414_v48 = vpop.f32.mrb[14].mxu1 }
 0x9ac   : > { %6218 = vst [vmem:[#allocation32_spill] sm:$0xff] %v5768_v6  ;;  %6219 = vst [vmem:[#allocation33_spill] sm:$0xff] %v5771_v40  ;;  %v2342_v10 = vadd.f32 %v2341_v45, %v2096_v36  ;;  %v2343_v2 = vpop.f32.mrb[15].mxu0  ;;  %v5780_v39 = vadd.f32 %v2414_v48, %v5692_v32  ;;  %v2416_v26 = vpop.f32.mrb[15].mxu1 }
 0x9ad   : > { %6220 = vst [vmem:[#allocation34_spill] sm:$0xff] %v5774_v18  ;;  %6221 = vst [vmem:[#allocation35_spill] sm:$0xff] %v5777_v46  ;;  %v2344_v6 = vadd.f32 %v2343_v2, %v5696_v41  ;;  %v2417_v19 = vadd.f32 %v2416_v26, %v5700_v43 }
 0x9ae   : > { %6222 = vst [vmem:[#allocation36_spill] sm:$0xff] %v5780_v39  ;;  %2447 = vst [vmem:[#allocation2 + $0xe0] sm:$0xff] %v2342_v10 }
 0x9af   : > { %2449 = vst [vmem:[#allocation2 + $0xf0] sm:$0xff] %v5780_v39  ;;  %2448 = vst [vmem:[#allocation2 + $0xe8] sm:$0xff] %v2344_v6 }
 0x9b0   : > { %2450 = vst [vmem:[#allocation2 + $0xf8] sm:$0xff] %v2417_v19 }
 0x9b1   : > { %v2681_v8 = vpop.f32.mrb[16].mxu0  ;;  %v2722_v40 = vpop.f32.mrb[16].mxu1 }
 0x9b2   : > { %v2729_v0 = vadd.f32 %v2681_v8, %v5702_v47  ;;  %v2731_v36 = vadd.f32 %v2722_v40, %v5705_v49  ;;  %v2683_v45 = vpop.f32.mrb[17].mxu0  ;;  %v2724_v46 = vpop.f32.mrb[17].mxu1 }
 0x9b3   : > { %v2730_v32 = vadd.f32 %v2683_v45, %v5708_v61  ;;  %v2732_v48 = vadd.f32 %v2724_v46, %v5711_v1  ;;  %v2685_v41 = vpop.f32.mrb[18].mxu0  ;;  %v2726_v2 = vpop.f32.mrb[18].mxu1 }
 0x9b4   : > { %v3987_v43 = vmul.f32 -1.442695, %v2729_v0  ;;  %v2686_v10 = vpop.f32.mrb[19].mxu0  ;;  %v2727_v26 = vpop.f32.mrb[19].mxu1 }
 0x9b5   : > { %v3988_v39 = vmul.f32 -1.442695, %v2730_v32  ;;  %v3989_v6 = vmul.f32 -1.442695, %v2732_v48 }
 0x9b6   : > { %4427 = vpow2.f32 %v3987_v43 }
 0x9b7   : > { %4429 = vpow2.f32 %v3988_v39 }
 0x9b8   : > { %4431 = vpow2.f32 %v3989_v6 }
 0x9b9   : > { %4433 = vtanh.f32 %v2731_v36 }
 0x9c0   : > { %v4428_v19 = vpop.eup %4427 }
 0x9c1   : > { %v4430_v18 = vpop.eup %4429  ;;  %v2736_v47 = vadd.f32 1.0, %v4428_v19 }
 0x9c2   : > { %v2742_v49 = vadd.f32 1.0, %v4430_v18  ;;  %v4432_v61 = vpop.eup %4431  ;;  %v6223_v18 = vmov 0  }
 0x9c3   : > { %4435 = vrcp.f32 %v2736_v47  ;;  %v4434_v40 = vpop.eup %4433  ;;  %v2749_v0 = vadd.f32 1.0, %v4432_v61 }
 0x9c4   : > { %4437 = vrcp.f32 %v2742_v49 }
 0x9c5   : > { %4439 = vrcp.f32 %v2749_v0 }
 0x9cd   : > { %v4436_v1 = vpop.eup %4435 }
 0x9ce   : > { %v4438_v46 = vpop.eup %4437  ;;  %v2753_v8 = vmul.f32 %v4436_v1, %v4434_v40 }
 0x9cf   : > { %v2752_v45 = vmul.f32 0.0, %v4438_v46  ;;  %v4440_v39 = vpop.eup %4439 }
 0x9d1   : > { %v5789_v41 = vadd.f32 %v2753_v8, %v2752_v45 }
 0x9d3   : > { %4441 = vtanh.f32 %v5789_v41 }
 0x9dd   : > { %v4442_v32 = vpop.eup %4441 }
 0x9de   : > { %v2756_v48 = vmul.f32 %v4442_v32, %v4440_v39 }
 0x9e0   : > { %v2761_v2 = vpack.c.bf16 %v2756_v48, %v2756_v48 }
 0x9e2   : > { %2795 = vmatmul.mubr.bf16.vlgmr.msra.gmra.mrb[20].mxu0 %v2761_v2  ;;  %2836 = vmatmul.mubr.bf16.vlgmr.msra.gmra.mrb[20].mxu1 %v2761_v2 }
 0x9e3   : > { %2878 = vmatpush1.bf16.msra.mxu0 %v5520_v5  ;;  %2919 = vmatpush1.bf16.msra.mxu1 %v5523_v20 }
 0x9e4   : > { %2879 = vmatprep.subr.bf16.mxu0 %v5528_v14  ;;  %2920 = vmatprep.subr.bf16.mxu1 %v5531_v27 }
 0x9e5   : > { %2909 = vmatprep.mubr.bf16.mxu0 %v6223_v18  ;;  %2950 = vmatprep.mubr.bf16.mxu1 %v6223_v18 }
 0x9e7   : > { %2880 = vmatpush1.bf16.msra.mxu0 %v5534_v22  ;;  %2921 = vmatpush1.bf16.msra.mxu1 %v5537_v16 }
 0x9e8   : > { %2881 = vmatprep.subr.bf16.mxu0 %v5542_v50  ;;  %2922 = vmatprep.subr.bf16.mxu1 %v5547_v52 }
 0x9eb   : > { %2882 = vmatpush1.bf16.msra.mxu0 %v5552_v55  ;;  %2923 = vmatpush1.bf16.msra.mxu1 %v5555_v56 }
 0x9ec   : > { %2883 = vmatprep.subr.bf16.mxu0 %v5560_v51  ;;  %2924 = vmatprep.subr.bf16.mxu1 %v5565_v57 }
 0x9ef   : > { %2884 = vmatpush1.bf16.msra.mxu0 %v5568_v59  ;;  %2925 = vmatpush1.bf16.msra.mxu1 %v5571_v62 }
 0x9f0   : > { %2885 = vmatprep.subr.bf16.mxu0 %v5578_v31  ;;  %2926 = vmatprep.subr.bf16.mxu1 %v5581_v33 }
 0x9f3   : > { %2886 = vmatpush1.bf16.msra.mxu0 %v5588_v34  ;;  %2927 = vmatpush1.bf16.msra.mxu1 %v5591_v53 }
 0x9f4   : > { %2887 = vmatprep.subr.bf16.mxu0 %v5596_v21  ;;  %2928 = vmatprep.subr.bf16.mxu1 %v5599_v17 }
 0x9f7   : > { %2888 = vmatpush1.bf16.msra.mxu0 %v5602_v15  ;;  %2929 = vmatpush1.bf16.msra.mxu1 %v5607_v12 }
 0x9f8   : > { %2889 = vmatprep.subr.bf16.mxu0 %v5612_v58  ;;  %2930 = vmatprep.subr.bf16.mxu1 %v5615_v24 }
 0x9fb   : > { %2890 = vmatpush1.bf16.msra.mxu0 %v5622_v35  ;;  %2931 = vmatpush1.bf16.msra.mxu1 %v5625_v11 }
 0x9fc   : > { %2891 = vmatprep.subr.bf16.mxu0 %v5630_v23  ;;  %2932 = vmatprep.subr.bf16.mxu1 %v5633_v30 }
 0x9ff   : > { %2892 = vmatpush1.bf16.msra.mxu0 %v5638_v25  ;;  %2933 = vmatpush1.bf16.msra.mxu1 %v5641_v9 }
 0xa00   : > { %2992 = vmatprep.subr.bf16.mxu0 %v5514_v38  ;;  %3033 = vmatprep.subr.bf16.mxu1 %v5517_v4 }
 0xab5   : > { %v2796_v36 = vpop.f32.mrb[20].mxu0  ;;  %v2837_v43 = vpop.f32.mrb[20].mxu1 }
 0xab6   : > { %v2844_v10 = vadd.f32 %v2796_v36, %v5713_v3  ;;  %v2798_v26 = vpop.f32.mrb[21].mxu0  ;;  %v2839_v6 = vpop.f32.mrb[21].mxu1  ;;  %v2846_v45 = vadd.f32 %v2837_v43, %v5716_v44 }
 0xab7   : > { %v2845_v19 = vadd.f32 %v2798_v26, %v5719_v54  ;;  %v2800_v47 = vpop.f32.mrb[22].mxu0  ;;  %v2841_v49 = vpop.f32.mrb[22].mxu1  ;;  %v2847_v8 = vadd.f32 %v2839_v6, %v5722_v13 }
 0xab8   : > { %v3990_v61 = vmul.f32 -1.442695, %v2844_v10  ;;  %v2801_v40 = vpop.f32.mrb[23].mxu0  ;;  %v2842_v1 = vpop.f32.mrb[23].mxu1 }
 0xab9   : > { %v3991_v46 = vmul.f32 -1.442695, %v2845_v19  ;;  %v3992_v0 = vmul.f32 -1.442695, %v2847_v8 }
 0xaba   : > { %4443 = vpow2.f32 %v3990_v61 }
 0xabb   : > { %4445 = vpow2.f32 %v3991_v46 }
 0xabc   : > { %4447 = vpow2.f32 %v3992_v0 }
 0xabd   : > { %4449 = vtanh.f32 %v2846_v45 }
 0xac4   : > { %v4444_v39 = vpop.eup %4443 }
 0xac5   : > { %v4446_v32 = vpop.eup %4445  ;;  %v2851_v3 = vadd.f32 1.0, %v4444_v39 }
 0xac6   : > { %v2857_v48 = vadd.f32 1.0, %v4446_v32  ;;  %v4448_v54 = vpop.eup %4447 }
 0xac7   : > { %4451 = vrcp.f32 %v2851_v3  ;;  %v4450_v2 = vpop.eup %4449  ;;  %v2864_v19 = vadd.f32 1.0, %v4448_v54 }
 0xac8   : > { %4453 = vrcp.f32 %v2857_v48 }
 0xac9   : > { %4455 = vrcp.f32 %v2864_v19 }
 0xad1   : > { %v4452_v36 = vpop.eup %4451 }
 0xad2   : > { %v4454_v10 = vpop.eup %4453  ;;  %v2868_v26 = vmul.f32 %v4452_v36, %v4450_v2 }
 0xad3   : > { %v2867_v47 = vmul.f32 %v4454_v10, %v5789_v41  ;;  %v4456_v44 = vpop.eup %4455 }
 0xad5   : > { %v5831_v13 = vadd.f32 %v2868_v26, %v2867_v47 }
 0xad7   : > { %4457 = vtanh.f32 %v5831_v13 }
 0xae1   : > { %v4458_v43 = vpop.eup %4457 }
 0xae2   : > { %v2871_v6 = vmul.f32 %v4458_v43, %v4456_v44 }
 0xae4   : > { %v2876_v49 = vpack.c.bf16 %v2871_v6, %v2871_v6 }
 0xae6   : > { %2910 = vmatmul.mubr.bf16.vlgmr.msra.gmra.mrb[24].mxu0 %v2876_v49  ;;  %2951 = vmatmul.mubr.bf16.vlgmr.msra.gmra.mrb[24].mxu1 %v2876_v49 }
 0xae7   : > { %2993 = vmatpush1.bf16.msra.mxu0 %v5520_v5  ;;  %3034 = vmatpush1.bf16.msra.mxu1 %v5523_v20 }
 0xae8   : > { %2994 = vmatprep.subr.bf16.mxu0 %v5528_v14  ;;  %3035 = vmatprep.subr.bf16.mxu1 %v5531_v27 }
 0xae9   : > { %3024 = vmatprep.mubr.bf16.mxu0 %v6223_v18  ;;  %3065 = vmatprep.mubr.bf16.mxu1 %v6223_v18 }
 0xaeb   : > { %2995 = vmatpush1.bf16.msra.mxu0 %v5534_v22  ;;  %3036 = vmatpush1.bf16.msra.mxu1 %v5537_v16 }
 0xaec   : > { %2996 = vmatprep.subr.bf16.mxu0 %v5542_v50  ;;  %3037 = vmatprep.subr.bf16.mxu1 %v5547_v52 }
 0xaef   : > { %2997 = vmatpush1.bf16.msra.mxu0 %v5552_v55  ;;  %3038 = vmatpush1.bf16.msra.mxu1 %v5555_v56 }
 0xaf0   : > { %2998 = vmatprep.subr.bf16.mxu0 %v5560_v51  ;;  %3039 = vmatprep.subr.bf16.mxu1 %v5565_v57 }
 0xaf3   : > { %2999 = vmatpush1.bf16.msra.mxu0 %v5568_v59  ;;  %3040 = vmatpush1.bf16.msra.mxu1 %v5571_v62 }
 0xaf4   : > { %3000 = vmatprep.subr.bf16.mxu0 %v5578_v31  ;;  %3041 = vmatprep.subr.bf16.mxu1 %v5581_v33 }
 0xaf7   : > { %3001 = vmatpush1.bf16.msra.mxu0 %v5588_v34  ;;  %3042 = vmatpush1.bf16.msra.mxu1 %v5591_v53 }
 0xaf8   : > { %3002 = vmatprep.subr.bf16.mxu0 %v5596_v21  ;;  %3043 = vmatprep.subr.bf16.mxu1 %v5599_v17 }
 0xafb   : > { %3003 = vmatpush1.bf16.msra.mxu0 %v5602_v15  ;;  %3044 = vmatpush1.bf16.msra.mxu1 %v5607_v12 }
 0xafc   : > { %3004 = vmatprep.subr.bf16.mxu0 %v5612_v58  ;;  %3045 = vmatprep.subr.bf16.mxu1 %v5615_v24 }
 0xaff   : > { %3005 = vmatpush1.bf16.msra.mxu0 %v5622_v35  ;;  %3046 = vmatpush1.bf16.msra.mxu1 %v5625_v11 }
 0xb00   : > { %3006 = vmatprep.subr.bf16.mxu0 %v5630_v23  ;;  %3047 = vmatprep.subr.bf16.mxu1 %v5633_v30 }
 0xb03   : > { %3007 = vmatpush1.bf16.msra.mxu0 %v5638_v25  ;;  %3048 = vmatpush1.bf16.msra.mxu1 %v5641_v9 }
 0xb04   : > { %3107 = vmatprep.subr.bf16.mxu0 %v5514_v38  ;;  %3148 = vmatprep.subr.bf16.mxu1 %v5517_v4 }
 0xbb9   : > { %v2911_v41 = vpop.f32.mrb[24].mxu0  ;;  %v2952_v61 = vpop.f32.mrb[24].mxu1 }
 0xbba   : > { %v2959_v40 = vadd.f32 %v2911_v41, %v5724_v37  ;;  %v2913_v1 = vpop.f32.mrb[25].mxu0  ;;  %v2954_v46 = vpop.f32.mrb[25].mxu1  ;;  %v2961_v36 = vadd.f32 %v2952_v61, %v5727_v29 }
 0xbbb   : > { %v2960_v8 = vadd.f32 %v2913_v1, %v5730_v28  ;;  %v2915_v0 = vpop.f32.mrb[26].mxu0  ;;  %v2956_v45 = vpop.f32.mrb[26].mxu1  ;;  %v2962_v54 = vadd.f32 %v2954_v46, %v5733_v7 }
 0xbbc   : > { %v3993_v39 = vmul.f32 -1.442695, %v2959_v40  ;;  %v2916_v32 = vpop.f32.mrb[27].mxu0  ;;  %v2957_v3 = vpop.f32.mrb[27].mxu1 }
 0xbbd   : > { %v3994_v48 = vmul.f32 -1.442695, %v2960_v8  ;;  %v3995_v2 = vmul.f32 -1.442695, %v2962_v54 }
 0xbbe   : > { %4459 = vpow2.f32 %v3993_v39 }
 0xbbf   : > { %4461 = vpow2.f32 %v3994_v48 }
 0xbc0   : > { %4463 = vpow2.f32 %v3995_v2 }
 0xbc1   : > { %4465 = vtanh.f32 %v2961_v36 }
 0xbc8   : > { %v4460_v10 = vpop.eup %4459 }
 0xbc9   : > { %v4462_v26 = vpop.eup %4461  ;;  %v2966_v37 = vadd.f32 1.0, %v4460_v10 }
 0xbca   : > { %v2972_v19 = vadd.f32 1.0, %v4462_v26  ;;  %v4464_v28 = vpop.eup %4463 }
 0xbcb   : > { %4467 = vrcp.f32 %v2966_v37  ;;  %v4466_v47 = vpop.eup %4465  ;;  %v2979_v49 = vadd.f32 1.0, %v4464_v28 }
 0xbcc   : > { %4469 = vrcp.f32 %v2972_v19 }
 0xbcd   : > { %4471 = vrcp.f32 %v2979_v49 }
 0xbd5   : > { %v4468_v44 = vpop.eup %4467 }
 0xbd6   : > { %v4470_v43 = vpop.eup %4469  ;;  %v2983_v6 = vmul.f32 %v4468_v44, %v4466_v47 }
 0xbd7   : > { %v2982_v41 = vmul.f32 %v4470_v43, %v5831_v13  ;;  %v4472_v29 = vpop.eup %4471 }
 0xbd9   : > { %v5873_v7 = vadd.f32 %v2983_v6, %v2982_v41 }
 0xbdb   : > { %4473 = vtanh.f32 %v5873_v7 }
 0xbe5   : > { %v4474_v61 = vpop.eup %4473 }
 0xbe6   : > { %v2986_v40 = vmul.f32 %v4474_v61, %v4472_v29 }
 0xbe8   : > { %v2991_v1 = vpack.c.bf16 %v2986_v40, %v2986_v40 }
 0xbea   : > { %3025 = vmatmul.mubr.bf16.vlgmr.msra.gmra.mrb[28].mxu0 %v2991_v1  ;;  %3066 = vmatmul.mubr.bf16.vlgmr.msra.gmra.mrb[28].mxu1 %v2991_v1 }
 0xbeb   : > { %3108 = vmatpush1.bf16.msra.mxu0 %v5520_v5  ;;  %3149 = vmatpush1.bf16.msra.mxu1 %v5523_v20 }
 0xbec   : > { %3109 = vmatprep.subr.bf16.mxu0 %v5528_v14  ;;  %3150 = vmatprep.subr.bf16.mxu1 %v5531_v27 }
 0xbed   : > { %3139 = vmatprep.mubr.bf16.mxu0 %v6223_v18  ;;  %3180 = vmatprep.mubr.bf16.mxu1 %v6223_v18 }
 0xbef   : > { %3110 = vmatpush1.bf16.msra.mxu0 %v5534_v22  ;;  %3151 = vmatpush1.bf16.msra.mxu1 %v5537_v16 }
 0xbf0   : > { %3111 = vmatprep.subr.bf16.mxu0 %v5542_v50  ;;  %3152 = vmatprep.subr.bf16.mxu1 %v5547_v52 }
 0xbf3   : > { %3112 = vmatpush1.bf16.msra.mxu0 %v5552_v55  ;;  %3153 = vmatpush1.bf16.msra.mxu1 %v5555_v56 }
 0xbf4   : > { %3113 = vmatprep.subr.bf16.mxu0 %v5560_v51  ;;  %3154 = vmatprep.subr.bf16.mxu1 %v5565_v57 }
 0xbf7   : > { %3114 = vmatpush1.bf16.msra.mxu0 %v5568_v59  ;;  %3155 = vmatpush1.bf16.msra.mxu1 %v5571_v62 }
 0xbf8   : > { %3115 = vmatprep.subr.bf16.mxu0 %v5578_v31  ;;  %3156 = vmatprep.subr.bf16.mxu1 %v5581_v33 }
 0xbfb   : > { %3116 = vmatpush1.bf16.msra.mxu0 %v5588_v34  ;;  %3157 = vmatpush1.bf16.msra.mxu1 %v5591_v53 }
 0xbfc   : > { %3117 = vmatprep.subr.bf16.mxu0 %v5596_v21  ;;  %3158 = vmatprep.subr.bf16.mxu1 %v5599_v17 }
 0xbff   : > { %3118 = vmatpush1.bf16.msra.mxu0 %v5602_v15  ;;  %3159 = vmatpush1.bf16.msra.mxu1 %v5607_v12 }
 0xc00   : > { %3119 = vmatprep.subr.bf16.mxu0 %v5612_v58  ;;  %3160 = vmatprep.subr.bf16.mxu1 %v5615_v24 }
 0xc03   : > { %3120 = vmatpush1.bf16.msra.mxu0 %v5622_v35  ;;  %3161 = vmatpush1.bf16.msra.mxu1 %v5625_v11 }
 0xc04   : > { %3121 = vmatprep.subr.bf16.mxu0 %v5630_v23  ;;  %3162 = vmatprep.subr.bf16.mxu1 %v5633_v30 }
 0xc07   : > { %3122 = vmatpush1.bf16.msra.mxu0 %v5638_v25  ;;  %3163 = vmatpush1.bf16.msra.mxu1 %v5641_v9 }
 0xc08   : > { %3222 = vmatprep.subr.bf16.mxu0 %v5514_v38  ;;  %3263 = vmatprep.subr.bf16.mxu1 %v5517_v4  ;;  %v6224_v4 = vld [vmem:[#allocation23_spill] sm:$0xff] }
 0xcbd   : > { %v3026_v13 = vpop.f32.mrb[28].mxu0  ;;  %v3067_v46 = vpop.f32.mrb[28].mxu1 }
 0xcbe   : > { %v3074_v8 = vadd.f32 %v3026_v13, %v5735_v42  ;;  %v3028_v0 = vpop.f32.mrb[29].mxu0  ;;  %v3069_v45 = vpop.f32.mrb[29].mxu1  ;;  %v3076_v26 = vadd.f32 %v3067_v46, %v6224_v4  ;;  %v6001_v4 = vld [vmem:[%s4757_s15 + $0x40] ss:$16 sps:$4 sm:$0xff]  }
 0xcbf   : > { %v3075_v39 = vadd.f32 %v3028_v0, %v5741_v60  ;;  %v3030_v32 = vpop.f32.mrb[30].mxu0  ;;  %v3071_v3 = vpop.f32.mrb[30].mxu1  ;;  %v3077_v38 = vadd.f32 %v3069_v45, %v5744_v63 }
 0xcc0   : > { %v3996_v48 = vmul.f32 -1.442695, %v3074_v8  ;;  %v3031_v54 = vpop.f32.mrb[31].mxu0  ;;  %v3072_v2 = vpop.f32.mrb[31].mxu1  ;;  %v5967_v32 = vld [vmem:[%s4757_s15] ss:$16 sps:$4 sm:$0xff]  }
 0xcc1   : > { %v3997_v36 = vmul.f32 -1.442695, %v3075_v39  ;;  %v3998_v10 = vmul.f32 -1.442695, %v3077_v38  ;;  %v5971_v3 = vld [vmem:[%s4757_s15 + $0x8] ss:$16 sps:$4 sm:$0xff]  }
 0xcc2   : > { %4475 = vpow2.f32 %v3996_v48  ;;  %v5975_v48 = vld [vmem:[%s4757_s15 + $0x24] ss:$16 sps:$4 sm:$0xff]   ;;  %v5979_v54 = vld [vmem:[%s4757_s15 + $0x2c] ss:$16 sps:$4 sm:$0xff]   ;;  %v5985_v2 = vld [vmem:[%s4757_s15 + $0x20] ss:$16 sps:$4 sm:$0xff]  }
 0xcc3   : > { %4477 = vpow2.f32 %v3997_v36  ;;  %v5989_v36 = vld [vmem:[%s4757_s15 + $0x28] ss:$16 sps:$4 sm:$0xff]   ;;  %v5993_v38 = vld [vmem:[%s4757_s15 + $0x44] ss:$16 sps:$4 sm:$0xff]  }
 0xcc4   : > { %4479 = vpow2.f32 %v3998_v10  ;;  %v5997_v10 = vld [vmem:[%s4757_s15 + $0x4c] ss:$16 sps:$4 sm:$0xff]  }
 0xcc5   : > { %4481 = vtanh.f32 %v3076_v26  ;;  %v6005_v26 = vld [vmem:[%s4757_s15 + $0x48] ss:$16 sps:$4 sm:$0xff]  }
 0xccc   : > { %v4476_v37 = vpop.eup %4475 }
 0xccd   : > { %v4478_v19 = vpop.eup %4477  ;;  %v3081_v42 = vadd.f32 1.0, %v4476_v37  ;;  %v6009_v37 = vld [vmem:[%s4757_s15 + $0x64] ss:$16 sps:$4 sm:$0xff]  }
 0xcce   : > { %v3087_v28 = vadd.f32 1.0, %v4478_v19  ;;  %v4480_v60 = vpop.eup %4479  ;;  %v6013_v19 = vld [vmem:[%s4757_s15 + $0x6c] ss:$16 sps:$4 sm:$0xff]  }
 0xccf   : > { %4483 = vrcp.f32 %v3081_v42  ;;  %v4482_v47 = vpop.eup %4481  ;;  %v3094_v49 = vadd.f32 1.0, %v4480_v60  ;;  %v6017_v42 = vld [vmem:[%s4757_s15 + $0x60] ss:$16 sps:$4 sm:$0xff]   ;;  %v6025_v60 = vld [vmem:[%s4757_s15 + $0x84] ss:$16 sps:$4 sm:$0xff]  }
 0xcd0   : > { %4485 = vrcp.f32 %v3087_v28  ;;  %v6021_v28 = vld [vmem:[%s4757_s15 + $0x68] ss:$16 sps:$4 sm:$0xff]  }
 0xcd1   : > { %4487 = vrcp.f32 %v3094_v49  ;;  %v6045_v49 = vld [vmem:[%s4757_s15 + $0xac] ss:$16 sps:$4 sm:$0xff]  }
 0xcd9   : > { %v4484_v44 = vpop.eup %4483 }
 0xcda   : > { %v4486_v43 = vpop.eup %4485  ;;  %v3098_v6 = vmul.f32 %v4484_v44, %v4482_v47  ;;  %v6029_v47 = vld [vmem:[%s4757_s15 + $0x8c] ss:$16 sps:$4 sm:$0xff]   ;;  %v6033_v44 = vld [vmem:[%s4757_s15 + $0x80] ss:$16 sps:$4 sm:$0xff]  }
 0xcdb   : > { %v3097_v41 = vmul.f32 %v4486_v43, %v5873_v7  ;;  %v4488_v29 = vpop.eup %4487  ;;  %v6037_v43 = vld [vmem:[%s4757_s15 + $0x88] ss:$16 sps:$4 sm:$0xff]  }
 0xcdd   : > { %v5915_v63 = vadd.f32 %v3098_v6, %v3097_v41  ;;  %v6041_v6 = vld [vmem:[%s4757_s15 + $0xa4] ss:$16 sps:$4 sm:$0xff]   ;;  %v6049_v41 = vld [vmem:[%s4757_s15 + $0xa0] ss:$16 sps:$4 sm:$0xff]  }
 0xcdf   : > { %4489 = vtanh.f32 %v5915_v63 }
 0xce9   : > { %v4490_v61 = vpop.eup %4489 }
 0xcea   : > { %v3101_v40 = vmul.f32 %v4490_v61, %v4488_v29  ;;  %v6057_v29 = vld [vmem:[%s4757_s15 + $0xc4] ss:$16 sps:$4 sm:$0xff]   ;;  %v6061_v61 = vld [vmem:[%s4757_s15 + $0xcc] ss:$16 sps:$4 sm:$0xff]  }
 0xcec   : > { %v3106_v1 = vpack.c.bf16 %v3101_v40, %v3101_v40  ;;  %v6065_v40 = vld [vmem:[%s4757_s15 + $0xc0] ss:$16 sps:$4 sm:$0xff]  }
 0xcee   : > { %3140 = vmatmul.mubr.bf16.vlgmr.msra.gmra.mrb[32].mxu0 %v3106_v1  ;;  %3181 = vmatmul.mubr.bf16.vlgmr.msra.gmra.mrb[32].mxu1 %v3106_v1  ;;  %v6069_v1 = vld [vmem:[%s4757_s15 + $0xc8] ss:$16 sps:$4 sm:$0xff]  }
 0xcef   : > { %3223 = vmatpush1.bf16.msra.mxu0 %v5520_v5  ;;  %3264 = vmatpush1.bf16.msra.mxu1 %v5523_v20  ;;  %v5951_v5 = vld [vmem:[%s4757_s15 + $0x4] ss:$16 sps:$4 sm:$0xff]   ;;  %v5955_v20 = vld [vmem:[%s4757_s15 + $0xc] ss:$16 sps:$4 sm:$0xff]  }
 0xcf0   : > { %3224 = vmatprep.subr.bf16.mxu0 %v5528_v14  ;;  %3265 = vmatprep.subr.bf16.mxu1 %v5531_v27 }
 0xcf1   : > { %3254 = vmatprep.mubr.bf16.mxu0 %v6223_v18  ;;  %3295 = vmatprep.mubr.bf16.mxu1 %v6223_v18 }
 0xcf3   : > { %3225 = vmatpush1.bf16.msra.mxu0 %v5534_v22  ;;  %3266 = vmatpush1.bf16.msra.mxu1 %v5537_v16  ;;  %v6225_v22 = vld [vmem:[#allocation24_spill] sm:$0xff] }
 0xcf4   : > { %3226 = vmatprep.subr.bf16.mxu0 %v5542_v50  ;;  %3267 = vmatprep.subr.bf16.mxu1 %v5547_v52 }
 0xcf7   : > { %3227 = vmatpush1.bf16.msra.mxu0 %v5552_v55  ;;  %3268 = vmatpush1.bf16.msra.mxu1 %v5555_v56  ;;  %v6226_v55 = vld [vmem:[#allocation26_spill] sm:$0xff] }
 0xcf8   : > { %3228 = vmatprep.subr.bf16.mxu0 %v5560_v51  ;;  %3269 = vmatprep.subr.bf16.mxu1 %v5565_v57 }
 0xcfb   : > { %3229 = vmatpush1.bf16.msra.mxu0 %v5568_v59  ;;  %3270 = vmatpush1.bf16.msra.mxu1 %v5571_v62 }
 0xcfc   : > { %3230 = vmatprep.subr.bf16.mxu0 %v5578_v31  ;;  %3271 = vmatprep.subr.bf16.mxu1 %v5581_v33 }
 0xcff   : > { %3231 = vmatpush1.bf16.msra.mxu0 %v5588_v34  ;;  %3272 = vmatpush1.bf16.msra.mxu1 %v5591_v53  ;;  %v6227_v34 = vld [vmem:[#allocation27_spill] sm:$0xff] }
 0xd00   : > { %3232 = vmatprep.subr.bf16.mxu0 %v5596_v21  ;;  %3273 = vmatprep.subr.bf16.mxu1 %v5599_v17  ;;  %v6228_v17 = vld [vmem:[#allocation25_spill] sm:$0xff] }
 0xd03   : > { %3233 = vmatpush1.bf16.msra.mxu0 %v5602_v15  ;;  %3274 = vmatpush1.bf16.msra.mxu1 %v5607_v12 }
 0xd04   : > { %3234 = vmatprep.subr.bf16.mxu0 %v5612_v58  ;;  %3275 = vmatprep.subr.bf16.mxu1 %v5615_v24 }
 0xd07   : > { %3235 = vmatpush1.bf16.msra.mxu0 %v5622_v35  ;;  %3276 = vmatpush1.bf16.msra.mxu1 %v5625_v11 }
 0xd08   : > { %3236 = vmatprep.subr.bf16.mxu0 %v5630_v23  ;;  %3277 = vmatprep.subr.bf16.mxu1 %v5633_v30 }
 0xd0b   : > { %3237 = vmatpush1.bf16.msra.mxu0 %v5638_v25  ;;  %3278 = vmatpush1.bf16.msra.mxu1 %v5641_v9 }
 0xd0c   : > { %3337 = vmatprep.subr.bf16.mxu0 %v5951_v5  ;;  %3378 = vmatprep.subr.bf16.mxu1 %v5955_v20 }
 0xdc1   : > { %v3141_v14 = vpop.f32.mrb[32].mxu0  ;;  %v3182_v27 = vpop.f32.mrb[32].mxu1 }
 0xdc2   : > { %v3189_v16 = vadd.f32 %v3141_v14, %v6225_v22  ;;  %v3143_v50 = vpop.f32.mrb[33].mxu0  ;;  %v3184_v52 = vpop.f32.mrb[33].mxu1  ;;  %v3191_v15 = vadd.f32 %v3182_v27, %v6228_v17  ;;  %v6073_v14 = vld [vmem:[%s4757_s15 + $0xe4] ss:$16 sps:$4 sm:$0xff]   ;;  %v6077_v27 = vld [vmem:[%s4757_s15 + $0xec] ss:$16 sps:$4 sm:$0xff]  }
 0xdc3   : > { %v3190_v56 = vadd.f32 %v3143_v50, %v6226_v55  ;;  %v3145_v51 = vpop.f32.mrb[34].mxu0  ;;  %v3186_v57 = vpop.f32.mrb[34].mxu1  ;;  %v3192_v53 = vadd.f32 %v3184_v52, %v6227_v34  ;;  %v6081_v22 = vld [vmem:[%s4757_s15 + $0xe0] ss:$16 sps:$4 sm:$0xff]  }
 0xdc4   : > { %v3999_v59 = vmul.f32 -1.442695, %v3189_v16  ;;  %v3146_v62 = vpop.f32.mrb[35].mxu0  ;;  %v3187_v31 = vpop.f32.mrb[35].mxu1  ;;  %v6085_v16 = vld [vmem:[%s4757_s15 + $0xe8] ss:$16 sps:$4 sm:$0xff]  }
 0xdc5   : > { %v4000_v33 = vmul.f32 -1.442695, %v3190_v56  ;;  %v4001_v21 = vmul.f32 -1.442695, %v3192_v53  ;;  %v6229_v55 = vld [vmem:[#allocation28_spill] sm:$0xff] }
 0xdc6   : > { %4491 = vpow2.f32 %v3999_v59  ;;  %v6230_v59 = vld [vmem:[#allocation30_spill] sm:$0xff] }
 0xdc7   : > { %4493 = vpow2.f32 %v4000_v33 }
 0xdc8   : > { %4495 = vpow2.f32 %v4001_v21 }
 0xdc9   : > { %4497 = vtanh.f32 %v3191_v15  ;;  %v6231_v15 = vld [vmem:[#allocation31_spill] sm:$0xff] }
 0xdd0   : > { %v4492_v12 = vpop.eup %4491 }
 0xdd1   : > { %v4494_v58 = vpop.eup %4493  ;;  %v3196_v24 = vadd.f32 1.0, %v4492_v12 }
 0xdd2   : > { %v3202_v35 = vadd.f32 1.0, %v4494_v58  ;;  %v4496_v11 = vpop.eup %4495 }
 0xdd3   : > { %4499 = vrcp.f32 %v3196_v24  ;;  %v4498_v23 = vpop.eup %4497  ;;  %v3209_v7 = vadd.f32 1.0, %v4496_v11 }
 0xdd4   : > { %4501 = vrcp.f32 %v3202_v35 }
 0xdd5   : > { %4503 = vrcp.f32 %v3209_v7 }
 0xddd   : > { %v4500_v30 = vpop.eup %4499 }
 0xdde   : > { %v4502_v25 = vpop.eup %4501  ;;  %v3213_v9 = vmul.f32 %v4500_v30, %v4498_v23 }
 0xddf   : > { %v3212_v13 = vmul.f32 %v4502_v25, %v5915_v63  ;;  %v4504_v8 = vpop.eup %4503  ;;  %v6053_v63 = vld [vmem:[%s4757_s15 + $0xa8] ss:$16 sps:$4 sm:$0xff]  }
 0xde1   : > { %v5963_v46 = vadd.f32 %v3213_v9, %v3212_v13 }
 0xde3   : > { %4505 = vtanh.f32 %v5963_v46 }
 0xded   : > { %v4506_v0 = vpop.eup %4505 }
 0xdee   : > { %v3216_v45 = vmul.f32 %v4506_v0, %v4504_v8 }
 0xdf0   : > { %v3221_v39 = vpack.c.bf16 %v3216_v45, %v3216_v45 }
 0xdf2   : > { %3255 = vmatmul.mubr.bf16.vlgmr.msra.gmra.mrb[36].mxu0 %v3221_v39  ;;  %3296 = vmatmul.mubr.bf16.vlgmr.msra.gmra.mrb[36].mxu1 %v3221_v39 }
 0xdf3   : > { %3338 = vmatpush1.bf16.msra.mxu0 %v5967_v32  ;;  %3379 = vmatpush1.bf16.msra.mxu1 %v5971_v3 }
 0xdf4   : > { %3339 = vmatprep.subr.bf16.mxu0 %v5975_v48  ;;  %3380 = vmatprep.subr.bf16.mxu1 %v5979_v54 }
 0xdf5   : > { %3369 = vmatprep.mubr.bf16.mxu0 %v6223_v18  ;;  %3410 = vmatprep.mubr.bf16.mxu1 %v6223_v18 }
 0xdf7   : > { %3340 = vmatpush1.bf16.msra.mxu0 %v5985_v2  ;;  %3381 = vmatpush1.bf16.msra.mxu1 %v5989_v36 }
 0xdf8   : > { %3341 = vmatprep.subr.bf16.mxu0 %v5993_v38  ;;  %3382 = vmatprep.subr.bf16.mxu1 %v5997_v10 }
 0xdfb   : > { %3342 = vmatpush1.bf16.msra.mxu0 %v6001_v4  ;;  %3383 = vmatpush1.bf16.msra.mxu1 %v6005_v26 }
 0xdfc   : > { %3343 = vmatprep.subr.bf16.mxu0 %v6009_v37  ;;  %3384 = vmatprep.subr.bf16.mxu1 %v6013_v19 }
 0xdff   : > { %3344 = vmatpush1.bf16.msra.mxu0 %v6017_v42  ;;  %3385 = vmatpush1.bf16.msra.mxu1 %v6021_v28 }
 0xe00   : > { %3345 = vmatprep.subr.bf16.mxu0 %v6025_v60  ;;  %3386 = vmatprep.subr.bf16.mxu1 %v6029_v47 }
 0xe03   : > { %3346 = vmatpush1.bf16.msra.mxu0 %v6033_v44  ;;  %3387 = vmatpush1.bf16.msra.mxu1 %v6037_v43 }
 0xe04   : > { %3347 = vmatprep.subr.bf16.mxu0 %v6041_v6  ;;  %3388 = vmatprep.subr.bf16.mxu1 %v6045_v49 }
 0xe07   : > { %3348 = vmatpush1.bf16.msra.mxu0 %v6049_v41  ;;  %3389 = vmatpush1.bf16.msra.mxu1 %v6053_v63 }
 0xe08   : > { %3349 = vmatprep.subr.bf16.mxu0 %v6057_v29  ;;  %3390 = vmatprep.subr.bf16.mxu1 %v6061_v61 }
 0xe0b   : > { %3350 = vmatpush1.bf16.msra.mxu0 %v6065_v40  ;;  %3391 = vmatpush1.bf16.msra.mxu1 %v6069_v1 }
 0xe0c   : > { %3351 = vmatprep.subr.bf16.mxu0 %v6073_v14  ;;  %3392 = vmatprep.subr.bf16.mxu1 %v6077_v27 }
 0xe0f   : > { %3352 = vmatpush1.bf16.msra.mxu0 %v6081_v22  ;;  %3393 = vmatpush1.bf16.msra.mxu1 %v6085_v16 }
 0xe10   : > { %3452 = vmatprep.subr.bf16.mxu0 %v5951_v5  ;;  %3493 = vmatprep.subr.bf16.mxu1 %v5955_v20  ;;  %v6232_v20 = vld [vmem:[#allocation29_spill] sm:$0xff] }
 0xec5   : > { %v3256_v50 = vpop.f32.mrb[36].mxu0  ;;  %v3297_v52 = vpop.f32.mrb[36].mxu1 }
 0xec6   : > { %v3304_v56 = vadd.f32 %v3256_v50, %v6229_v55  ;;  %v3258_v51 = vpop.f32.mrb[37].mxu0  ;;  %v3299_v57 = vpop.f32.mrb[37].mxu1  ;;  %v3306_v58 = vadd.f32 %v3297_v52, %v6232_v20 }
 0xec7   : > { %v3305_v62 = vadd.f32 %v3258_v51, %v6230_v59  ;;  %v3260_v31 = vpop.f32.mrb[38].mxu0  ;;  %v3301_v33 = vpop.f32.mrb[38].mxu1  ;;  %v3307_v5 = vadd.f32 %v3299_v57, %v6231_v15  ;;  %v3447_v59 = vld [vmem:[#allocation2 + $0xe0] sm:$0xff] }
 0xec8   : > { %v4002_v34 = vmul.f32 -1.442695, %v3304_v56  ;;  %v3261_v53 = vpop.f32.mrb[39].mxu0  ;;  %v3302_v21 = vpop.f32.mrb[39].mxu1 }
 0xec9   : > { %v4003_v17 = vmul.f32 -1.442695, %v3305_v62  ;;  %v4004_v12 = vmul.f32 -1.442695, %v3307_v5 }
 0xeca   : > { %4507 = vpow2.f32 %v4002_v34  ;;  %v3448_v34 = vld [vmem:[#allocation2 + $0xe8] sm:$0xff] }
 0xecb   : > { %4509 = vpow2.f32 %v4003_v17 }
 0xecc   : > { %4511 = vpow2.f32 %v4004_v12 }
 0xecd   : > { %4513 = vtanh.f32 %v3306_v58 }
 0xed4   : > { %v4508_v24 = vpop.eup %4507 }
 0xed5   : > { %v4510_v35 = vpop.eup %4509  ;;  %v3311_v11 = vadd.f32 1.0, %v4508_v24 }
 0xed6   : > { %v3317_v23 = vadd.f32 1.0, %v4510_v35  ;;  %v4512_v30 = vpop.eup %4511  ;;  %v3450_v35 = vld [vmem:[#allocation2 + $0xf8] sm:$0xff] }
 0xed7   : > { %4515 = vrcp.f32 %v3311_v11  ;;  %v4514_v25 = vpop.eup %4513  ;;  %v3324_v8 = vadd.f32 1.0, %v4512_v30  ;;  %v6237_v30 = vld [vmem:[#allocation36_spill] sm:$0xff] }
 0xed8   : > { %4517 = vrcp.f32 %v3317_v23 }
 0xed9   : > { %4519 = vrcp.f32 %v3324_v8 }
 0xee1   : > { %v4516_v9 = vpop.eup %4515 }
 0xee2   : > { %v4518_v7 = vpop.eup %4517  ;;  %v3328_v13 = vmul.f32 %v4516_v9, %v4514_v25 }
 0xee3   : > { %v3327_v0 = vmul.f32 %v4518_v7, %v5963_v46  ;;  %v4520_v39 = vpop.eup %4519 }
 0xee5   : > { %v6095_v45 = vadd.f32 %v3328_v13, %v3327_v0 }
 0xee7   : > { %4521 = vtanh.f32 %v6095_v45 }
 0xef1   : > { %v4522_v50 = vpop.eup %4521 }
 0xef2   : > { %v3331_v52 = vmul.f32 %v4522_v50, %v4520_v39 }
 0xef4   : > { %v3336_v55 = vpack.c.bf16 %v3331_v52, %v3331_v52 }
 0xef6   : > { %3370 = vmatmul.mubr.bf16.vlgmr.msra.gmra.mrb[40].mxu0 %v3336_v55  ;;  %3411 = vmatmul.mubr.bf16.vlgmr.msra.gmra.mrb[40].mxu1 %v3336_v55 }
 0xef7   : > { %3453 = vmatpush1.bf16.msra.mxu0 %v5967_v32  ;;  %3494 = vmatpush1.bf16.msra.mxu1 %v5971_v3  ;;  %v6233_v32 = vld [vmem:[#allocation32_spill] sm:$0xff] }
 0xef8   : > { %3454 = vmatprep.subr.bf16.mxu0 %v5975_v48  ;;  %3495 = vmatprep.subr.bf16.mxu1 %v5979_v54 }
 0xef9   : > { %3484 = vmatprep.mubr.bf16.mxu0 %v6223_v18  ;;  %3525 = vmatprep.mubr.bf16.mxu1 %v6223_v18 }
 0xefb   : > { %3455 = vmatpush1.bf16.msra.mxu0 %v5985_v2  ;;  %3496 = vmatpush1.bf16.msra.mxu1 %v5989_v36  ;;  %v6234_v2 = vld [vmem:[#allocation34_spill] sm:$0xff] }
 0xefc   : > { %3456 = vmatprep.subr.bf16.mxu0 %v5993_v38  ;;  %3497 = vmatprep.subr.bf16.mxu1 %v5997_v10 }
 0xeff   : > { %3457 = vmatpush1.bf16.msra.mxu0 %v6001_v4  ;;  %3498 = vmatpush1.bf16.msra.mxu1 %v6005_v26 }
 0xf00   : > { %3458 = vmatprep.subr.bf16.mxu0 %v6009_v37  ;;  %3499 = vmatprep.subr.bf16.mxu1 %v6013_v19 }
 0xf03   : > { %3459 = vmatpush1.bf16.msra.mxu0 %v6017_v42  ;;  %3500 = vmatpush1.bf16.msra.mxu1 %v6021_v28  ;;  %v6235_v42 = vld [vmem:[#allocation35_spill] sm:$0xff] }
 0xf04   : > { %3460 = vmatprep.subr.bf16.mxu0 %v6025_v60  ;;  %3501 = vmatprep.subr.bf16.mxu1 %v6029_v47  ;;  %v6236_v47 = vld [vmem:[#allocation33_spill] sm:$0xff] }
 0xf07   : > { %3461 = vmatpush1.bf16.msra.mxu0 %v6033_v44  ;;  %3502 = vmatpush1.bf16.msra.mxu1 %v6037_v43 }
 0xf08   : > { %3462 = vmatprep.subr.bf16.mxu0 %v6041_v6  ;;  %3503 = vmatprep.subr.bf16.mxu1 %v6045_v49 }
 0xf0b   : > { %3463 = vmatpush1.bf16.msra.mxu0 %v6049_v41  ;;  %3504 = vmatpush1.bf16.msra.mxu1 %v6053_v63 }
 0xf0c   : > { %3464 = vmatprep.subr.bf16.mxu0 %v6057_v29  ;;  %3505 = vmatprep.subr.bf16.mxu1 %v6061_v61 }
 0xf0f   : > { %3465 = vmatpush1.bf16.msra.mxu0 %v6065_v40  ;;  %3506 = vmatpush1.bf16.msra.mxu1 %v6069_v1 }
 0xf10   : > { %3466 = vmatprep.subr.bf16.mxu0 %v6073_v14  ;;  %3507 = vmatprep.subr.bf16.mxu1 %v6077_v27 }
 0xf13   : > { %3467 = vmatpush1.bf16.msra.mxu0 %v6081_v22  ;;  %3508 = vmatpush1.bf16.msra.mxu1 %v6085_v16 }
 0xfc9   : > { %v3371_v18 = vpop.f32.mrb[40].mxu0  ;;  %v3412_v46 = vpop.f32.mrb[40].mxu1 }
 0xfca   : > { %v3419_v3 = vadd.f32 %v3371_v18, %v6233_v32  ;;  %v3373_v48 = vpop.f32.mrb[41].mxu0  ;;  %v3414_v54 = vpop.f32.mrb[41].mxu1  ;;  %v3421_v44 = vadd.f32 %v3412_v46, %v6236_v47 }
 0xfcb   : > { %v3420_v36 = vadd.f32 %v3373_v48, %v6234_v2  ;;  %v3375_v38 = vpop.f32.mrb[42].mxu0  ;;  %v3416_v10 = vpop.f32.mrb[42].mxu1  ;;  %v3422_v28 = vadd.f32 %v3414_v54, %v6235_v42 }
 0xfcc   : > { %v4005_v4 = vmul.f32 -1.442695, %v3419_v3  ;;  %v3376_v26 = vpop.f32.mrb[43].mxu0  ;;  %v3417_v37 = vpop.f32.mrb[43].mxu1 }
 0xfcd   : > { %v4006_v19 = vmul.f32 -1.442695, %v3420_v36  ;;  %v4007_v60 = vmul.f32 -1.442695, %v3422_v28 }
 0xfce   : > { %4523 = vpow2.f32 %v4005_v4 }
 0xfcf   : > { %4525 = vpow2.f32 %v4006_v19 }
 0xfd0   : > { %4527 = vpow2.f32 %v4007_v60 }
 0xfd1   : > { %4529 = vtanh.f32 %v3421_v44 }
 0xfd8   : > { %v4524_v43 = vpop.eup %4523 }
 0xfd9   : > { %v4526_v6 = vpop.eup %4525  ;;  %v3426_v49 = vadd.f32 1.0, %v4524_v43 }
 0xfda   : > { %v3432_v41 = vadd.f32 1.0, %v4526_v6  ;;  %v4528_v63 = vpop.eup %4527 }
 0xfdb   : > { %4531 = vrcp.f32 %v3426_v49  ;;  %v4530_v29 = vpop.eup %4529  ;;  %v3439_v14 = vadd.f32 1.0, %v4528_v63 }
 0xfdc   : > { %4533 = vrcp.f32 %v3432_v41 }
 0xfdd   : > { %4535 = vrcp.f32 %v3439_v14 }
 0xfe5   : > { %v4532_v61 = vpop.eup %4531 }
 0xfe6   : > { %v4534_v40 = vpop.eup %4533  ;;  %v3443_v1 = vmul.f32 %v4532_v61, %v4530_v29 }
 0xfe7   : > { %v3442_v27 = vmul.f32 %v4534_v40, %v6095_v45  ;;  %v4536_v16 = vpop.eup %4535 }
 0xfe9   : > { %v3444_v22 = vadd.f32 %v3443_v1, %v3442_v27 }
 0xfeb   : > { %4537 = vtanh.f32 %v3444_v22 }
 0xff5   : > { %v4538_v56 = vpop.eup %4537 }
 0xff6   : > { %v3446_v51 = vmul.f32 %v4538_v56, %v4536_v16 }
 0xff8   : > { %v3451_v57 = vpack.c.bf16 %v3446_v51, %v3446_v51 }
 0xffa   : > { %3485 = vmatmul.mubr.bf16.vlgmr.msra.gmra.mrb[44].mxu0 %v3451_v57  ;;  %3526 = vmatmul.mubr.bf16.vlgmr.msra.gmra.mrb[44].mxu1 %v3451_v57 }
0x10cd   : > { %v3486_v62 = vpop.f32.mrb[44].mxu0  ;;  %v3527_v31 = vpop.f32.mrb[44].mxu1 }
0x10ce   : > { %v3534_v33 = vadd.f32 %v3486_v62, %v3447_v59  ;;  %v3488_v53 = vpop.f32.mrb[45].mxu0  ;;  %v3529_v21 = vpop.f32.mrb[45].mxu1  ;;  %v3536_v25 = vadd.f32 %v3527_v31, %v6237_v30 }
0x10cf   : > { %v3535_v17 = vadd.f32 %v3488_v53, %v3448_v34  ;;  %v3490_v15 = vpop.f32.mrb[46].mxu0  ;;  %v3531_v5 = vpop.f32.mrb[46].mxu1  ;;  %v3537_v11 = vadd.f32 %v3529_v21, %v3450_v35 }
0x10d0   : > { %v4008_v12 = vmul.f32 -1.442695, %v3534_v33  ;;  %v3491_v20 = vpop.f32.mrb[47].mxu0  ;;  %v3532_v58 = vpop.f32.mrb[47].mxu1 }
0x10d1   : > { %v4009_v24 = vmul.f32 -1.442695, %v3535_v17  ;;  %v4010_v23 = vmul.f32 -1.442695, %v3537_v11 }
0x10d2   : > { %4539 = vpow2.f32 %v4008_v12 }
0x10d3   : > { %4541 = vpow2.f32 %v4009_v24 }
0x10d4   : > { %4543 = vpow2.f32 %v4010_v23 }
0x10d5   : > { %4545 = vtanh.f32 %v3536_v25 }
0x10dc   : > { %v4540_v9 = vpop.eup %4539 }
0x10dd   : > { %v4542_v7 = vpop.eup %4541  ;;  %v3541_v13 = vadd.f32 1.0, %v4540_v9 }
0x10de   : > { %v3547_v8 = vadd.f32 1.0, %v4542_v7  ;;  %v4544_v0 = vpop.eup %4543 }
0x10df   : > { %4547 = vrcp.f32 %v3541_v13  ;;  %v4546_v45 = vpop.eup %4545  ;;  %v3554_v55 = vadd.f32 1.0, %v4544_v0 }
0x10e0   : > { %4549 = vrcp.f32 %v3547_v8 }
0x10e1   : > { %4551 = vrcp.f32 %v3554_v55 }
0x10e9   : > { %v4548_v39 = vpop.eup %4547 }
0x10ea   : > { %v4550_v50 = vpop.eup %4549  ;;  %v3558_v52 = vmul.f32 %v4548_v39, %v4546_v45 }
0x10eb   : > { %v3557_v18 = vmul.f32 %v4550_v50, %v3444_v22  ;;  %v4552_v32 = vpop.eup %4551 }
0x10ed   : > { %v3559_v46 = vadd.f32 %v3558_v52, %v3557_v18 }
0x10ef   : > { %4553 = vtanh.f32 %v3559_v46 }
0x10f9   : > { %v4554_v3 = vpop.eup %4553 }
0x10fa   : > { %v3561_v48 = vmul.f32 %v4554_v3, %v4552_v32 }
0x10fc   : > { %3562 = vst [vmem:[#allocation4] sm:$0xff] %v3561_v48 }
0x10fd PF: > { %v4587_v54 = vld [vmem:[%s4734_s19] sm:$0xff]   ;;  %v4633_v2 = vmov 0.0   ;;  %v4588_v36 = vld [vmem:[%s4734_s19 + $0x8] sm:$0xff]   ;;  %vm4634_vm0 = vmmov 0   ;;  %v4589_v38 = vld [vmem:[%s4734_s19 + $0x10] sm:$0xff]  }
0x10fe   : > { %4036 = vmatprep.subr.bf16.mxu0 %v4633_v2  ;;  %4052 = vmatprep.mubr.msk.bf16.mxu0 %vm4634_vm0, %v4633_v2  ;;  %v4590_v10 = vld [vmem:[%s4734_s19 + $0x18] sm:$0xff]   ;;  %v4591_v4 = vld [vmem:[%s4734_s19 + $0x20] sm:$0xff]   ;;  %v4592_v26 = vld [vmem:[%s4734_s19 + $0x28] sm:$0xff]  }
0x10ff   : > { %4037 = vmatpush3.bf16.msra.mxu0 %v4587_v54  ;;  %v4593_v37 = vld [vmem:[%s4734_s19 + $0x30] sm:$0xff]   ;;  %v4594_v19 = vld [vmem:[%s4734_s19 + $0x38] sm:$0xff]   ;;  %v4011_v60 = vld [vmem:[%s487_s23] ss:$0 sm:$0xff] }
0x1100   : > { %4038 = vmatprep.subr.bf16.mxu0 %v4633_v2 }
0x1103   : > { %4039 = vmatpush3.bf16.msra.mxu0 %v4588_v36  ;;  %v3563_v42 = vld [vmem:[#allocation4] sm:$0xff] }
0x1104   : > { %4040 = vmatprep.subr.bf16.mxu0 %v4633_v2  ;;  %v3564_v28 = vpack.c.bf16 %v3563_v42, %v3563_v42 }
0x1107   : > { %4041 = vmatpush3.bf16.msra.mxu0 %v4589_v38 }
0x1108   : > { %4042 = vmatprep.subr.bf16.mxu0 %v4633_v2 }
0x110b   : > { %4043 = vmatpush3.bf16.msra.mxu0 %v4590_v10 }
0x110c   : > { %4044 = vmatprep.subr.bf16.mxu0 %v4633_v2 }
0x110f   : > { %4045 = vmatpush3.bf16.msra.mxu0 %v4591_v4 }
0x1110   : > { %4046 = vmatprep.subr.bf16.mxu0 %v4633_v2 }
0x1113   : > { %4047 = vmatpush3.bf16.msra.mxu0 %v4592_v26 }
0x1114   : > { %4048 = vmatprep.subr.bf16.mxu0 %v4633_v2 }
0x1117   : > { %4049 = vmatpush3.bf16.msra.mxu0 %v4593_v37 }
0x1118   : > { %4050 = vmatprep.subr.bf16.mxu0 %v4633_v2 }
0x111b   : > { %4051 = vmatpush3.bf16.msra.mxu0 %v4594_v19 }
0x111e   : > { %4053 = vmatmul.mubr.bf16.vlgmr.msra.gmra.mrb[0].mxu0 %v3564_v28 }
0x11f1   : > { %v3670_v47 = vpop.f32.mrb[0].mxu0 }
0x11f2   : > { %v3671_v44 = vadd.f32 %v4011_v60, %v3670_v47  ;;  %v4054_v43 = vpop.f32.mrb[1].mxu0 }
0x11f3   : > { %v3673_v6 = vpop.f32.mrb[2].mxu0 }
0x11f4   : > { %3676 = vst [vmem:[%s4769_s20] sm:$0xff] %v3671_v44  ;;  %v4055_v49 = vpop.f32.mrb[3].mxu0 }
0x11f5 PF: > { %s31_s1 = sadd.s32 1, %s4627_s1  }
0x11f6   : > { %p28_p5 = scmp.ge.s32.totalorder %s31_s1, 5  }
0x11f8   :  { %30 = sbr.rel (!%p28_p5) target bundleno = 26 (0x1a), region = 115 }

</bundles_post_ra>
